<compile_context>
chip_gen: v7x
topology: tpu7x:2x2x1
jax: 0.10.0
libtpu: 0.0.40
codegen_flags: <defaults>
</compile_context>

<pallas_src>
import functools

import jax
import jax.numpy as jnp
from jax import lax
from jax.experimental import pallas as pl
from jax.experimental.pallas import tpu as pltpu


def _round_up(x, m):
    return (x + m - 1) // m * m


# ----------------------------------------------------------------------------
# Encoder kernel: full sequence in a single invocation
# ----------------------------------------------------------------------------
def encoder_lstm_kernel(x_ref, w_ih_ref, w_hh_ref, b_ref,
                        h_out_ref, c_out_ref, gx_sc):
    """x_ref: (T*B, E) time-major embedded inputs (flattened over (T, B)).
    gx_sc: (T*B, 4H) scratch for the batched input projections."""
    B, H = h_out_ref.shape
    T = x_ref.shape[0] // B

    # One big MXU pass for every timestep's input projection; bias added once
    # (hoisted out of the time loop).
    gx_sc[...] = (
        jnp.dot(x_ref[...], w_ih_ref[...], preferred_element_type=jnp.float32)
        + b_ref[...]
    )

    w_hh = w_hh_ref[...]
    h = jnp.zeros((B, H), jnp.float32)
    c = jnp.zeros((B, H), jnp.float32)

    # T is small and static -> fully unrolled, static sublane-aligned slices.
    for t in range(T):
        gates = gx_sc[t * B:(t + 1) * B, :] + jnp.dot(
            h, w_hh, preferred_element_type=jnp.float32)
        i = jax.nn.sigmoid(gates[:, 0 * H:1 * H])
        f = jax.nn.sigmoid(gates[:, 1 * H:2 * H])
        g = jnp.tanh(gates[:, 2 * H:3 * H])
        o = jax.nn.sigmoid(gates[:, 3 * H:4 * H])
        c = f * c + i * g
        h = o * jnp.tanh(c)

    h_out_ref[...] = h
    c_out_ref[...] = c


def run_encoder(emb_flat, w_ih, w_hh, b, batch):
    TB, E = emb_flat.shape
    H = w_hh.shape[0]
    return pl.pallas_call(
        encoder_lstm_kernel,
        out_shape=(
            jax.ShapeDtypeStruct((batch, H), jnp.float32),
            jax.ShapeDtypeStruct((batch, H), jnp.float32),
        ),
        grid_spec=pltpu.PrefetchScalarGridSpec(
            num_scalar_prefetch=0,
            grid=(1,),
            in_specs=[
                pl.BlockSpec((TB, E), lambda i: (0, 0)),
                pl.BlockSpec((E, 4 * H), lambda i: (0, 0)),
                pl.BlockSpec((H, 4 * H), lambda i: (0, 0)),
                pl.BlockSpec((1, 4 * H), lambda i: (0, 0)),
            ],
            out_specs=[
                pl.BlockSpec((batch, H), lambda i: (0, 0)),
                pl.BlockSpec((batch, H), lambda i: (0, 0)),
            ],
            scratch_shapes=[pltpu.VMEM((TB, 4 * H), jnp.float32)],
        ),
        compiler_params=pltpu.CompilerParams(
            dimension_semantics=("arbitrary",)),
    )(emb_flat, w_ih, w_hh, b)


# ----------------------------------------------------------------------------
# Decoder kernel: entire teacher-forcing loop in ONE pallas_call (grid = time)
# ----------------------------------------------------------------------------
def decoder_seq_kernel(tf_ref,              # SMEM (trg_len,) int32 (scalar prefetch)
                       trg0_ref,            # (B, V)  one-hot of trg[0]
                       trg_oh_ref,          # (1, B, V) one-hot of trg[t], t = s+1
                       h0_ref, c0_ref,      # (B, H) encoder final state
                       embp_ref,            # (V, 4H) = dec_emb @ W_ih + b (folded)
                       w_hh_ref,            # (H, 4H)
                       w_fc_ref,            # (H, V)
                       b_fc_ref,            # (1, V)  (-1e9 in padded lanes)
                       logits_ref,          # out block (1, B, V)
                       inp_sc, h_sc, c_sc): # VMEM scratch carried across steps
    s = pl.program_id(0)
    B, H = h_sc.shape
    V = inp_sc.shape[1]

    @pl.when(s == 0)
    def _():
        inp_sc[...] = trg0_ref[...]      # input = trg[0]
        h_sc[...] = h0_ref[...]
        c_sc[...] = c0_ref[...]

    x_oh = inp_sc[...]
    h = h_sc[...]
    c = c_sc[...]

    # Fused LSTM cell: input path is one (B,V)@(V,4H) matmul (embedding gather
    # + input projection + bias, exact because x_oh is an exact one-hot).
    gates = (
        jnp.dot(x_oh, embp_ref[...], preferred_element_type=jnp.float32)
        + jnp.dot(h, w_hh_ref[...], preferred_element_type=jnp.float32)
    )
    i = jax.nn.sigmoid(gates[:, 0 * H:1 * H])
    f = jax.nn.sigmoid(gates[:, 1 * H:2 * H])
    g = jnp.tanh(gates[:, 2 * H:3 * H])
    o = jax.nn.sigmoid(gates[:, 3 * H:4 * H])
    c_new = f * c + i * g
    h_new = o * jnp.tanh(c_new)

    # FC projection to (padded) vocab; lane-dense unmasked store.
    logits = (jnp.dot(h_new, w_fc_ref[...], preferred_element_type=jnp.float32)
              + b_fc_ref[...])
    logits_ref[0] = logits
    h_sc[...] = h_new
    c_sc[...] = c_new

    # Next-input selection (argmax feedback vs. teacher forcing), in-kernel.
    lane = lax.broadcasted_iota(jnp.int32, (B, V), 1)
    row_max = jnp.max(logits, axis=1, keepdims=True)
    cand = jnp.where(logits == row_max, lane, V)     # first-max tie-break
    top1 = jnp.min(cand, axis=1, keepdims=True)      # (B, 1) argmax index
    top1_oh = (lane == top1).astype(jnp.float32)

    t = s + 1
    sel = tf_ref[t].astype(jnp.float32)              # 1.0 -> teacher force
    inp_sc[...] = sel * trg_oh_ref[0] + (1.0 - sel) * top1_oh


def run_decoder(tf_flags, trg0_oh, trg_oh, h0, c0, emb_proj, w_hh, w_fc, b_fc):
    trg_len, B, V = trg_oh.shape
    H = h0.shape[1]
    n_steps = trg_len - 1
    return pl.pallas_call(
        decoder_seq_kernel,
        out_shape=jax.ShapeDtypeStruct((n_steps, B, V), jnp.float32),
        grid_spec=pltpu.PrefetchScalarGridSpec(
            num_scalar_prefetch=1,
            grid=(n_steps,),
            in_specs=[
                pl.BlockSpec((B, V), lambda s, tf: (0, 0)),            # trg0_oh
                pl.BlockSpec((1, B, V), lambda s, tf: (s + 1, 0, 0)),  # trg_oh[t]
                pl.BlockSpec((B, H), lambda s, tf: (0, 0)),            # h0
                pl.BlockSpec((B, H), lambda s, tf: (0, 0)),            # c0
                pl.BlockSpec((V, 4 * H), lambda s, tf: (0, 0)),        # emb_proj
                pl.BlockSpec((H, 4 * H), lambda s, tf: (0, 0)),        # w_hh
                pl.BlockSpec((H, V), lambda s, tf: (0, 0)),            # w_fc
                pl.BlockSpec((1, V), lambda s, tf: (0, 0)),            # b_fc
            ],
            out_specs=pl.BlockSpec((1, B, V), lambda s, tf: (s, 0, 0)),
            scratch_shapes=[
                pltpu.VMEM((B, V), jnp.float32),   # fed-back input (one-hot)
                pltpu.VMEM((B, H), jnp.float32),   # h
                pltpu.VMEM((B, H), jnp.float32),   # c
            ],
        ),
        compiler_params=pltpu.CompilerParams(
            dimension_semantics=("arbitrary",)),
    )(tf_flags, trg0_oh, trg_oh, h0, c0, emb_proj, w_hh, w_fc, b_fc)


# ----------------------------------------------------------------------------
# Forward pass (mirrors Seq2Seq.forward; outputs[0] stays zero)
# ----------------------------------------------------------------------------
def seq2seq_forward(src, trg, params, teacher_forcing_ratio=0.5, tf_key=None):
    if tf_key is None:
        tf_key = jax.random.PRNGKey(42)
    src_len, batch = src.shape
    trg_len = trg.shape[0]
    E = params["enc_emb"].shape[1]
    H = params["enc_w_hh"].shape[0]
    V = params["dec_fc_w"].shape[1]

    B_pad = _round_up(batch, 8)       # f32 sublane alignment
    V_pad = _round_up(V, 128)         # lane alignment for logits / FC

    src_p = jnp.pad(src, ((0, 0), (0, B_pad - batch)))
    trg_p = jnp.pad(trg, ((0, 0), (0, B_pad - batch)))

    # ---- encoder ----
    emb = jnp.take(params["enc_emb"], src_p, axis=0)          # (T, B_pad, E) glue gather
    emb_flat = emb.reshape(src_len * B_pad, E)
    hidden, cell = run_encoder(emb_flat, params["enc_w_ih"],
                               params["enc_w_hh"], params["enc_b"], B_pad)

    # ---- decoder weight prep (pad vocab, fold embedding @ W_ih + bias) ----
    dec_emb_p = jnp.pad(params["dec_emb"], ((0, V_pad - V), (0, 0)))
    emb_proj = jnp.dot(dec_emb_p, params["dec_w_ih"]) + params["dec_b"]  # (V_pad, 4H)
    w_fc_p = jnp.pad(params["dec_fc_w"], ((0, 0), (0, V_pad - V)))
    b_fc_p = jnp.pad(params["dec_fc_b"], ((0, 0), (0, V_pad - V)),
                     constant_values=-1e9)     # padded logits never win argmax

    trg_oh = jax.nn.one_hot(trg_p, V_pad, dtype=jnp.float32)  # (trg_len, B_pad, V_pad)

    # Deterministic stand-in for python random.random() < teacher_forcing_ratio
    # TODO(synk): PyTorch draws a fresh Python random per call/step; here the
    # flags come from a fixed JAX PRNG key (deterministic across calls).
    tf_flags = (jax.random.uniform(tf_key, (trg_len,))
                < teacher_forcing_ratio).astype(jnp.int32)

    logits = run_decoder(tf_flags, trg_oh[0], trg_oh, hidden, cell,
                         emb_proj, params["dec_w_hh"], w_fc_p, b_fc_p)

    outputs = jnp.concatenate(
        [jnp.zeros((1, B_pad, V_pad), jnp.float32), logits], axis=0)
    return outputs[:, :batch, :V]


# ----------------------------------------------------------------------------
# Deterministic parameter construction (synthetic, no checkpoints)
# ----------------------------------------------------------------------------
def make_params(key, src_vocab, trg_vocab, emb_dim, hidden_dim):
    ks = jax.random.split(key, 10)
    s = 0.1
    return {
        # encoder
        "enc_emb":  s * jax.random.normal(ks[0], (src_vocab, emb_dim), jnp.float32),
        "enc_w_ih": s * jax.random.normal(ks[1], (emb_dim, 4 * hidden_dim), jnp.float32),
        "enc_w_hh": s * jax.random.normal(ks[2], (hidden_dim, 4 * hidden_dim), jnp.float32),
        "enc_b":    s * jax.random.normal(ks[3], (1, 4 * hidden_dim), jnp.float32),
        # decoder
        "dec_emb":  s * jax.random.normal(ks[4], (trg_vocab, emb_dim), jnp.float32),
        "dec_w_ih": s * jax.random.normal(ks[5], (emb_dim, 4 * hidden_dim), jnp.float32),
        "dec_w_hh": s * jax.random.normal(ks[6], (hidden_dim, 4 * hidden_dim), jnp.float32),
        "dec_b":    s * jax.random.normal(ks[7], (1, 4 * hidden_dim), jnp.float32),
        "dec_fc_w": s * jax.random.normal(ks[8], (hidden_dim, trg_vocab), jnp.float32),
        "dec_fc_b": s * jax.random.normal(ks[9], (1, trg_vocab), jnp.float32),
    }


if __name__ == "__main__":
    # Small shapes consistent with the module's forward (hidden_dim=128 as in
    # the original config); batch/vocab are deliberately unaligned to exercise
    # the padding path (batch 4 -> 8 sublanes, vocab 96 -> 128 lanes).
    SRC_VOCAB, TRG_VOCAB = 120, 96
    EMB_DIM, HIDDEN_DIM = 128, 128
    SRC_LEN, TRG_LEN, BATCH = 12, 8, 4

    key = jax.random.PRNGKey(0)
    k_params, k_src, k_trg = jax.random.split(key, 3)

    params = make_params(k_params, SRC_VOCAB, TRG_VOCAB, EMB_DIM, HIDDEN_DIM)
    src = jax.random.randint(k_src, (SRC_LEN, BATCH), 0, SRC_VOCAB, jnp.int32)
    trg = jax.random.randint(k_trg, (TRG_LEN, BATCH), 0, TRG_VOCAB, jnp.int32)

    fwd = jax.jit(functools.partial(seq2seq_forward, teacher_forcing_ratio=0.5))
    outputs = fwd(src, trg, params)
    outputs = jax.block_until_ready(outputs)

    assert outputs.shape == (TRG_LEN, BATCH, TRG_VOCAB)
    assert outputs.dtype == jnp.float32
    assert bool(jnp.all(outputs[0] == 0.0))          # outputs[0] stays zero
    assert bool(jnp.all(jnp.isfinite(outputs)))

    print("KERNEL_OK")
</pallas_src>

<mosaic_0001>
module attributes {stable_mosaic.version = 11 : i64} {
  func.func @encoder_lstm_kernel(%arg0: i32, %arg1: memref<96x128xf32, #tpu.memory_space<vmem>>, %arg2: memref<128x512xf32, #tpu.memory_space<vmem>>, %arg3: memref<128x512xf32, #tpu.memory_space<vmem>>, %arg4: memref<1x512xf32, #tpu.memory_space<vmem>>, %arg5: memref<8x128xf32, #tpu.memory_space<vmem>>, %arg6: memref<8x128xf32, #tpu.memory_space<vmem>>, %arg7: memref<96x512xf32, #tpu.memory_space<vmem>>) attributes {dimension_semantics = [#tpu.dimension_semantics<arbitrary>], iteration_bounds = array<i64: 1>, scalar_prefetch = 0 : i64, scratch_operands = 1 : i64, tpu.core_type = #tpu.core_type<tc>, window_params = [{pipeline_mode = #tpu.pipeline_mode<synchronous>, transform_indices = @transform_0, window_bounds = array<i64: 96, 128>}, {pipeline_mode = #tpu.pipeline_mode<synchronous>, transform_indices = @transform_1, window_bounds = array<i64: 128, 512>}, {pipeline_mode = #tpu.pipeline_mode<synchronous>, transform_indices = @transform_2, window_bounds = array<i64: 128, 512>}, {pipeline_mode = #tpu.pipeline_mode<synchronous>, transform_indices = @transform_3, window_bounds = array<i64: 1, 512>}, {pipeline_mode = #tpu.pipeline_mode<synchronous>, transform_indices = @transform_4, window_bounds = array<i64: 8, 128>}, {pipeline_mode = #tpu.pipeline_mode<synchronous>, transform_indices = @transform_5, window_bounds = array<i64: 8, 128>}]} {
    %c0 = arith.constant 0 : index
    %c0_0 = arith.constant 0 : index
    %0 = vector.load %arg1[%c0, %c0_0] : memref<96x128xf32, #tpu.memory_space<vmem>>, vector<96x128xf32>
    %c0_1 = arith.constant 0 : index
    %c0_2 = arith.constant 0 : index
    %1 = vector.load %arg2[%c0_1, %c0_2] : memref<128x512xf32, #tpu.memory_space<vmem>>, vector<128x512xf32>
    %cst = arith.constant dense<0.000000e+00> : vector<96x512xf32>
    %2 = tpu.matmul %0, %1, %cst {dimension_numbers = #tpu.dot_dimension_numbers<[1], [0], [0], [1], [0, 0, 1, 1], [], []>} : vector<96x128xf32>, vector<128x512xf32>, vector<96x512xf32> -> vector<96x512xf32>
    %c0_3 = arith.constant 0 : index
    %c0_4 = arith.constant 0 : index
    %3 = vector.load %arg4[%c0_3, %c0_4] : memref<1x512xf32, #tpu.memory_space<vmem>>, vector<1x512xf32>
    %4 = vector.broadcast %3 : vector<1x512xf32> to vector<96x512xf32>
    %5 = arith.addf %2, %4 : vector<96x512xf32>
    %c0_5 = arith.constant 0 : index
    %c0_6 = arith.constant 0 : index
    %6 = vector.load %arg7[%c0_5, %c0_6] : memref<96x512xf32, #tpu.memory_space<vmem>>, vector<96x512xf32>
    tpu.vector_store %arg7[%c0_5, %c0_6], %5 {strides = array<i32>} : memref<96x512xf32, #tpu.memory_space<vmem>>, vector<96x512xf32>,
    %c0_7 = arith.constant 0 : index
    %c0_8 = arith.constant 0 : index
    %7 = vector.load %arg3[%c0_7, %c0_8] : memref<128x512xf32, #tpu.memory_space<vmem>>, vector<128x512xf32>
    %cst_9 = arith.constant 0.000000e+00 : f32
    %8 = vector.broadcast %cst_9 : f32 to vector<8x128xf32>
    %cst_10 = arith.constant 0.000000e+00 : f32
    %9 = vector.broadcast %cst_10 : f32 to vector<8x128xf32>
    %c0_11 = arith.constant 0 : index
    %c0_12 = arith.constant 0 : index
    %10 = vector.load %arg7[%c0_11, %c0_12] : memref<96x512xf32, #tpu.memory_space<vmem>>, vector<8x512xf32>
    %cst_13 = arith.constant dense<0.000000e+00> : vector<8x512xf32>
    %11 = tpu.matmul %8, %7, %cst_13 {dimension_numbers = #tpu.dot_dimension_numbers<[1], [0], [0], [1], [0, 0, 1, 1], [], []>} : vector<8x128xf32>, vector<128x512xf32>, vector<8x512xf32> -> vector<8x512xf32>
    %12 = arith.addf %10, %11 : vector<8x512xf32>
    %13 = vector.extract_strided_slice %12 {offsets = [0, 0], sizes = [8, 128], strides = [1, 1]} : vector<8x512xf32> to vector<8x128xf32>
    %14 = arith.negf %13 : vector<8x128xf32>
    %15 = math.exp %14 : vector<8x128xf32>
    %cst_14 = arith.constant 1.000000e+00 : f32
    %16 = vector.broadcast %cst_14 : f32 to vector<8x128xf32>
    %17 = arith.addf %16, %15 : vector<8x128xf32>
    %18 = arith.divf %16, %17 : vector<8x128xf32>
    %19 = vector.extract_strided_slice %12 {offsets = [0, 128], sizes = [8, 128], strides = [1, 1]} : vector<8x512xf32> to vector<8x128xf32>
    %20 = arith.negf %19 : vector<8x128xf32>
    %21 = math.exp %20 : vector<8x128xf32>
    %cst_15 = arith.constant 1.000000e+00 : f32
    %22 = vector.broadcast %cst_15 : f32 to vector<8x128xf32>
    %23 = arith.addf %22, %21 : vector<8x128xf32>
    %24 = arith.divf %22, %23 : vector<8x128xf32>
    %25 = vector.extract_strided_slice %12 {offsets = [0, 256], sizes = [8, 128], strides = [1, 1]} : vector<8x512xf32> to vector<8x128xf32>
    %26 = math.tanh %25 : vector<8x128xf32>
    %27 = vector.extract_strided_slice %12 {offsets = [0, 384], sizes = [8, 128], strides = [1, 1]} : vector<8x512xf32> to vector<8x128xf32>
    %28 = arith.negf %27 : vector<8x128xf32>
    %29 = math.exp %28 : vector<8x128xf32>
    %cst_16 = arith.constant 1.000000e+00 : f32
    %30 = vector.broadcast %cst_16 : f32 to vector<8x128xf32>
    %31 = arith.addf %30, %29 : vector<8x128xf32>
    %32 = arith.divf %30, %31 : vector<8x128xf32>
    %33 = arith.mulf %24, %9 : vector<8x128xf32>
    %34 = arith.mulf %18, %26 : vector<8x128xf32>
    %35 = arith.addf %33, %34 : vector<8x128xf32>
    %36 = math.tanh %35 : vector<8x128xf32>
    %37 = arith.mulf %32, %36 : vector<8x128xf32>
    %c8 = arith.constant 8 : index
    %c0_17 = arith.constant 0 : index
    %38 = vector.load %arg7[%c8, %c0_17] : memref<96x512xf32, #tpu.memory_space<vmem>>, vector<8x512xf32>
    %cst_18 = arith.constant dense<0.000000e+00> : vector<8x512xf32>
    %39 = tpu.matmul %37, %7, %cst_18 {dimension_numbers = #tpu.dot_dimension_numbers<[1], [0], [0], [1], [0, 0, 1, 1], [], []>} : vector<8x128xf32>, vector<128x512xf32>, vector<8x512xf32> -> vector<8x512xf32>
    %40 = arith.addf %38, %39 : vector<8x512xf32>
    %41 = vector.extract_strided_slice %40 {offsets = [0, 0], sizes = [8, 128], strides = [1, 1]} : vector<8x512xf32> to vector<8x128xf32>
    %42 = arith.negf %41 : vector<8x128xf32>
    %43 = math.exp %42 : vector<8x128xf32>
    %cst_19 = arith.constant 1.000000e+00 : f32
    %44 = vector.broadcast %cst_19 : f32 to vector<8x128xf32>
    %45 = arith.addf %44, %43 : vector<8x128xf32>
    %46 = arith.divf %44, %45 : vector<8x128xf32>
    %47 = vector.extract_strided_slice %40 {offsets = [0, 128], sizes = [8, 128], strides = [1, 1]} : vector<8x512xf32> to vector<8x128xf32>
    %48 = arith.negf %47 : vector<8x128xf32>
    %49 = math.exp %48 : vector<8x128xf32>
    %cst_20 = arith.constant 1.000000e+00 : f32
    %50 = vector.broadcast %cst_20 : f32 to vector<8x128xf32>
    %51 = arith.addf %50, %49 : vector<8x128xf32>
    %52 = arith.divf %50, %51 : vector<8x128xf32>
    %53 = vector.extract_strided_slice %40 {offsets = [0, 256], sizes = [8, 128], strides = [1, 1]} : vector<8x512xf32> to vector<8x128xf32>
    %54 = math.tanh %53 : vector<8x128xf32>
    %55 = vector.extract_strided_slice %40 {offsets = [0, 384], sizes = [8, 128], strides = [1, 1]} : vector<8x512xf32> to vector<8x128xf32>
    %56 = arith.negf %55 : vector<8x128xf32>
    %57 = math.exp %56 : vector<8x128xf32>
    %cst_21 = arith.constant 1.000000e+00 : f32
    %58 = vector.broadcast %cst_21 : f32 to vector<8x128xf32>
    %59 = arith.addf %58, %57 : vector<8x128xf32>
    %60 = arith.divf %58, %59 : vector<8x128xf32>
    %61 = arith.mulf %52, %35 : vector<8x128xf32>
    %62 = arith.mulf %46, %54 : vector<8x128xf32>
    %63 = arith.addf %61, %62 : vector<8x128xf32>
    %64 = math.tanh %63 : vector<8x128xf32>
    %65 = arith.mulf %60, %64 : vector<8x128xf32>
    %c16 = arith.constant 16 : index
    %c0_22 = arith.constant 0 : index
    %66 = vector.load %arg7[%c16, %c0_22] : memref<96x512xf32, #tpu.memory_space<vmem>>, vector<8x512xf32>
    %cst_23 = arith.constant dense<0.000000e+00> : vector<8x512xf32>
    %67 = tpu.matmul %65, %7, %cst_23 {dimension_numbers = #tpu.dot_dimension_numbers<[1], [0], [0], [1], [0, 0, 1, 1], [], []>} : vector<8x128xf32>, vector<128x512xf32>, vector<8x512xf32> -> vector<8x512xf32>
    %68 = arith.addf %66, %67 : vector<8x512xf32>
    %69 = vector.extract_strided_slice %68 {offsets = [0, 0], sizes = [8, 128], strides = [1, 1]} : vector<8x512xf32> to vector<8x128xf32>
    %70 = arith.negf %69 : vector<8x128xf32>
    %71 = math.exp %70 : vector<8x128xf32>
    %cst_24 = arith.constant 1.000000e+00 : f32
    %72 = vector.broadcast %cst_24 : f32 to vector<8x128xf32>
    %73 = arith.addf %72, %71 : vector<8x128xf32>
    %74 = arith.divf %72, %73 : vector<8x128xf32>
    %75 = vector.extract_strided_slice %68 {offsets = [0, 128], sizes = [8, 128], strides = [1, 1]} : vector<8x512xf32> to vector<8x128xf32>
    %76 = arith.negf %75 : vector<8x128xf32>
    %77 = math.exp %76 : vector<8x128xf32>
    %cst_25 = arith.constant 1.000000e+00 : f32
    %78 = vector.broadcast %cst_25 : f32 to vector<8x128xf32>
    %79 = arith.addf %78, %77 : vector<8x128xf32>
    %80 = arith.divf %78, %79 : vector<8x128xf32>
    %81 = vector.extract_strided_slice %68 {offsets = [0, 256], sizes = [8, 128], strides = [1, 1]} : vector<8x512xf32> to vector<8x128xf32>
    %82 = math.tanh %81 : vector<8x128xf32>
    %83 = vector.extract_strided_slice %68 {offsets = [0, 384], sizes = [8, 128], strides = [1, 1]} : vector<8x512xf32> to vector<8x128xf32>
    %84 = arith.negf %83 : vector<8x128xf32>
    %85 = math.exp %84 : vector<8x128xf32>
    %cst_26 = arith.constant 1.000000e+00 : f32
    %86 = vector.broadcast %cst_26 : f32 to vector<8x128xf32>
    %87 = arith.addf %86, %85 : vector<8x128xf32>
    %88 = arith.divf %86, %87 : vector<8x128xf32>
    %89 = arith.mulf %80, %63 : vector<8x128xf32>
    %90 = arith.mulf %74, %82 : vector<8x128xf32>
    %91 = arith.addf %89, %90 : vector<8x128xf32>
    %92 = math.tanh %91 : vector<8x128xf32>
    %93 = arith.mulf %88, %92 : vector<8x128xf32>
    %c24 = arith.constant 24 : index
    %c0_27 = arith.constant 0 : index
    %94 = vector.load %arg7[%c24, %c0_27] : memref<96x512xf32, #tpu.memory_space<vmem>>, vector<8x512xf32>
    %cst_28 = arith.constant dense<0.000000e+00> : vector<8x512xf32>
    %95 = tpu.matmul %93, %7, %cst_28 {dimension_numbers = #tpu.dot_dimension_numbers<[1], [0], [0], [1], [0, 0, 1, 1], [], []>} : vector<8x128xf32>, vector<128x512xf32>, vector<8x512xf32> -> vector<8x512xf32>
    %96 = arith.addf %94, %95 : vector<8x512xf32>
    %97 = vector.extract_strided_slice %96 {offsets = [0, 0], sizes = [8, 128], strides = [1, 1]} : vector<8x512xf32> to vector<8x128xf32>
    %98 = arith.negf %97 : vector<8x128xf32>
    %99 = math.exp %98 : vector<8x128xf32>
    %cst_29 = arith.constant 1.000000e+00 : f32
    %100 = vector.broadcast %cst_29 : f32 to vector<8x128xf32>
    %101 = arith.addf %100, %99 : vector<8x128xf32>
    %102 = arith.divf %100, %101 : vector<8x128xf32>
    %103 = vector.extract_strided_slice %96 {offsets = [0, 128], sizes = [8, 128], strides = [1, 1]} : vector<8x512xf32> to vector<8x128xf32>
    %104 = arith.negf %103 : vector<8x128xf32>
    %105 = math.exp %104 : vector<8x128xf32>
    %cst_30 = arith.constant 1.000000e+00 : f32
    %106 = vector.broadcast %cst_30 : f32 to vector<8x128xf32>
    %107 = arith.addf %106, %105 : vector<8x128xf32>
    %108 = arith.divf %106, %107 : vector<8x128xf32>
    %109 = vector.extract_strided_slice %96 {offsets = [0, 256], sizes = [8, 128], strides = [1, 1]} : vector<8x512xf32> to vector<8x128xf32>
    %110 = math.tanh %109 : vector<8x128xf32>
    %111 = vector.extract_strided_slice %96 {offsets = [0, 384], sizes = [8, 128], strides = [1, 1]} : vector<8x512xf32> to vector<8x128xf32>
    %112 = arith.negf %111 : vector<8x128xf32>
    %113 = math.exp %112 : vector<8x128xf32>
    %cst_31 = arith.constant 1.000000e+00 : f32
    %114 = vector.broadcast %cst_31 : f32 to vector<8x128xf32>
    %115 = arith.addf %114, %113 : vector<8x128xf32>
    %116 = arith.divf %114, %115 : vector<8x128xf32>
    %117 = arith.mulf %108, %91 : vector<8x128xf32>
    %118 = arith.mulf %102, %110 : vector<8x128xf32>
    %119 = arith.addf %117, %118 : vector<8x128xf32>
    %120 = math.tanh %119 : vector<8x128xf32>
    %121 = arith.mulf %116, %120 : vector<8x128xf32>
    %c32 = arith.constant 32 : index
    %c0_32 = arith.constant 0 : index
    %122 = vector.load %arg7[%c32, %c0_32] : memref<96x512xf32, #tpu.memory_space<vmem>>, vector<8x512xf32>
    %cst_33 = arith.constant dense<0.000000e+00> : vector<8x512xf32>
    %123 = tpu.matmul %121, %7, %cst_33 {dimension_numbers = #tpu.dot_dimension_numbers<[1], [0], [0], [1], [0, 0, 1, 1], [], []>} : vector<8x128xf32>, vector<128x512xf32>, vector<8x512xf32> -> vector<8x512xf32>
    %124 = arith.addf %122, %123 : vector<8x512xf32>
    %125 = vector.extract_strided_slice %124 {offsets = [0, 0], sizes = [8, 128], strides = [1, 1]} : vector<8x512xf32> to vector<8x128xf32>
    %126 = arith.negf %125 : vector<8x128xf32>
    %127 = math.exp %126 : vector<8x128xf32>
    %cst_34 = arith.constant 1.000000e+00 : f32
    %128 = vector.broadcast %cst_34 : f32 to vector<8x128xf32>
    %129 = arith.addf %128, %127 : vector<8x128xf32>
    %130 = arith.divf %128, %129 : vector<8x128xf32>
    %131 = vector.extract_strided_slice %124 {offsets = [0, 128], sizes = [8, 128], strides = [1, 1]} : vector<8x512xf32> to vector<8x128xf32>
    %132 = arith.negf %131 : vector<8x128xf32>
    %133 = math.exp %132 : vector<8x128xf32>
    %cst_35 = arith.constant 1.000000e+00 : f32
    %134 = vector.broadcast %cst_35 : f32 to vector<8x128xf32>
    %135 = arith.addf %134, %133 : vector<8x128xf32>
    %136 = arith.divf %134, %135 : vector<8x128xf32>
    %137 = vector.extract_strided_slice %124 {offsets = [0, 256], sizes = [8, 128], strides = [1, 1]} : vector<8x512xf32> to vector<8x128xf32>
    %138 = math.tanh %137 : vector<8x128xf32>
    %139 = vector.extract_strided_slice %124 {offsets = [0, 384], sizes = [8, 128], strides = [1, 1]} : vector<8x512xf32> to vector<8x128xf32>
    %140 = arith.negf %139 : vector<8x128xf32>
    %141 = math.exp %140 : vector<8x128xf32>
    %cst_36 = arith.constant 1.000000e+00 : f32
    %142 = vector.broadcast %cst_36 : f32 to vector<8x128xf32>
    %143 = arith.addf %142, %141 : vector<8x128xf32>
    %144 = arith.divf %142, %143 : vector<8x128xf32>
    %145 = arith.mulf %136, %119 : vector<8x128xf32>
    %146 = arith.mulf %130, %138 : vector<8x128xf32>
    %147 = arith.addf %145, %146 : vector<8x128xf32>
    %148 = math.tanh %147 : vector<8x128xf32>
    %149 = arith.mulf %144, %148 : vector<8x128xf32>
    %c40 = arith.constant 40 : index
    %c0_37 = arith.constant 0 : index
    %150 = vector.load %arg7[%c40, %c0_37] : memref<96x512xf32, #tpu.memory_space<vmem>>, vector<8x512xf32>
    %cst_38 = arith.constant dense<0.000000e+00> : vector<8x512xf32>
    %151 = tpu.matmul %149, %7, %cst_38 {dimension_numbers = #tpu.dot_dimension_numbers<[1], [0], [0], [1], [0, 0, 1, 1], [], []>} : vector<8x128xf32>, vector<128x512xf32>, vector<8x512xf32> -> vector<8x512xf32>
    %152 = arith.addf %150, %151 : vector<8x512xf32>
    %153 = vector.extract_strided_slice %152 {offsets = [0, 0], sizes = [8, 128], strides = [1, 1]} : vector<8x512xf32> to vector<8x128xf32>
    %154 = arith.negf %153 : vector<8x128xf32>
    %155 = math.exp %154 : vector<8x128xf32>
    %cst_39 = arith.constant 1.000000e+00 : f32
    %156 = vector.broadcast %cst_39 : f32 to vector<8x128xf32>
    %157 = arith.addf %156, %155 : vector<8x128xf32>
    %158 = arith.divf %156, %157 : vector<8x128xf32>
    %159 = vector.extract_strided_slice %152 {offsets = [0, 128], sizes = [8, 128], strides = [1, 1]} : vector<8x512xf32> to vector<8x128xf32>
    %160 = arith.negf %159 : vector<8x128xf32>
    %161 = math.exp %160 : vector<8x128xf32>
    %cst_40 = arith.constant 1.000000e+00 : f32
    %162 = vector.broadcast %cst_40 : f32 to vector<8x128xf32>
    %163 = arith.addf %162, %161 : vector<8x128xf32>
    %164 = arith.divf %162, %163 : vector<8x128xf32>
    %165 = vector.extract_strided_slice %152 {offsets = [0, 256], sizes = [8, 128], strides = [1, 1]} : vector<8x512xf32> to vector<8x128xf32>
    %166 = math.tanh %165 : vector<8x128xf32>
    %167 = vector.extract_strided_slice %152 {offsets = [0, 384], sizes = [8, 128], strides = [1, 1]} : vector<8x512xf32> to vector<8x128xf32>
    %168 = arith.negf %167 : vector<8x128xf32>
    %169 = math.exp %168 : vector<8x128xf32>
    %cst_41 = arith.constant 1.000000e+00 : f32
    %170 = vector.broadcast %cst_41 : f32 to vector<8x128xf32>
    %171 = arith.addf %170, %169 : vector<8x128xf32>
    %172 = arith.divf %170, %171 : vector<8x128xf32>
    %173 = arith.mulf %164, %147 : vector<8x128xf32>
    %174 = arith.mulf %158, %166 : vector<8x128xf32>
    %175 = arith.addf %173, %174 : vector<8x128xf32>
    %176 = math.tanh %175 : vector<8x128xf32>
    %177 = arith.mulf %172, %176 : vector<8x128xf32>
    %c48 = arith.constant 48 : index
    %c0_42 = arith.constant 0 : index
    %178 = vector.load %arg7[%c48, %c0_42] : memref<96x512xf32, #tpu.memory_space<vmem>>, vector<8x512xf32>
    %cst_43 = arith.constant dense<0.000000e+00> : vector<8x512xf32>
    %179 = tpu.matmul %177, %7, %cst_43 {dimension_numbers = #tpu.dot_dimension_numbers<[1], [0], [0], [1], [0, 0, 1, 1], [], []>} : vector<8x128xf32>, vector<128x512xf32>, vector<8x512xf32> -> vector<8x512xf32>
    %180 = arith.addf %178, %179 : vector<8x512xf32>
    %181 = vector.extract_strided_slice %180 {offsets = [0, 0], sizes = [8, 128], strides = [1, 1]} : vector<8x512xf32> to vector<8x128xf32>
    %182 = arith.negf %181 : vector<8x128xf32>
    %183 = math.exp %182 : vector<8x128xf32>
    %cst_44 = arith.constant 1.000000e+00 : f32
    %184 = vector.broadcast %cst_44 : f32 to vector<8x128xf32>
    %185 = arith.addf %184, %183 : vector<8x128xf32>
    %186 = arith.divf %184, %185 : vector<8x128xf32>
    %187 = vector.extract_strided_slice %180 {offsets = [0, 128], sizes = [8, 128], strides = [1, 1]} : vector<8x512xf32> to vector<8x128xf32>
    %188 = arith.negf %187 : vector<8x128xf32>
    %189 = math.exp %188 : vector<8x128xf32>
    %cst_45 = arith.constant 1.000000e+00 : f32
    %190 = vector.broadcast %cst_45 : f32 to vector<8x128xf32>
    %191 = arith.addf %190, %189 : vector<8x128xf32>
    %192 = arith.divf %190, %191 : vector<8x128xf32>
    %193 = vector.extract_strided_slice %180 {offsets = [0, 256], sizes = [8, 128], strides = [1, 1]} : vector<8x512xf32> to vector<8x128xf32>
    %194 = math.tanh %193 : vector<8x128xf32>
    %195 = vector.extract_strided_slice %180 {offsets = [0, 384], sizes = [8, 128], strides = [1, 1]} : vector<8x512xf32> to vector<8x128xf32>
    %196 = arith.negf %195 : vector<8x128xf32>
    %197 = math.exp %196 : vector<8x128xf32>
    %cst_46 = arith.constant 1.000000e+00 : f32
    %198 = vector.broadcast %cst_46 : f32 to vector<8x128xf32>
    %199 = arith.addf %198, %197 : vector<8x128xf32>
    %200 = arith.divf %198, %199 : vector<8x128xf32>
    %201 = arith.mulf %192, %175 : vector<8x128xf32>
    %202 = arith.mulf %186, %194 : vector<8x128xf32>
    %203 = arith.addf %201, %202 : vector<8x128xf32>
    %204 = math.tanh %203 : vector<8x128xf32>
    %205 = arith.mulf %200, %204 : vector<8x128xf32>
    %c56 = arith.constant 56 : index
    %c0_47 = arith.constant 0 : index
    %206 = vector.load %arg7[%c56, %c0_47] : memref<96x512xf32, #tpu.memory_space<vmem>>, vector<8x512xf32>
    %cst_48 = arith.constant dense<0.000000e+00> : vector<8x512xf32>
    %207 = tpu.matmul %205, %7, %cst_48 {dimension_numbers = #tpu.dot_dimension_numbers<[1], [0], [0], [1], [0, 0, 1, 1], [], []>} : vector<8x128xf32>, vector<128x512xf32>, vector<8x512xf32> -> vector<8x512xf32>
    %208 = arith.addf %206, %207 : vector<8x512xf32>
    %209 = vector.extract_strided_slice %208 {offsets = [0, 0], sizes = [8, 128], strides = [1, 1]} : vector<8x512xf32> to vector<8x128xf32>
    %210 = arith.negf %209 : vector<8x128xf32>
    %211 = math.exp %210 : vector<8x128xf32>
    %cst_49 = arith.constant 1.000000e+00 : f32
    %212 = vector.broadcast %cst_49 : f32 to vector<8x128xf32>
    %213 = arith.addf %212, %211 : vector<8x128xf32>
    %214 = arith.divf %212, %213 : vector<8x128xf32>
    %215 = vector.extract_strided_slice %208 {offsets = [0, 128], sizes = [8, 128], strides = [1, 1]} : vector<8x512xf32> to vector<8x128xf32>
    %216 = arith.negf %215 : vector<8x128xf32>
    %217 = math.exp %216 : vector<8x128xf32>
    %cst_50 = arith.constant 1.000000e+00 : f32
    %218 = vector.broadcast %cst_50 : f32 to vector<8x128xf32>
    %219 = arith.addf %218, %217 : vector<8x128xf32>
    %220 = arith.divf %218, %219 : vector<8x128xf32>
    %221 = vector.extract_strided_slice %208 {offsets = [0, 256], sizes = [8, 128], strides = [1, 1]} : vector<8x512xf32> to vector<8x128xf32>
    %222 = math.tanh %221 : vector<8x128xf32>
    %223 = vector.extract_strided_slice %208 {offsets = [0, 384], sizes = [8, 128], strides = [1, 1]} : vector<8x512xf32> to vector<8x128xf32>
    %224 = arith.negf %223 : vector<8x128xf32>
    %225 = math.exp %224 : vector<8x128xf32>
    %cst_51 = arith.constant 1.000000e+00 : f32
    %226 = vector.broadcast %cst_51 : f32 to vector<8x128xf32>
    %227 = arith.addf %226, %225 : vector<8x128xf32>
    %228 = arith.divf %226, %227 : vector<8x128xf32>
    %229 = arith.mulf %220, %203 : vector<8x128xf32>
    %230 = arith.mulf %214, %222 : vector<8x128xf32>
    %231 = arith.addf %229, %230 : vector<8x128xf32>
    %232 = math.tanh %231 : vector<8x128xf32>
    %233 = arith.mulf %228, %232 : vector<8x128xf32>
    %c64 = arith.constant 64 : index
    %c0_52 = arith.constant 0 : index
    %234 = vector.load %arg7[%c64, %c0_52] : memref<96x512xf32, #tpu.memory_space<vmem>>, vector<8x512xf32>
    %cst_53 = arith.constant dense<0.000000e+00> : vector<8x512xf32>
    %235 = tpu.matmul %233, %7, %cst_53 {dimension_numbers = #tpu.dot_dimension_numbers<[1], [0], [0], [1], [0, 0, 1, 1], [], []>} : vector<8x128xf32>, vector<128x512xf32>, vector<8x512xf32> -> vector<8x512xf32>
    %236 = arith.addf %234, %235 : vector<8x512xf32>
    %237 = vector.extract_strided_slice %236 {offsets = [0, 0], sizes = [8, 128], strides = [1, 1]} : vector<8x512xf32> to vector<8x128xf32>
    %238 = arith.negf %237 : vector<8x128xf32>
    %239 = math.exp %238 : vector<8x128xf32>
    %cst_54 = arith.constant 1.000000e+00 : f32
    %240 = vector.broadcast %cst_54 : f32 to vector<8x128xf32>
    %241 = arith.addf %240, %239 : vector<8x128xf32>
    %242 = arith.divf %240, %241 : vector<8x128xf32>
    %243 = vector.extract_strided_slice %236 {offsets = [0, 128], sizes = [8, 128], strides = [1, 1]} : vector<8x512xf32> to vector<8x128xf32>
    %244 = arith.negf %243 : vector<8x128xf32>
    %245 = math.exp %244 : vector<8x128xf32>
    %cst_55 = arith.constant 1.000000e+00 : f32
    %246 = vector.broadcast %cst_55 : f32 to vector<8x128xf32>
    %247 = arith.addf %246, %245 : vector<8x128xf32>
    %248 = arith.divf %246, %247 : vector<8x128xf32>
    %249 = vector.extract_strided_slice %236 {offsets = [0, 256], sizes = [8, 128], strides = [1, 1]} : vector<8x512xf32> to vector<8x128xf32>
    %250 = math.tanh %249 : vector<8x128xf32>
    %251 = vector.extract_strided_slice %236 {offsets = [0, 384], sizes = [8, 128], strides = [1, 1]} : vector<8x512xf32> to vector<8x128xf32>
    %252 = arith.negf %251 : vector<8x128xf32>
    %253 = math.exp %252 : vector<8x128xf32>
    %cst_56 = arith.constant 1.000000e+00 : f32
    %254 = vector.broadcast %cst_56 : f32 to vector<8x128xf32>
    %255 = arith.addf %254, %253 : vector<8x128xf32>
    %256 = arith.divf %254, %255 : vector<8x128xf32>
    %257 = arith.mulf %248, %231 : vector<8x128xf32>
    %258 = arith.mulf %242, %250 : vector<8x128xf32>
    %259 = arith.addf %257, %258 : vector<8x128xf32>
    %260 = math.tanh %259 : vector<8x128xf32>
    %261 = arith.mulf %256, %260 : vector<8x128xf32>
    %c72 = arith.constant 72 : index
    %c0_57 = arith.constant 0 : index
    %262 = vector.load %arg7[%c72, %c0_57] : memref<96x512xf32, #tpu.memory_space<vmem>>, vector<8x512xf32>
    %cst_58 = arith.constant dense<0.000000e+00> : vector<8x512xf32>
    %263 = tpu.matmul %261, %7, %cst_58 {dimension_numbers = #tpu.dot_dimension_numbers<[1], [0], [0], [1], [0, 0, 1, 1], [], []>} : vector<8x128xf32>, vector<128x512xf32>, vector<8x512xf32> -> vector<8x512xf32>
    %264 = arith.addf %262, %263 : vector<8x512xf32>
    %265 = vector.extract_strided_slice %264 {offsets = [0, 0], sizes = [8, 128], strides = [1, 1]} : vector<8x512xf32> to vector<8x128xf32>
    %266 = arith.negf %265 : vector<8x128xf32>
    %267 = math.exp %266 : vector<8x128xf32>
    %cst_59 = arith.constant 1.000000e+00 : f32
    %268 = vector.broadcast %cst_59 : f32 to vector<8x128xf32>
    %269 = arith.addf %268, %267 : vector<8x128xf32>
    %270 = arith.divf %268, %269 : vector<8x128xf32>
    %271 = vector.extract_strided_slice %264 {offsets = [0, 128], sizes = [8, 128], strides = [1, 1]} : vector<8x512xf32> to vector<8x128xf32>
    %272 = arith.negf %271 : vector<8x128xf32>
    %273 = math.exp %272 : vector<8x128xf32>
    %cst_60 = arith.constant 1.000000e+00 : f32
    %274 = vector.broadcast %cst_60 : f32 to vector<8x128xf32>
    %275 = arith.addf %274, %273 : vector<8x128xf32>
    %276 = arith.divf %274, %275 : vector<8x128xf32>
    %277 = vector.extract_strided_slice %264 {offsets = [0, 256], sizes = [8, 128], strides = [1, 1]} : vector<8x512xf32> to vector<8x128xf32>
    %278 = math.tanh %277 : vector<8x128xf32>
    %279 = vector.extract_strided_slice %264 {offsets = [0, 384], sizes = [8, 128], strides = [1, 1]} : vector<8x512xf32> to vector<8x128xf32>
    %280 = arith.negf %279 : vector<8x128xf32>
    %281 = math.exp %280 : vector<8x128xf32>
    %cst_61 = arith.constant 1.000000e+00 : f32
    %282 = vector.broadcast %cst_61 : f32 to vector<8x128xf32>
    %283 = arith.addf %282, %281 : vector<8x128xf32>
    %284 = arith.divf %282, %283 : vector<8x128xf32>
    %285 = arith.mulf %276, %259 : vector<8x128xf32>
    %286 = arith.mulf %270, %278 : vector<8x128xf32>
    %287 = arith.addf %285, %286 : vector<8x128xf32>
    %288 = math.tanh %287 : vector<8x128xf32>
    %289 = arith.mulf %284, %288 : vector<8x128xf32>
    %c80 = arith.constant 80 : index
    %c0_62 = arith.constant 0 : index
    %290 = vector.load %arg7[%c80, %c0_62] : memref<96x512xf32, #tpu.memory_space<vmem>>, vector<8x512xf32>
    %cst_63 = arith.constant dense<0.000000e+00> : vector<8x512xf32>
    %291 = tpu.matmul %289, %7, %cst_63 {dimension_numbers = #tpu.dot_dimension_numbers<[1], [0], [0], [1], [0, 0, 1, 1], [], []>} : vector<8x128xf32>, vector<128x512xf32>, vector<8x512xf32> -> vector<8x512xf32>
    %292 = arith.addf %290, %291 : vector<8x512xf32>
    %293 = vector.extract_strided_slice %292 {offsets = [0, 0], sizes = [8, 128], strides = [1, 1]} : vector<8x512xf32> to vector<8x128xf32>
    %294 = arith.negf %293 : vector<8x128xf32>
    %295 = math.exp %294 : vector<8x128xf32>
    %cst_64 = arith.constant 1.000000e+00 : f32
    %296 = vector.broadcast %cst_64 : f32 to vector<8x128xf32>
    %297 = arith.addf %296, %295 : vector<8x128xf32>
    %298 = arith.divf %296, %297 : vector<8x128xf32>
    %299 = vector.extract_strided_slice %292 {offsets = [0, 128], sizes = [8, 128], strides = [1, 1]} : vector<8x512xf32> to vector<8x128xf32>
    %300 = arith.negf %299 : vector<8x128xf32>
    %301 = math.exp %300 : vector<8x128xf32>
    %cst_65 = arith.constant 1.000000e+00 : f32
    %302 = vector.broadcast %cst_65 : f32 to vector<8x128xf32>
    %303 = arith.addf %302, %301 : vector<8x128xf32>
    %304 = arith.divf %302, %303 : vector<8x128xf32>
    %305 = vector.extract_strided_slice %292 {offsets = [0, 256], sizes = [8, 128], strides = [1, 1]} : vector<8x512xf32> to vector<8x128xf32>
    %306 = math.tanh %305 : vector<8x128xf32>
    %307 = vector.extract_strided_slice %292 {offsets = [0, 384], sizes = [8, 128], strides = [1, 1]} : vector<8x512xf32> to vector<8x128xf32>
    %308 = arith.negf %307 : vector<8x128xf32>
    %309 = math.exp %308 : vector<8x128xf32>
    %cst_66 = arith.constant 1.000000e+00 : f32
    %310 = vector.broadcast %cst_66 : f32 to vector<8x128xf32>
    %311 = arith.addf %310, %309 : vector<8x128xf32>
    %312 = arith.divf %310, %311 : vector<8x128xf32>
    %313 = arith.mulf %304, %287 : vector<8x128xf32>
    %314 = arith.mulf %298, %306 : vector<8x128xf32>
    %315 = arith.addf %313, %314 : vector<8x128xf32>
    %316 = math.tanh %315 : vector<8x128xf32>
    %317 = arith.mulf %312, %316 : vector<8x128xf32>
    %c88 = arith.constant 88 : index
    %c0_67 = arith.constant 0 : index
    %318 = vector.load %arg7[%c88, %c0_67] : memref<96x512xf32, #tpu.memory_space<vmem>>, vector<8x512xf32>
    %cst_68 = arith.constant dense<0.000000e+00> : vector<8x512xf32>
    %319 = tpu.matmul %317, %7, %cst_68 {dimension_numbers = #tpu.dot_dimension_numbers<[1], [0], [0], [1], [0, 0, 1, 1], [], []>} : vector<8x128xf32>, vector<128x512xf32>, vector<8x512xf32> -> vector<8x512xf32>
    %320 = arith.addf %318, %319 : vector<8x512xf32>
    %321 = vector.extract_strided_slice %320 {offsets = [0, 0], sizes = [8, 128], strides = [1, 1]} : vector<8x512xf32> to vector<8x128xf32>
    %322 = arith.negf %321 : vector<8x128xf32>
    %323 = math.exp %322 : vector<8x128xf32>
    %cst_69 = arith.constant 1.000000e+00 : f32
    %324 = vector.broadcast %cst_69 : f32 to vector<8x128xf32>
    %325 = arith.addf %324, %323 : vector<8x128xf32>
    %326 = arith.divf %324, %325 : vector<8x128xf32>
    %327 = vector.extract_strided_slice %320 {offsets = [0, 128], sizes = [8, 128], strides = [1, 1]} : vector<8x512xf32> to vector<8x128xf32>
    %328 = arith.negf %327 : vector<8x128xf32>
    %329 = math.exp %328 : vector<8x128xf32>
    %cst_70 = arith.constant 1.000000e+00 : f32
    %330 = vector.broadcast %cst_70 : f32 to vector<8x128xf32>
    %331 = arith.addf %330, %329 : vector<8x128xf32>
    %332 = arith.divf %330, %331 : vector<8x128xf32>
    %333 = vector.extract_strided_slice %320 {offsets = [0, 256], sizes = [8, 128], strides = [1, 1]} : vector<8x512xf32> to vector<8x128xf32>
    %334 = math.tanh %333 : vector<8x128xf32>
    %335 = vector.extract_strided_slice %320 {offsets = [0, 384], sizes = [8, 128], strides = [1, 1]} : vector<8x512xf32> to vector<8x128xf32>
    %336 = arith.negf %335 : vector<8x128xf32>
    %337 = math.exp %336 : vector<8x128xf32>
    %cst_71 = arith.constant 1.000000e+00 : f32
    %338 = vector.broadcast %cst_71 : f32 to vector<8x128xf32>
    %339 = arith.addf %338, %337 : vector<8x128xf32>
    %340 = arith.divf %338, %339 : vector<8x128xf32>
    %341 = arith.mulf %332, %315 : vector<8x128xf32>
    %342 = arith.mulf %326, %334 : vector<8x128xf32>
    %343 = arith.addf %341, %342 : vector<8x128xf32>
    %344 = math.tanh %343 : vector<8x128xf32>
    %345 = arith.mulf %340, %344 : vector<8x128xf32>
    %c0_72 = arith.constant 0 : index
    %c0_73 = arith.constant 0 : index
    %346 = vector.load %arg5[%c0_72, %c0_73] : memref<8x128xf32, #tpu.memory_space<vmem>>, vector<8x128xf32>
    tpu.vector_store %arg5[%c0_72, %c0_73], %345 {strides = array<i32>} : memref<8x128xf32, #tpu.memory_space<vmem>>, vector<8x128xf32>,
    %c0_74 = arith.constant 0 : index
    %c0_75 = arith.constant 0 : index
    %347 = vector.load %arg6[%c0_74, %c0_75] : memref<8x128xf32, #tpu.memory_space<vmem>>, vector<8x128xf32>
    tpu.vector_store %arg6[%c0_74, %c0_75], %343 {strides = array<i32>} : memref<8x128xf32, #tpu.memory_space<vmem>>, vector<8x128xf32>,
    return
  }
  func.func @transform_0(%arg0: i32) -> (i32, i32) {
    %c0_i32 = arith.constant 0 : i32
    %c0_i32_0 = arith.constant 0 : i32
    %c0_i32_1 = arith.constant 0 : i32
    return %c0_i32, %c0_i32_0 : i32, i32
  }
  func.func @transform_1(%arg0: i32) -> (i32, i32) {
    %c0_i32 = arith.constant 0 : i32
    %c0_i32_0 = arith.constant 0 : i32
    %c0_i32_1 = arith.constant 0 : i32
    return %c0_i32, %c0_i32_0 : i32, i32
  }
  func.func @transform_2(%arg0: i32) -> (i32, i32) {
    %c0_i32 = arith.constant 0 : i32
    %c0_i32_0 = arith.constant 0 : i32
    %c0_i32_1 = arith.constant 0 : i32
    return %c0_i32, %c0_i32_0 : i32, i32
  }
  func.func @transform_3(%arg0: i32) -> (i32, i32) {
    %c0_i32 = arith.constant 0 : i32
    %c0_i32_0 = arith.constant 0 : i32
    %c0_i32_1 = arith.constant 0 : i32
    return %c0_i32, %c0_i32_0 : i32, i32
  }
  func.func @transform_4(%arg0: i32) -> (i32, i32) {
    %c0_i32 = arith.constant 0 : i32
    %c0_i32_0 = arith.constant 0 : i32
    %c0_i32_1 = arith.constant 0 : i32
    return %c0_i32, %c0_i32_0 : i32, i32
  }
  func.func @transform_5(%arg0: i32) -> (i32, i32) {
    %c0_i32 = arith.constant 0 : i32
    %c0_i32_0 = arith.constant 0 : i32
    %c0_i32_1 = arith.constant 0 : i32
    return %c0_i32, %c0_i32_0 : i32, i32
  }
}

module attributes {stable_mosaic.version = 11 : i64} {
  func.func @decoder_seq_kernel(%arg0: i32, %arg1: memref<8xi32, #tpu.memory_space<smem>>, %arg2: memref<8x128xf32, #tpu.memory_space<vmem>>, %arg3: memref<1x8x128xf32, #tpu.memory_space<vmem>>, %arg4: memref<8x128xf32, #tpu.memory_space<vmem>>, %arg5: memref<8x128xf32, #tpu.memory_space<vmem>>, %arg6: memref<128x512xf32, #tpu.memory_space<vmem>>, %arg7: memref<128x512xf32, #tpu.memory_space<vmem>>, %arg8: memref<128x128xf32, #tpu.memory_space<vmem>>, %arg9: memref<1x128xf32, #tpu.memory_space<vmem>>, %arg10: memref<1x8x128xf32, #tpu.memory_space<vmem>>, %arg11: memref<8x128xf32, #tpu.memory_space<vmem>>, %arg12: memref<8x128xf32, #tpu.memory_space<vmem>>, %arg13: memref<8x128xf32, #tpu.memory_space<vmem>>) attributes {dimension_semantics = [#tpu.dimension_semantics<arbitrary>], iteration_bounds = array<i64: 7>, scalar_prefetch = 1 : i64, scratch_operands = 3 : i64, tpu.core_type = #tpu.core_type<tc>, window_params = [{pipeline_mode = #tpu.pipeline_mode<synchronous>, transform_indices = @transform_0, window_bounds = array<i64: 8, 128>}, {transform_indices = @transform_1, window_bounds = array<i64: 1, 8, 128>}, {pipeline_mode = #tpu.pipeline_mode<synchronous>, transform_indices = @transform_2, window_bounds = array<i64: 8, 128>}, {pipeline_mode = #tpu.pipeline_mode<synchronous>, transform_indices = @transform_3, window_bounds = array<i64: 8, 128>}, {pipeline_mode = #tpu.pipeline_mode<synchronous>, transform_indices = @transform_4, window_bounds = array<i64: 128, 512>}, {pipeline_mode = #tpu.pipeline_mode<synchronous>, transform_indices = @transform_5, window_bounds = array<i64: 128, 512>}, {pipeline_mode = #tpu.pipeline_mode<synchronous>, transform_indices = @transform_6, window_bounds = array<i64: 128, 128>}, {pipeline_mode = #tpu.pipeline_mode<synchronous>, transform_indices = @transform_7, window_bounds = array<i64: 1, 128>}, {transform_indices = @transform_8, window_bounds = array<i64: 1, 8, 128>}]} {
    %c0_i32 = arith.constant 0 : i32
    %0 = arith.cmpi eq, %arg0, %c0_i32 : i32
    %1 = arith.extui %0 : i1 to i32
    %c0_i32_0 = arith.constant 0 : i32
    %2 = arith.cmpi ne, %1, %c0_i32_0 : i32
    scf.if %2 {
      %c0_34 = arith.constant 0 : index
      %c0_35 = arith.constant 0 : index
      %72 = vector.load %arg2[%c0_34, %c0_35] : memref<8x128xf32, #tpu.memory_space<vmem>>, vector<8x128xf32>
      %c0_36 = arith.constant 0 : index
      %c0_37 = arith.constant 0 : index
      %73 = vector.load %arg11[%c0_36, %c0_37] : memref<8x128xf32, #tpu.memory_space<vmem>>, vector<8x128xf32>
      tpu.vector_store %arg11[%c0_36, %c0_37], %72 {strides = array<i32>} : memref<8x128xf32, #tpu.memory_space<vmem>>, vector<8x128xf32>,
      %c0_38 = arith.constant 0 : index
      %c0_39 = arith.constant 0 : index
      %74 = vector.load %arg4[%c0_38, %c0_39] : memref<8x128xf32, #tpu.memory_space<vmem>>, vector<8x128xf32>
      %c0_40 = arith.constant 0 : index
      %c0_41 = arith.constant 0 : index
      %75 = vector.load %arg12[%c0_40, %c0_41] : memref<8x128xf32, #tpu.memory_space<vmem>>, vector<8x128xf32>
      tpu.vector_store %arg12[%c0_40, %c0_41], %74 {strides = array<i32>} : memref<8x128xf32, #tpu.memory_space<vmem>>, vector<8x128xf32>,
      %c0_42 = arith.constant 0 : index
      %c0_43 = arith.constant 0 : index
      %76 = vector.load %arg5[%c0_42, %c0_43] : memref<8x128xf32, #tpu.memory_space<vmem>>, vector<8x128xf32>
      %c0_44 = arith.constant 0 : index
      %c0_45 = arith.constant 0 : index
      %77 = vector.load %arg13[%c0_44, %c0_45] : memref<8x128xf32, #tpu.memory_space<vmem>>, vector<8x128xf32>
      tpu.vector_store %arg13[%c0_44, %c0_45], %76 {strides = array<i32>} : memref<8x128xf32, #tpu.memory_space<vmem>>, vector<8x128xf32>,
    } else {
    }
    %c0 = arith.constant 0 : index
    %c0_1 = arith.constant 0 : index
    %3 = vector.load %arg11[%c0, %c0_1] : memref<8x128xf32, #tpu.memory_space<vmem>>, vector<8x128xf32>
    %c0_2 = arith.constant 0 : index
    %c0_3 = arith.constant 0 : index
    %4 = vector.load %arg12[%c0_2, %c0_3] : memref<8x128xf32, #tpu.memory_space<vmem>>, vector<8x128xf32>
    %c0_4 = arith.constant 0 : index
    %c0_5 = arith.constant 0 : index
    %5 = vector.load %arg13[%c0_4, %c0_5] : memref<8x128xf32, #tpu.memory_space<vmem>>, vector<8x128xf32>
    %c0_6 = arith.constant 0 : index
    %c0_7 = arith.constant 0 : index
    %6 = vector.load %arg6[%c0_6, %c0_7] : memref<128x512xf32, #tpu.memory_space<vmem>>, vector<128x512xf32>
    %cst = arith.constant dense<0.000000e+00> : vector<8x512xf32>
    %7 = tpu.matmul %3, %6, %cst {dimension_numbers = #tpu.dot_dimension_numbers<[1], [0], [0], [1], [0, 0, 1, 1], [], []>} : vector<8x128xf32>, vector<128x512xf32>, vector<8x512xf32> -> vector<8x512xf32>
    %c0_8 = arith.constant 0 : index
    %c0_9 = arith.constant 0 : index
    %8 = vector.load %arg7[%c0_8, %c0_9] : memref<128x512xf32, #tpu.memory_space<vmem>>, vector<128x512xf32>
    %cst_10 = arith.constant dense<0.000000e+00> : vector<8x512xf32>
    %9 = tpu.matmul %4, %8, %cst_10 {dimension_numbers = #tpu.dot_dimension_numbers<[1], [0], [0], [1], [0, 0, 1, 1], [], []>} : vector<8x128xf32>, vector<128x512xf32>, vector<8x512xf32> -> vector<8x512xf32>
    %10 = arith.addf %7, %9 : vector<8x512xf32>
    %11 = vector.extract_strided_slice %10 {offsets = [0, 0], sizes = [8, 128], strides = [1, 1]} : vector<8x512xf32> to vector<8x128xf32>
    %12 = arith.negf %11 : vector<8x128xf32>
    %13 = math.exp %12 : vector<8x128xf32>
    %cst_11 = arith.constant 1.000000e+00 : f32
    %14 = vector.broadcast %cst_11 : f32 to vector<8x128xf32>
    %15 = arith.addf %14, %13 : vector<8x128xf32>
    %16 = arith.divf %14, %15 : vector<8x128xf32>
    %17 = vector.extract_strided_slice %10 {offsets = [0, 128], sizes = [8, 128], strides = [1, 1]} : vector<8x512xf32> to vector<8x128xf32>
    %18 = arith.negf %17 : vector<8x128xf32>
    %19 = math.exp %18 : vector<8x128xf32>
    %cst_12 = arith.constant 1.000000e+00 : f32
    %20 = vector.broadcast %cst_12 : f32 to vector<8x128xf32>
    %21 = arith.addf %20, %19 : vector<8x128xf32>
    %22 = arith.divf %20, %21 : vector<8x128xf32>
    %23 = vector.extract_strided_slice %10 {offsets = [0, 256], sizes = [8, 128], strides = [1, 1]} : vector<8x512xf32> to vector<8x128xf32>
    %24 = math.tanh %23 : vector<8x128xf32>
    %25 = vector.extract_strided_slice %10 {offsets = [0, 384], sizes = [8, 128], strides = [1, 1]} : vector<8x512xf32> to vector<8x128xf32>
    %26 = arith.negf %25 : vector<8x128xf32>
    %27 = math.exp %26 : vector<8x128xf32>
    %cst_13 = arith.constant 1.000000e+00 : f32
    %28 = vector.broadcast %cst_13 : f32 to vector<8x128xf32>
    %29 = arith.addf %28, %27 : vector<8x128xf32>
    %30 = arith.divf %28, %29 : vector<8x128xf32>
    %31 = arith.mulf %22, %5 : vector<8x128xf32>
    %32 = arith.mulf %16, %24 : vector<8x128xf32>
    %33 = arith.addf %31, %32 : vector<8x128xf32>
    %34 = math.tanh %33 : vector<8x128xf32>
    %35 = arith.mulf %30, %34 : vector<8x128xf32>
    %c0_14 = arith.constant 0 : index
    %c0_15 = arith.constant 0 : index
    %36 = vector.load %arg8[%c0_14, %c0_15] : memref<128x128xf32, #tpu.memory_space<vmem>>, vector<128x128xf32>
    %cst_16 = arith.constant dense<0.000000e+00> : vector<8x128xf32>
    %37 = tpu.matmul %35, %36, %cst_16 {dimension_numbers = #tpu.dot_dimension_numbers<[1], [0], [0], [1], [0, 0, 1, 1], [], []>} : vector<8x128xf32>, vector<128x128xf32>, vector<8x128xf32> -> vector<8x128xf32>
    %c0_17 = arith.constant 0 : index
    %c0_18 = arith.constant 0 : index
    %38 = vector.load %arg9[%c0_17, %c0_18] : memref<1x128xf32, #tpu.memory_space<vmem>>, vector<1x128xf32>
    %39 = vector.broadcast %38 : vector<1x128xf32> to vector<8x128xf32>
    %40 = arith.addf %37, %39 : vector<8x128xf32>
    %c0_19 = arith.constant 0 : index
    %c0_20 = arith.constant 0 : index
    %c0_21 = arith.constant 0 : index
    %41 = vector.load %arg10[%c0_19, %c0_20, %c0_21] : memref<1x8x128xf32, #tpu.memory_space<vmem>>, vector<1x8x128xf32>
    %42 = vector.shape_cast %41 : vector<1x8x128xf32> to vector<8x128xf32>
    %43 = vector.shape_cast %40 : vector<8x128xf32> to vector<1x8x128xf32>
    tpu.vector_store %arg10[%c0_19, %c0_20, %c0_21], %43 {strides = array<i32>} : memref<1x8x128xf32, #tpu.memory_space<vmem>>, vector<1x8x128xf32>,
    %c0_22 = arith.constant 0 : index
    %c0_23 = arith.constant 0 : index
    %44 = vector.load %arg12[%c0_22, %c0_23] : memref<8x128xf32, #tpu.memory_space<vmem>>, vector<8x128xf32>
    tpu.vector_store %arg12[%c0_22, %c0_23], %35 {strides = array<i32>} : memref<8x128xf32, #tpu.memory_space<vmem>>, vector<8x128xf32>,
    %c0_24 = arith.constant 0 : index
    %c0_25 = arith.constant 0 : index
    %45 = vector.load %arg13[%c0_24, %c0_25] : memref<8x128xf32, #tpu.memory_space<vmem>>, vector<8x128xf32>
    tpu.vector_store %arg13[%c0_24, %c0_25], %33 {strides = array<i32>} : memref<8x128xf32, #tpu.memory_space<vmem>>, vector<8x128xf32>,
    %46 = tpu.iota {dimensions = array<i32: 1>} : vector<8x128xi32>
    %cst_26 = arith.constant dense<0xFF800000> : vector<8xf32>
    %47 = vector.multi_reduction <maximumf>, %40, %cst_26 [1] : vector<8x128xf32> to vector<8xf32>
    %48 = vector.shape_cast %47 : vector<8xf32> to vector<8x1xf32>
    %49 = vector.broadcast %48 : vector<8x1xf32> to vector<8x128xf32>
    %50 = arith.cmpf oeq, %40, %49 : vector<8x128xf32>
    %c128_i32 = arith.constant 128 : i32
    %51 = vector.broadcast %c128_i32 : i32 to vector<8x128xi32>
    %52 = arith.select %50, %46, %51 : vector<8x128xi1>, vector<8x128xi32>
    %cst_27 = arith.constant dense<2147483647> : vector<8xi32>
    %53 = vector.multi_reduction <minsi>, %52, %cst_27 [1] : vector<8x128xi32> to vector<8xi32>
    %54 = vector.shape_cast %53 : vector<8xi32> to vector<8x1xi32>
    %55 = vector.broadcast %54 : vector<8x1xi32> to vector<8x128xi32>
    %56 = arith.cmpi eq, %46, %55 : vector<8x128xi32>
    %57 = arith.extui %56 : vector<8x128xi1> to vector<8x128xi32>
    %58 = arith.sitofp %57 : vector<8x128xi32> to vector<8x128xf32>
    %c1_i32 = arith.constant 1 : i32
    %59 = arith.addi %arg0, %c1_i32 : i32
    %60 = arith.index_cast %59 : i32 to index
    %61 = memref.load %arg1[%60] : memref<8xi32, #tpu.memory_space<smem>>
    %62 = arith.sitofp %61 : i32 to f32
    %c0_28 = arith.constant 0 : index
    %c0_29 = arith.constant 0 : index
    %c0_30 = arith.constant 0 : index
    %63 = vector.load %arg3[%c0_28, %c0_29, %c0_30] : memref<1x8x128xf32, #tpu.memory_space<vmem>>, vector<1x8x128xf32>
    %64 = vector.shape_cast %63 : vector<1x8x128xf32> to vector<8x128xf32>
    %65 = vector.broadcast %62 : f32 to vector<8x128xf32>
    %66 = arith.mulf %65, %64 : vector<8x128xf32>
    %cst_31 = arith.constant 1.000000e+00 : f32
    %67 = arith.subf %cst_31, %62 : f32
    %68 = vector.broadcast %67 : f32 to vector<8x128xf32>
    %69 = arith.mulf %68, %58 : vector<8x128xf32>
    %70 = arith.addf %66, %69 : vector<8x128xf32>
    %c0_32 = arith.constant 0 : index
    %c0_33 = arith.constant 0 : index
    %71 = vector.load %arg11[%c0_32, %c0_33] : memref<8x128xf32, #tpu.memory_space<vmem>>, vector<8x128xf32>
    tpu.vector_store %arg11[%c0_32, %c0_33], %70 {strides = array<i32>} : memref<8x128xf32, #tpu.memory_space<vmem>>, vector<8x128xf32>,
    return
  }
  func.func @transform_0(%arg0: i32, %arg1: memref<8xi32, #tpu.memory_space<smem>>) -> (i32, i32) {
    %c0_i32 = arith.constant 0 : i32
    %c0_i32_0 = arith.constant 0 : i32
    %c0_i32_1 = arith.constant 0 : i32
    return %c0_i32, %c0_i32_0 : i32, i32
  }
  func.func @transform_1(%arg0: i32, %arg1: memref<8xi32, #tpu.memory_space<smem>>) -> (i32, i32, i32) {
    %c1_i32 = arith.constant 1 : i32
    %0 = arith.addi %arg0, %c1_i32 : i32
    %c0_i32 = arith.constant 0 : i32
    %c0_i32_0 = arith.constant 0 : i32
    %c0_i32_1 = arith.constant 0 : i32
    return %0, %c0_i32, %c0_i32_0 : i32, i32, i32
  }
  func.func @transform_2(%arg0: i32, %arg1: memref<8xi32, #tpu.memory_space<smem>>) -> (i32, i32) {
    %c0_i32 = arith.constant 0 : i32
    %c0_i32_0 = arith.constant 0 : i32
    %c0_i32_1 = arith.constant 0 : i32
    return %c0_i32, %c0_i32_0 : i32, i32
  }
  func.func @transform_3(%arg0: i32, %arg1: memref<8xi32, #tpu.memory_space<smem>>) -> (i32, i32) {
    %c0_i32 = arith.constant 0 : i32
    %c0_i32_0 = arith.constant 0 : i32
    %c0_i32_1 = arith.constant 0 : i32
    return %c0_i32, %c0_i32_0 : i32, i32
  }
  func.func @transform_4(%arg0: i32, %arg1: memref<8xi32, #tpu.memory_space<smem>>) -> (i32, i32) {
    %c0_i32 = arith.constant 0 : i32
    %c0_i32_0 = arith.constant 0 : i32
    %c0_i32_1 = arith.constant 0 : i32
    return %c0_i32, %c0_i32_0 : i32, i32
  }
  func.func @transform_5(%arg0: i32, %arg1: memref<8xi32, #tpu.memory_space<smem>>) -> (i32, i32) {
    %c0_i32 = arith.constant 0 : i32
    %c0_i32_0 = arith.constant 0 : i32
    %c0_i32_1 = arith.constant 0 : i32
    return %c0_i32, %c0_i32_0 : i32, i32
  }
  func.func @transform_6(%arg0: i32, %arg1: memref<8xi32, #tpu.memory_space<smem>>) -> (i32, i32) {
    %c0_i32 = arith.constant 0 : i32
    %c0_i32_0 = arith.constant 0 : i32
    %c0_i32_1 = arith.constant 0 : i32
    return %c0_i32, %c0_i32_0 : i32, i32
  }
  func.func @transform_7(%arg0: i32, %arg1: memref<8xi32, #tpu.memory_space<smem>>) -> (i32, i32) {
    %c0_i32 = arith.constant 0 : i32
    %c0_i32_0 = arith.constant 0 : i32
    %c0_i32_1 = arith.constant 0 : i32
    return %c0_i32, %c0_i32_0 : i32, i32
  }
  func.func @transform_8(%arg0: i32, %arg1: memref<8xi32, #tpu.memory_space<smem>>) -> (i32, i32, i32) {
    %c0_i32 = arith.constant 0 : i32
    %c0_i32_0 = arith.constant 0 : i32
    %c0_i32_1 = arith.constant 0 : i32
    return %arg0, %c0_i32, %c0_i32_0 : i32, i32, i32
  }
}

</mosaic_0001>

<bundles_post_ra>
// kernel: seq2seq_forward.3
= control target key start
LH: loop header
LB: loop body
LE: loop exit
PB: predicated region body
PF: predicated region fallthrough
CT: control target
= control target key end

     0   :  { %s1755_s0 = inlined_call_operand.vmem [shape: s32[8], index: 0, kind: input, shape index: {}]   ;;  %s1756_s1 = inlined_call_operand.vmem [shape: f32[8,128], index: 1, kind: input, shape index: {}]   ;;  %s1757_s2 = inlined_call_operand.vmem [shape: f32[8,8,128], index: 2, kind: input, shape index: {}]   ;;  %s1758_s3 = inlined_call_operand.vmem [shape: f32[8,128], index: 3, kind: input, shape index: {}]   ;;  %s1759_s4 = inlined_call_operand.vmem [shape: f32[8,128], index: 4, kind: input, shape index: {}]   ;;  %s1760_s5 = inlined_call_operand.vmem [shape: f32[128,512], index: 5, kind: input, shape index: {}]   ;;  %s1761_s6 = inlined_call_operand.vmem [shape: f32[128,512], index: 6, kind: input, shape index: {}]   ;;  %s1762_s7 = inlined_call_operand.vmem [shape: f32[128,128], index: 7, kind: input, shape index: {}]   ;;  %s1763_s8 = inlined_call_operand.vmem [shape: f32[1,128], index: 8, kind: input, shape index: {}]   ;;  %s1764_s9 = inlined_call_operand.vmem [shape: f32[7,8,128], index: 9, kind: output, shape index: {}]  }
   0x1   :  { %s14_s11 = sshll.u32 %s1755_s0, 4  ;;  %s15_s11 = int_to_ptr.vmem [resolvable:$true] %s14_s11 }
   0x2   :  { %s1198_s12 = scalar_lea.vmem %s15_s11, 16  ;;  %p1203_p1 = scmp.lt.s32.totalorder %s15_s11, %s15_s11 }
   0x3   :  { %p1199_p0 = scmp.ne.s32.totalorder %s15_s11, %s1198_s12  ;;  %p1204_p2 = scmp.lt.s32.totalorder %s1198_s12, %s1198_s12 }
   0x5   :  { %p1205_p3 = por %p1204_p2, %p1203_p1 }
   0x7   :  { %p1206_p4 = pnand %p1205_p3, %p1199_p0 }
   0x9   :  { %1209 = shalt.err (!%p1206_p4)  }
   0xa   :  { %s1220_s13 = smov [#allocation6]  }
   0xb   :  { %17 = dma.vmem_to_smem %s15_s11, 16, %s1220_s13, [#allocation5] }
   0xc   :  { %1214 = dma.done.wait [#allocation5], 16 }
   0xd   :  { %1215 = vsyncadd [#allocation5], 4294967280 }
   0xe   :  { %19 = sfence }
   0xf   :  { %s1277_s14 = smov 0  }
  0x10 LB: > { %s947_s0 = sadd.s32 4294967295, %s1218_s14   ;;  %p951_p5 = scmp.ge.s32.totalorder %s1218_s14, 1  ;;  %s1218_s14 = sphi %s1277_s14, %s25_s14  }
  0x11   : > { %p272_p6 = scmp.lt.s32.totalorder %s1218_s14, 8 }
  0x13   : > { %p273_p7 = pnand %p951_p5, %p272_p6 }
  0x14   : > { %s1285_s15 = sadd.s32 (!%p273_p7), 1, %s947_s0  ;;  %p311_p8 = scmp.lt.s32.totalorder (!%p273_p7), %s947_s0, 6 }
  0x15   : > { %276 = sbr.rel (%p273_p7) target bundleno = 1020 (0x3fc), region = 52  ;;  %p306_p9 = scmp.lt.s32.totalorder (!%p273_p7), %s1285_s15, 7 }
  0x16   : > { %p954_p10 = scmp.ne.s32.totalorder (!%p273_p7), %s947_s0, 0 }
  0x1c   : > { %s312_s16 = scalar_select %p311_p8, %s947_s0, 6 }
  0x1d   : > { %s307_s17 = scalar_select %p306_p9, %s1285_s15, 7 }
  0x1e   : > { %s953_s18 = sshll.u32 %s312_s16, 3  ;;  %318 = sbr.rel (%p954_p10) target bundleno = 37 (0x25), region = 56  ;;  %v319_v0 = vld [vmem:[%s1756_s1] sm:$0xff] (!%p954_p10) }
  0x1f   : > { %s952_s19 = sshll.u32 %s307_s17, 3  ;;  %s1292_s22 = scalar_lea.vmem %s1764_s9, %s953_s18  ;;  %v321_v1 = vld [vmem:[%s1758_s3] sm:$0xff] (!%p954_p10)  ;;  %320 = vst [vmem:[#allocation2] sm:$0xff] (!%p954_p10), %v319_v0 }
  0x20   : > { %s1297_s25 = scalar_lea.vmem %s1757_s2, %s952_s19  ;;  %v323_v2 = vld [vmem:[%s1759_s4] sm:$0xff] (!%p954_p10)  ;;  %322 = vst [vmem:[#allocation3] sm:$0xff] (!%p954_p10), %v321_v1 }
  0x21   : > { %324 = vst [vmem:[#allocation4] sm:$0xff] (!%p954_p10), %v323_v2 }
  0x25 PF: > { %v393_v3 = vld [vmem:[%s1761_s6 + $0x8] sm:$0xff]  ;;  %v395_v5 = vld [vmem:[%s1761_s6 + $0x18] sm:$0xff]  ;;  %v392_v8 = vld [vmem:[%s1761_s6] sm:$0xff]  ;;  %v1221_v10 = vmov 0.0   ;;  %vm1223_vm0 = vmmov 0   ;;  %s884_s13 = sld [smem:[#allocation6 + %s1285_s15]] }
  0x26   : > { %v397_v4 = vld [vmem:[%s1761_s6 + $0x28] sm:$0xff]  ;;  %v399_v7 = vld [vmem:[%s1761_s6 + $0x38] sm:$0xff]  ;;  %v396_v9 = vld [vmem:[%s1761_s6 + $0x20] sm:$0xff]  ;;  %520 = vmatprep.mubr.f32.mxu0 %v1221_v10  ;;  %591 = vmatprep.mubr.f32.mxu1 %v1221_v10 }
  0x27   : > { %v1014_v6 = vpack.c.bf16 %v397_v4, %v393_v3  ;;  %v1046_v11 = vpack.c.bf16 %v399_v7, %v395_v5  ;;  %v1016_v12 = vpack.c.bf16 %v396_v9, %v392_v8  ;;  %v394_v13 = vld [vmem:[%s1761_s6 + $0x10] sm:$0xff]  ;;  %v401_v15 = vld [vmem:[%s1761_s6 + $0x48] sm:$0xff]  ;;  %v403_v18 = vld [vmem:[%s1761_s6 + $0x58] sm:$0xff] }
  0x28   : > { %v398_v14 = vld [vmem:[%s1761_s6 + $0x30] sm:$0xff]  ;;  %v405_v17 = vld [vmem:[%s1761_s6 + $0x68] sm:$0xff]  ;;  %v407_v19 = vld [vmem:[%s1761_s6 + $0x78] sm:$0xff] }
  0x29   : > { %1015 = vmatprep.subr.bf16.mxu0 %v1014_v6  ;;  %v1048_v16 = vpack.c.bf16 %v398_v14, %v394_v13  ;;  %1047 = vmatprep.subr.bf16.mxu1 %v1046_v11  ;;  %v1018_v20 = vpack.c.bf16 %v405_v17, %v401_v15  ;;  %v1050_v21 = vpack.c.bf16 %v407_v19, %v403_v18  ;;  %v400_v22 = vld [vmem:[%s1761_s6 + $0x40] sm:$0xff]  ;;  %v402_v24 = vld [vmem:[%s1761_s6 + $0x50] sm:$0xff]  ;;  %v409_v27 = vld [vmem:[%s1761_s6 + $0x88] sm:$0xff] }
  0x2a   : > { %1017 = vmatpush1.bf16.msra.mxu0 %v1016_v12  ;;  %v404_v23 = vld [vmem:[%s1761_s6 + $0x60] sm:$0xff]  ;;  %v406_v26 = vld [vmem:[%s1761_s6 + $0x70] sm:$0xff]  ;;  %v413_v28 = vld [vmem:[%s1761_s6 + $0xa8] sm:$0xff] }
  0x2b   : > { %1049 = vmatpush1.bf16.msra.mxu1 %v1048_v16  ;;  %v1020_v25 = vpack.c.bf16 %v404_v23, %v400_v22  ;;  %1019 = vmatprep.subr.bf16.mxu0 %v1018_v20  ;;  %v1052_v29 = vpack.c.bf16 %v406_v26, %v402_v24  ;;  %v1022_v30 = vpack.c.bf16 %v413_v28, %v409_v27  ;;  %v411_v31 = vld [vmem:[%s1761_s6 + $0x98] sm:$0xff]  ;;  %v408_v33 = vld [vmem:[%s1761_s6 + $0x80] sm:$0xff]  ;;  %v410_v36 = vld [vmem:[%s1761_s6 + $0x90] sm:$0xff]  ;;  %s885_s0 = scvt.s32.f32 %s884_s13 }
  0x2c   : > { %1051 = vmatprep.subr.bf16.mxu1 %v1050_v21  ;;  %v415_v32 = vld [vmem:[%s1761_s6 + $0xb8] sm:$0xff]  ;;  %v412_v35 = vld [vmem:[%s1761_s6 + $0xa0] sm:$0xff]  ;;  %v414_v37 = vld [vmem:[%s1761_s6 + $0xb0] sm:$0xff] }
  0x2d   : > { %v1054_v34 = vpack.c.bf16 %v415_v32, %v411_v31  ;;  %v1024_v38 = vpack.c.bf16 %v412_v35, %v408_v33  ;;  %v417_v39 = vld [vmem:[%s1761_s6 + $0xc8] sm:$0xff]  ;;  %v419_v41 = vld [vmem:[%s1761_s6 + $0xd8] sm:$0xff]  ;;  %v1056_v42 = vpack.c.bf16 %v414_v37, %v410_v36  ;;  %v416_v45 = vld [vmem:[%s1761_s6 + $0xc0] sm:$0xff] }
  0x2e   : > { %1021 = vmatpush1.bf16.msra.mxu0 %v1020_v25  ;;  %v421_v40 = vld [vmem:[%s1761_s6 + $0xe8] sm:$0xff]  ;;  %v423_v44 = vld [vmem:[%s1761_s6 + $0xf8] sm:$0xff]  ;;  %v420_v46 = vld [vmem:[%s1761_s6 + $0xe0] sm:$0xff] }
  0x2f   : > { %1053 = vmatpush1.bf16.msra.mxu1 %v1052_v29  ;;  %1023 = vmatprep.subr.bf16.mxu0 %v1022_v30  ;;  %v1026_v43 = vpack.c.bf16 %v421_v40, %v417_v39  ;;  %v1058_v47 = vpack.c.bf16 %v423_v44, %v419_v41  ;;  %v418_v48 = vld [vmem:[%s1761_s6 + $0xd0] sm:$0xff]  ;;  %v425_v50 = vld [vmem:[%s1761_s6 + $0x108] sm:$0xff]  ;;  %v427_v52 = vld [vmem:[%s1761_s6 + $0x118] sm:$0xff]  ;;  %v1028_v54 = vpack.c.bf16 %v420_v46, %v416_v45 }
  0x30   : > { %1055 = vmatprep.subr.bf16.mxu1 %v1054_v34  ;;  %v422_v49 = vld [vmem:[%s1761_s6 + $0xf0] sm:$0xff]  ;;  %v429_v51 = vld [vmem:[%s1761_s6 + $0x128] sm:$0xff]  ;;  %v431_v53 = vld [vmem:[%s1761_s6 + $0x138] sm:$0xff] }
  0x31   : > { %v1060_v55 = vpack.c.bf16 %v422_v49, %v418_v48  ;;  %v1030_v56 = vpack.c.bf16 %v429_v51, %v425_v50  ;;  %v424_v57 = vld [vmem:[%s1761_s6 + $0x100] sm:$0xff]  ;;  %v426_v59 = vld [vmem:[%s1761_s6 + $0x110] sm:$0xff]  ;;  %v1062_v60 = vpack.c.bf16 %v431_v53, %v427_v52  ;;  %v433_v62 = vld [vmem:[%s1761_s6 + $0x148] sm:$0xff] }
  0x32   : > { %1025 = vmatpush1.bf16.msra.mxu0 %v1024_v38  ;;  %v428_v58 = vld [vmem:[%s1761_s6 + $0x120] sm:$0xff]  ;;  %v430_v61 = vld [vmem:[%s1761_s6 + $0x130] sm:$0xff]  ;;  %v437_v63 = vld [vmem:[%s1761_s6 + $0x168] sm:$0xff] }
  0x33   : > { %1057 = vmatpush1.bf16.msra.mxu1 %v1056_v42  ;;  %1027 = vmatprep.subr.bf16.mxu0 %v1026_v43  ;;  %v435_v0 = vld [vmem:[%s1761_s6 + $0x158] sm:$0xff]  ;;  %v1032_v2 = vpack.c.bf16 %v428_v58, %v424_v57  ;;  %v1064_v3 = vpack.c.bf16 %v430_v61, %v426_v59  ;;  %v1034_v4 = vpack.c.bf16 %v437_v63, %v433_v62  ;;  %v432_v5 = vld [vmem:[%s1761_s6 + $0x140] sm:$0xff]  ;;  %v434_v7 = vld [vmem:[%s1761_s6 + $0x150] sm:$0xff] }
  0x34   : > { %1059 = vmatprep.subr.bf16.mxu1 %v1058_v47  ;;  %v439_v1 = vld [vmem:[%s1761_s6 + $0x178] sm:$0xff]  ;;  %v436_v6 = vld [vmem:[%s1761_s6 + $0x160] sm:$0xff]  ;;  %v438_v9 = vld [vmem:[%s1761_s6 + $0x170] sm:$0xff] }
  0x35   : > { %v1066_v8 = vpack.c.bf16 %v439_v1, %v435_v0  ;;  %v441_v11 = vld [vmem:[%s1761_s6 + $0x188] sm:$0xff]  ;;  %v443_v13 = vld [vmem:[%s1761_s6 + $0x198] sm:$0xff]  ;;  %v1036_v15 = vpack.c.bf16 %v436_v6, %v432_v5  ;;  %v1068_v16 = vpack.c.bf16 %v438_v9, %v434_v7  ;;  %v440_v18 = vld [vmem:[%s1761_s6 + $0x180] sm:$0xff] }
  0x36   : > { %1029 = vmatpush1.bf16.msra.mxu0 %v1028_v54  ;;  %v445_v12 = vld [vmem:[%s1761_s6 + $0x1a8] sm:$0xff]  ;;  %v447_v14 = vld [vmem:[%s1761_s6 + $0x1b8] sm:$0xff]  ;;  %v444_v19 = vld [vmem:[%s1761_s6 + $0x1a0] sm:$0xff] }
  0x37   : > { %1061 = vmatpush1.bf16.msra.mxu1 %v1060_v55  ;;  %1031 = vmatprep.subr.bf16.mxu0 %v1030_v56  ;;  %v1038_v17 = vpack.c.bf16 %v445_v12, %v441_v11  ;;  %v442_v20 = vld [vmem:[%s1761_s6 + $0x190] sm:$0xff]  ;;  %v1070_v21 = vpack.c.bf16 %v447_v14, %v443_v13  ;;  %v449_v23 = vld [vmem:[%s1761_s6 + $0x1c8] sm:$0xff]  ;;  %v451_v25 = vld [vmem:[%s1761_s6 + $0x1d8] sm:$0xff]  ;;  %v1040_v27 = vpack.c.bf16 %v444_v19, %v440_v18 }
  0x38   : > { %1063 = vmatprep.subr.bf16.mxu1 %v1062_v60  ;;  %v446_v22 = vld [vmem:[%s1761_s6 + $0x1b0] sm:$0xff]  ;;  %v453_v24 = vld [vmem:[%s1761_s6 + $0x1e8] sm:$0xff]  ;;  %v455_v26 = vld [vmem:[%s1761_s6 + $0x1f8] sm:$0xff] }
  0x39   : > { %v1072_v28 = vpack.c.bf16 %v446_v22, %v442_v20  ;;  %v1042_v29 = vpack.c.bf16 %v453_v24, %v449_v23  ;;  %v448_v30 = vld [vmem:[%s1761_s6 + $0x1c0] sm:$0xff]  ;;  %v450_v32 = vld [vmem:[%s1761_s6 + $0x1d0] sm:$0xff]  ;;  %v1074_v33 = vpack.c.bf16 %v455_v26, %v451_v25  ;;  %v329_v35 = vld [vmem:[%s1760_s5 + $0x8] sm:$0xff] }
  0x3a   : > { %1033 = vmatpush1.bf16.msra.mxu0 %v1032_v2  ;;  %v452_v31 = vld [vmem:[%s1761_s6 + $0x1e0] sm:$0xff]  ;;  %v454_v34 = vld [vmem:[%s1761_s6 + $0x1f0] sm:$0xff]  ;;  %v333_v36 = vld [vmem:[%s1760_s5 + $0x28] sm:$0xff] }
  0x3b   : > { %1065 = vmatpush1.bf16.msra.mxu1 %v1064_v3  ;;  %1035 = vmatprep.subr.bf16.mxu0 %v1034_v4  ;;  %v331_v37 = vld [vmem:[%s1760_s5 + $0x18] sm:$0xff]  ;;  %v1044_v39 = vpack.c.bf16 %v452_v31, %v448_v30  ;;  %v1076_v40 = vpack.c.bf16 %v454_v34, %v450_v32  ;;  %v1078_v41 = vpack.c.bf16 %v333_v36, %v329_v35  ;;  %v328_v42 = vld [vmem:[%s1760_s5] sm:$0xff]  ;;  %v330_v44 = vld [vmem:[%s1760_s5 + $0x10] sm:$0xff] }
  0x3c   : > { %1067 = vmatprep.subr.bf16.mxu1 %v1066_v8  ;;  %v335_v38 = vld [vmem:[%s1760_s5 + $0x38] sm:$0xff]  ;;  %v332_v43 = vld [vmem:[%s1760_s5 + $0x20] sm:$0xff]  ;;  %v334_v46 = vld [vmem:[%s1760_s5 + $0x30] sm:$0xff] }
  0x3d   : > { %v1110_v45 = vpack.c.bf16 %v335_v38, %v331_v37  ;;  %v337_v47 = vld [vmem:[%s1760_s5 + $0x48] sm:$0xff]  ;;  %v339_v49 = vld [vmem:[%s1760_s5 + $0x58] sm:$0xff]  ;;  %v1080_v52 = vpack.c.bf16 %v332_v43, %v328_v42  ;;  %v1112_v53 = vpack.c.bf16 %v334_v46, %v330_v44  ;;  %v336_v55 = vld [vmem:[%s1760_s5 + $0x40] sm:$0xff] }
  0x3e   : > { %1037 = vmatpush1.bf16.msra.mxu0 %v1036_v15  ;;  %v341_v48 = vld [vmem:[%s1760_s5 + $0x68] sm:$0xff]  ;;  %v343_v50 = vld [vmem:[%s1760_s5 + $0x78] sm:$0xff]  ;;  %v340_v56 = vld [vmem:[%s1760_s5 + $0x60] sm:$0xff] }
  0x3f   : > { %1069 = vmatpush1.bf16.msra.mxu1 %v1068_v16  ;;  %1039 = vmatprep.subr.bf16.mxu0 %v1038_v17  ;;  %v326_v51 = vld [vmem:[#allocation3] sm:$0xff]  ;;  %v1082_v54 = vpack.c.bf16 %v341_v48, %v337_v47  ;;  %v338_v57 = vld [vmem:[%s1760_s5 + $0x50] sm:$0xff]  ;;  %v1114_v58 = vpack.c.bf16 %v343_v50, %v339_v49  ;;  %v347_v62 = vld [vmem:[%s1760_s5 + $0x98] sm:$0xff]  ;;  %v1084_v0 = vpack.c.bf16 %v340_v56, %v336_v55 }
  0x40   : > { %1071 = vmatprep.subr.bf16.mxu1 %v1070_v21  ;;  %v342_v59 = vld [vmem:[%s1760_s5 + $0x70] sm:$0xff]  ;;  %v345_v60 = vld [vmem:[%s1760_s5 + $0x88] sm:$0xff]  ;;  %v351_v63 = vld [vmem:[%s1760_s5 + $0xb8] sm:$0xff] }
  0x41   : > { %v349_v61 = vld [vmem:[%s1760_s5 + $0xa8] sm:$0xff]  ;;  %v1116_v1 = vpack.c.bf16 %v342_v59, %v338_v57  ;;  %v344_v3 = vld [vmem:[%s1760_s5 + $0x80] sm:$0xff]  ;;  %v346_v5 = vld [vmem:[%s1760_s5 + $0x90] sm:$0xff]  ;;  %v1118_v6 = vpack.c.bf16 %v351_v63, %v347_v62 }
  0x42   : > { %1041 = vmatpush1.bf16.msra.mxu0 %v1040_v27  ;;  %v1086_v2 = vpack.c.bf16 %v349_v61, %v345_v60  ;;  %v348_v4 = vld [vmem:[%s1760_s5 + $0xa0] sm:$0xff]  ;;  %v350_v7 = vld [vmem:[%s1760_s5 + $0xb0] sm:$0xff]  ;;  %v353_v8 = vld [vmem:[%s1760_s5 + $0xc8] sm:$0xff] }
  0x43   : > { %1073 = vmatpush1.bf16.msra.mxu1 %v1072_v28  ;;  %1043 = vmatprep.subr.bf16.mxu0 %v1042_v29  ;;  %v357_v9 = vld [vmem:[%s1760_s5 + $0xe8] sm:$0xff]  ;;  %v355_v11 = vld [vmem:[%s1760_s5 + $0xd8] sm:$0xff]  ;;  %v1088_v13 = vpack.c.bf16 %v348_v4, %v344_v3  ;;  %v1120_v14 = vpack.c.bf16 %v350_v7, %v346_v5  ;;  %v352_v16 = vld [vmem:[%s1760_s5 + $0xc0] sm:$0xff] }
  0x44   : > { %1075 = vmatprep.subr.bf16.mxu1 %v1074_v33  ;;  %v359_v12 = vld [vmem:[%s1760_s5 + $0xf8] sm:$0xff]  ;;  %v1090_v15 = vpack.c.bf16 %v357_v9, %v353_v8  ;;  %v356_v17 = vld [vmem:[%s1760_s5 + $0xe0] sm:$0xff]  ;;  %v354_v18 = vld [vmem:[%s1760_s5 + $0xd0] sm:$0xff] }
  0x45   : > { %v1122_v19 = vpack.c.bf16 %v359_v12, %v355_v11  ;;  %v358_v20 = vld [vmem:[%s1760_s5 + $0xf0] sm:$0xff]  ;;  %v361_v21 = vld [vmem:[%s1760_s5 + $0x108] sm:$0xff]  ;;  %v363_v23 = vld [vmem:[%s1760_s5 + $0x118] sm:$0xff]  ;;  %v1092_v25 = vpack.c.bf16 %v356_v17, %v352_v16  ;;  %v1222_v12 = vmov 0.0|0.0  }
  0x46   : > { %1045 = vmatpush1.bf16.msra.mxu0 %v1044_v39  ;;  %v365_v22 = vld [vmem:[%s1760_s5 + $0x128] sm:$0xff]  ;;  %v367_v24 = vld [vmem:[%s1760_s5 + $0x138] sm:$0xff]  ;;  %v1124_v26 = vpack.c.bf16 %v358_v20, %v354_v18  ;;  %v360_v28 = vld [vmem:[%s1760_s5 + $0x100] sm:$0xff] }
  0x47   : > { %1077 = vmatpush1.bf16.msra.mxu1 %v1076_v40  ;;  %1079 = vmatprep.subr.bf16.mxu0 %v1078_v41  ;;  %v1094_v27 = vpack.c.bf16 %v365_v22, %v361_v21  ;;  %v364_v29 = vld [vmem:[%s1760_s5 + $0x120] sm:$0xff]  ;;  %v362_v30 = vld [vmem:[%s1760_s5 + $0x110] sm:$0xff]  ;;  %v1126_v31 = vpack.c.bf16 %v367_v24, %v363_v23  ;;  %v369_v33 = vld [vmem:[%s1760_s5 + $0x148] sm:$0xff] }
  0x48   : > { %1111 = vmatprep.subr.bf16.mxu1 %v1110_v45  ;;  %v366_v32 = vld [vmem:[%s1760_s5 + $0x130] sm:$0xff]  ;;  %v373_v34 = vld [vmem:[%s1760_s5 + $0x168] sm:$0xff]  ;;  %v371_v35 = vld [vmem:[%s1760_s5 + $0x158] sm:$0xff]  ;;  %v1096_v37 = vpack.c.bf16 %v364_v29, %v360_v28 }
  0x49   : > { %521 = vmatmul.mubr.f32.vlgmr.msra.gmra.mrb[0].mxu0 %v326_v51  ;;  %v375_v36 = vld [vmem:[%s1760_s5 + $0x178] sm:$0xff]  ;;  %v1128_v38 = vpack.c.bf16 %v366_v32, %v362_v30  ;;  %v1098_v39 = vpack.c.bf16 %v373_v34, %v369_v33  ;;  %v368_v40 = vld [vmem:[%s1760_s5 + $0x140] sm:$0xff]  ;;  %v370_v42 = vld [vmem:[%s1760_s5 + $0x150] sm:$0xff] }
  0x4a   : > { %592 = vmatmul.mubr.f32.vlgmr.msra.gmra.mrb[0].mxu1 %v326_v51  ;;  %1081 = vmatpush1.bf16.msra.mxu0 %v1080_v52  ;;  %v372_v41 = vld [vmem:[%s1760_s5 + $0x160] sm:$0xff]  ;;  %v1130_v43 = vpack.c.bf16 %v375_v36, %v371_v35  ;;  %v374_v44 = vld [vmem:[%s1760_s5 + $0x170] sm:$0xff]  ;;  %v377_v45 = vld [vmem:[%s1760_s5 + $0x188] sm:$0xff] }
  0x4b   : > { %1113 = vmatpush1.bf16.msra.mxu1 %v1112_v53  ;;  %1083 = vmatprep.subr.bf16.mxu0 %v1082_v54  ;;  %v381_v46 = vld [vmem:[%s1760_s5 + $0x1a8] sm:$0xff]  ;;  %v379_v47 = vld [vmem:[%s1760_s5 + $0x198] sm:$0xff]  ;;  %v1100_v49 = vpack.c.bf16 %v372_v41, %v368_v40  ;;  %v1132_v50 = vpack.c.bf16 %v374_v44, %v370_v42  ;;  %v376_v52 = vld [vmem:[%s1760_s5 + $0x180] sm:$0xff] }
  0x4c   : > { %1115 = vmatprep.subr.bf16.mxu1 %v1114_v58  ;;  %662 = vmatprep.mubr.f32.mxu0 %v1221_v10  ;;  %v383_v48 = vld [vmem:[%s1760_s5 + $0x1b8] sm:$0xff]  ;;  %v1102_v51 = vpack.c.bf16 %v381_v46, %v377_v45  ;;  %v380_v53 = vld [vmem:[%s1760_s5 + $0x1a0] sm:$0xff]  ;;  %v378_v54 = vld [vmem:[%s1760_s5 + $0x190] sm:$0xff] }
  0x4d   : > { %733 = vmatprep.mubr.f32.mxu1 %v1221_v10  ;;  %v1134_v55 = vpack.c.bf16 %v383_v48, %v379_v47  ;;  %v382_v56 = vld [vmem:[%s1760_s5 + $0x1b0] sm:$0xff]  ;;  %v385_v57 = vld [vmem:[%s1760_s5 + $0x1c8] sm:$0xff]  ;;  %v387_v59 = vld [vmem:[%s1760_s5 + $0x1d8] sm:$0xff]  ;;  %v1104_v61 = vpack.c.bf16 %v380_v53, %v376_v52 }
  0x4e   : > { %1085 = vmatpush1.bf16.msra.mxu0 %v1084_v0  ;;  %v389_v58 = vld [vmem:[%s1760_s5 + $0x1e8] sm:$0xff]  ;;  %v391_v60 = vld [vmem:[%s1760_s5 + $0x1f8] sm:$0xff]  ;;  %v1136_v62 = vpack.c.bf16 %v382_v56, %v378_v54  ;;  %v384_v0 = vld [vmem:[%s1760_s5 + $0x1c0] sm:$0xff] }
  0x4f   : > { %1117 = vmatpush1.bf16.msra.mxu1 %v1116_v1  ;;  %1087 = vmatprep.subr.bf16.mxu0 %v1086_v2  ;;  %v1106_v63 = vpack.c.bf16 %v389_v58, %v385_v57  ;;  %v388_v1 = vld [vmem:[%s1760_s5 + $0x1e0] sm:$0xff]  ;;  %v1138_v2 = vpack.c.bf16 %v391_v60, %v387_v59  ;;  %v386_v3 = vld [vmem:[%s1760_s5 + $0x1d0] sm:$0xff]  ;;  %v765_v9 = vld [vmem:[%s1762_s7 + $0x8] sm:$0xff] }
  0x50   : > { %1119 = vmatprep.subr.bf16.mxu1 %v1118_v6  ;;  %v390_v4 = vld [vmem:[%s1760_s5 + $0x1f0] sm:$0xff]  ;;  %v1108_v5 = vpack.c.bf16 %v388_v1, %v384_v0  ;;  %v325_v7 = vld [vmem:[#allocation2] sm:$0xff]  ;;  %v769_v17 = vld [vmem:[%s1762_s7 + $0x28] sm:$0xff] }
  0x51   : > { %v1140_v6 = vpack.c.bf16 %v390_v4, %v386_v3  ;;  %v764_v8 = vld [vmem:[%s1762_s7] sm:$0xff]  ;;  %v771_v20 = vld [vmem:[%s1762_s7 + $0x38] sm:$0xff]  ;;  %v773_v23 = vld [vmem:[%s1762_s7 + $0x48] sm:$0xff] }
  0x52   : > { %1089 = vmatpush1.bf16.msra.mxu0 %v1088_v13  ;;  %v1143_v11 = vpack.c.bf16 %v765_v9, %v764_v8  ;;  %v766_v13 = vld [vmem:[%s1762_s7 + $0x10] sm:$0xff]  ;;  %v768_v16 = vld [vmem:[%s1762_s7 + $0x20] sm:$0xff]  ;;  %v777_v29 = vld [vmem:[%s1762_s7 + $0x68] sm:$0xff] }
  0x53   : > { %1121 = vmatpush1.bf16.msra.mxu1 %v1120_v14  ;;  %1091 = vmatprep.subr.bf16.mxu0 %v1090_v15  ;;  %v767_v14 = vld [vmem:[%s1762_s7 + $0x18] sm:$0xff]  ;;  %v1149_v18 = vpack.c.bf16 %v769_v17, %v768_v16  ;;  %v772_v22 = vld [vmem:[%s1762_s7 + $0x40] sm:$0xff]  ;;  %v327_v47 = vld [vmem:[#allocation4] sm:$0xff] }
  0x54   : > { %1123 = vmatprep.subr.bf16.mxu1 %v1122_v19  ;;  %v1146_v15 = vpack.c.bf16 %v767_v14, %v766_v13  ;;  %v770_v19 = vld [vmem:[%s1762_s7 + $0x30] sm:$0xff]  ;;  %v1155_v24 = vpack.c.bf16 %v773_v23, %v772_v22  ;;  %v779_v32 = vld [vmem:[%s1762_s7 + $0x78] sm:$0xff]  ;;  %v958_v57 = vld [vmem:[%s1763_s8] ss:$0 sm:$0xff]  ;;  %v887_v13 = vstv %s885_s0 }
  0x55   : > { %v1152_v21 = vpack.c.bf16 %v771_v20, %v770_v19 }
  0x56   : > { %1093 = vmatpush1.bf16.msra.mxu0 %v1092_v25  ;;  %v774_v25 = vld [vmem:[%s1762_s7 + $0x50] sm:$0xff] }
  0x57   : > { %1125 = vmatpush1.bf16.msra.mxu1 %v1124_v26  ;;  %1095 = vmatprep.subr.bf16.mxu0 %v1094_v27  ;;  %v775_v26 = vld [vmem:[%s1762_s7 + $0x58] sm:$0xff]  ;;  %v776_v27 = vld [vmem:[%s1762_s7 + $0x60] sm:$0xff] }
  0x58   : > { %1127 = vmatprep.subr.bf16.mxu1 %v1126_v31  ;;  %v1158_v28 = vpack.c.bf16 %v775_v26, %v774_v25  ;;  %v1161_v30 = vpack.c.bf16 %v777_v29, %v776_v27  ;;  %v778_v31 = vld [vmem:[%s1762_s7 + $0x70] sm:$0xff] }
  0x59   : > { %v1164_v33 = vpack.c.bf16 %v779_v32, %v778_v31 }
  0x5a   : > { %1097 = vmatpush1.bf16.msra.mxu0 %v1096_v37 }
  0x5b   : > { %1129 = vmatpush1.bf16.msra.mxu1 %v1128_v38  ;;  %1099 = vmatprep.subr.bf16.mxu0 %v1098_v39 }
  0x5c   : > { %1131 = vmatprep.subr.bf16.mxu1 %v1130_v43 }
  0x5e   : > { %1101 = vmatpush1.bf16.msra.mxu0 %v1100_v49 }
  0x5f   : > { %1133 = vmatpush1.bf16.msra.mxu1 %v1132_v50  ;;  %1103 = vmatprep.subr.bf16.mxu0 %v1102_v51 }
  0x60   : > { %1135 = vmatprep.subr.bf16.mxu1 %v1134_v55 }
  0x62   : > { %1105 = vmatpush1.bf16.msra.mxu0 %v1104_v61  ;;  %v860_v61 = vlaneseq }
  0x63   : > { %1137 = vmatpush1.bf16.msra.mxu1 %v1136_v62  ;;  %1107 = vmatprep.subr.bf16.mxu0 %v1106_v63 }
  0x64   : > { %1139 = vmatprep.subr.bf16.mxu1 %v1138_v2  ;;  %v861_v62 = vand.u32 127, %v860_v61 }
  0x66   : > { %1109 = vmatpush1.bf16.msra.mxu0 %v1108_v5 }
  0x67   : > { %1141 = vmatpush1.bf16.msra.mxu1 %v1140_v6  ;;  %1142 = vmatprep.subr.bf16.mxu0 %v1222_v12 }
  0x69   : > { %663 = vmatmul.mubr.f32.vlgmr.msra.gmra.mrb[0].mxu0 %v325_v7 }
  0x6a   : > { %734 = vmatmul.mubr.f32.vlgmr.msra.gmra.mrb[0].mxu1 %v325_v7  ;;  %1144 = vmatpush3.bf16.msra.mxu0 %v1143_v11 }
  0x6b   : > { %1145 = vmatprep.subr.bf16.mxu0 %v1222_v12  ;;  %1011 = vmatprep.mubr.msk.f32.mxu0 %vm1223_vm0, %v1221_v10 }
  0x6e   : > { %1147 = vmatpush3.bf16.msra.mxu0 %v1146_v15 }
  0x6f   : > { %1148 = vmatprep.subr.bf16.mxu0 %v1222_v12 }
  0x72   : > { %1150 = vmatpush3.bf16.msra.mxu0 %v1149_v18 }
  0x73   : > { %1151 = vmatprep.subr.bf16.mxu0 %v1222_v12 }
  0x76   : > { %1153 = vmatpush3.bf16.msra.mxu0 %v1152_v21 }
  0x77   : > { %1154 = vmatprep.subr.bf16.mxu0 %v1222_v12 }
  0x7a   : > { %1156 = vmatpush3.bf16.msra.mxu0 %v1155_v24 }
  0x7b   : > { %1157 = vmatprep.subr.bf16.mxu0 %v1222_v12 }
  0x7e   : > { %1159 = vmatpush3.bf16.msra.mxu0 %v1158_v28 }
  0x7f   : > { %1160 = vmatprep.subr.bf16.mxu0 %v1222_v12 }
  0x82   : > { %1162 = vmatpush3.bf16.msra.mxu0 %v1161_v30 }
  0x83   : > { %1163 = vmatprep.subr.bf16.mxu0 %v1222_v12  ;;  %v886_v12 = vld [vmem:[%s1297_s25] sm:$0xff] }
  0x84   : > { %v888_v16 = vmul.f32 %v887_v13, %v886_v12 }
  0x86   : > { %1165 = vmatpush3.bf16.msra.mxu0 %v1164_v33 }
 0x13c   : > { %v664_v34 = vpop.f32.mrb[0].mxu0 }
 0x13d   : > { %v955_v35 = vmul.f32 -1.442695, %v664_v34  ;;  %v735_v36 = vpop.f32.mrb[0].mxu1  ;;  %v666_v37 = vpop.f32.mrb[1].mxu0 }
 0x13e   : > { %v956_v38 = vmul.f32 -1.442695, %v666_v37  ;;  %v737_v39 = vpop.f32.mrb[1].mxu1 }
 0x13f   : > { %1182 = vpow2.f32 %v955_v35  ;;  %v957_v40 = vmul.f32 -1.442695, %v737_v39 }
 0x140   : > { %1184 = vpow2.f32 %v956_v38 }
 0x141   : > { %1186 = vpow2.f32 %v957_v40 }
 0x142   : > { %1188 = vtanh.f32 %v735_v36 }
 0x149   : > { %v1183_v41 = vpop.eup %1182 }
 0x14a   : > { %v1185_v42 = vpop.eup %1184  ;;  %v743_v43 = vadd.f32 1.0, %v1183_v41 }
 0x14b   : > { %v749_v44 = vadd.f32 1.0, %v1185_v42  ;;  %v1187_v45 = vpop.eup %1186 }
 0x14c   : > { %1190 = vrcp.f32 %v743_v43  ;;  %v1189_v46 = vpop.eup %1188  ;;  %v756_v51 = vadd.f32 1.0, %v1187_v45 }
 0x14d   : > { %1192 = vrcp.f32 %v749_v44 }
 0x14e   : > { %1194 = vrcp.f32 %v756_v51 }
 0x156   : > { %v1191_v48 = vpop.eup %1190 }
 0x157   : > { %v1193_v49 = vpop.eup %1192  ;;  %v760_v50 = vmul.f32 %v1191_v48, %v1189_v46 }
 0x158   : > { %v759_v52 = vmul.f32 %v1193_v49, %v327_v47  ;;  %v1195_v54 = vpop.eup %1194 }
 0x15a   : > { %v761_v53 = vadd.f32 %v760_v50, %v759_v52 }
 0x15c   : > { %859 = vst [vmem:[#allocation4] sm:$0xff] %v761_v53  ;;  %1196 = vtanh.f32 %v761_v53 }
 0x166   : > { %v1197_v55 = vpop.eup %1196 }
 0x167   : > { %v763_v56 = vmul.f32 %v1197_v55, %v1195_v54 }
 0x169   : > { %1012 = vmatmul.mubr.f32.vlgmr.msra.gmra.mrb[2].mxu0 %v763_v56  ;;  %858 = vst [vmem:[#allocation3] sm:$0xff] %v763_v56 }
 0x23c   : > { %v853_v58 = vpop.f32.mrb[2].mxu0 }
 0x23d   : > { %v854_v59 = vadd.f32 %v958_v57, %v853_v58  ;;  %v1013_v60 = vpop.f32.mrb[3].mxu0 }
 0x23f   : > { %857 = vst [vmem:[%s1292_s22] sm:$0xff] %v854_v59  ;;  %862 = vmax.xlane.f32.xlu0 %v854_v59  ;;  %s889_s22 = ssub.f32 1.0, %s885_s0 }
 0x241   : > { %v890_v15 = vstv %s889_s22 }
 0x2cc   : > { %v863_v63 = vpop.xlane.xlu0 %862 }
 0x2cd   : > { %vm864_vm1 = vcmp.eq.f32.partialorder %v854_v59, %v863_v63 }
 0x2ce   : > { %v865_v0 = vsel %vm864_vm1, %v861_v62, 128 }
 0x2cf   : > { %v867_v1 = vshra.s32 %v865_v0, 16  ;;  %v866_v3 = vand.u32 65535, %v865_v0 }
 0x2d1   : > { %v869_v2 = vcvt.s32.f32 %v867_v1  ;;  %v868_v5 = vcvt.s32.f32 %v866_v3 }
 0x2d3   : > { %870 = vmin.xlane.f32.xlu0 %v869_v2 }
 0x360   : > { %v871_v4 = vpop.xlane.xlu0 %870 }
 0x361   : > { %vm872_vm2 = vcmp.eq.f32.partialorder %v869_v2, %v871_v4  ;;  %v877_v7 = vcvt.f32.s32 %v871_v4 }
 0x362   : > { %v873_v6 = vsel %vm872_vm2, %v868_v5, inf }
 0x363   : > { %874 = vmin.xlane.f32.xlu1 %v873_v6  ;;  %v878_v9 = vshll.u32 %v877_v7, 16 }
 0x3f0   : > { %v875_v8 = vpop.xlane.xlu1 %874 }
 0x3f1   : > { %v876_v11 = vcvt.f32.s32 %v875_v8 }
 0x3f3   : > { %v879_v14 = vadd.s32 %v878_v9, %v876_v11 }
 0x3f5   : > { %vm880_vm3 = vcmp.eq.s32.totalorder %v861_v62, %v879_v14 }
 0x3f6   : > { %v959_v17 = vsel %vm880_vm3, 1.0, %v1221_v10 }
 0x3f7   : > { %v891_v18 = vmul.f32 %v959_v17, %v890_v15 }
 0x3f9   : > { %v892_v19 = vadd.f32 %v891_v18, %v888_v16 }
 0x3fb   : > { %893 = vst [vmem:[#allocation2] sm:$0xff] %v892_v19 }
 0x3fc PF: > { %s25_s14 = sadd.s32 1, %s1218_s14  }
 0x3fd   : > { %p22_p11 = scmp.ge.s32.totalorder %s25_s14, 9  }
 0x3ff   :  { %24 = sbr.rel (!%p22_p11) target bundleno = 16 (0x10), region = 86 }

// kernel: seq2seq_forward.2
= control target key start
LH: loop header
LB: loop body
LE: loop exit
PB: predicated region body
PF: predicated region fallthrough
CT: control target
= control target key end

     0   :  { %v3758_v3 = vmov 0.0   ;;  %s4812_s1 = inlined_call_operand.vmem [shape: f32[128,512], index: 1, kind: input, shape index: {}]   ;;  %s4813_s2 = inlined_call_operand.vmem [shape: f32[128,512], index: 2, kind: input, shape index: {}]   ;;  %s4814_s0 = inlined_call_operand.vmem [shape: f32[96,128], index: 0, kind: input, shape index: {}]   ;;  %s4815_s3 = inlined_call_operand.vmem [shape: f32[1,512], index: 3, kind: input, shape index: {}]   ;;  %s4816_s5 = inlined_call_operand.vmem [shape: f32[8,128], index: 5, kind: output, shape index: {1}]   ;;  %s4817_s4 = inlined_call_operand.vmem [shape: f32[8,128], index: 4, kind: output, shape index: {0}]  }
   0x1   :  { %v32_v0 = vld [vmem:[%s4812_s1 + $0x8] sm:$0xff]  ;;  %v34_v2 = vld [vmem:[%s4812_s1 + $0x18] sm:$0xff]  ;;  %181 = vmatprep.mubr.f32.mxu0 %v3758_v3  ;;  %318 = vmatprep.mubr.f32.mxu1 %v3758_v3  ;;  %v31_v6 = vld [vmem:[%s4812_s1] sm:$0xff] }
   0x2   :  { %v36_v1 = vld [vmem:[%s4812_s1 + $0x28] sm:$0xff]  ;;  %v38_v5 = vld [vmem:[%s4812_s1 + $0x38] sm:$0xff]  ;;  %v35_v7 = vld [vmem:[%s4812_s1 + $0x20] sm:$0xff] }
   0x3   :  { %v2637_v4 = vpack.c.bf16 %v36_v1, %v32_v0  ;;  %v2669_v8 = vpack.c.bf16 %v38_v5, %v34_v2  ;;  %v2639_v9 = vpack.c.bf16 %v35_v7, %v31_v6  ;;  %v33_v10 = vld [vmem:[%s4812_s1 + $0x10] sm:$0xff]  ;;  %v40_v12 = vld [vmem:[%s4812_s1 + $0x48] sm:$0xff]  ;;  %v42_v15 = vld [vmem:[%s4812_s1 + $0x58] sm:$0xff] }
   0x4   :  { %v37_v11 = vld [vmem:[%s4812_s1 + $0x30] sm:$0xff]  ;;  %v44_v14 = vld [vmem:[%s4812_s1 + $0x68] sm:$0xff]  ;;  %v46_v16 = vld [vmem:[%s4812_s1 + $0x78] sm:$0xff] }
   0x5   :  { %2638 = vmatprep.subr.bf16.mxu0 %v2637_v4  ;;  %v2671_v13 = vpack.c.bf16 %v37_v11, %v33_v10  ;;  %2670 = vmatprep.subr.bf16.mxu1 %v2669_v8  ;;  %v2641_v17 = vpack.c.bf16 %v44_v14, %v40_v12  ;;  %v2673_v18 = vpack.c.bf16 %v46_v16, %v42_v15  ;;  %v39_v19 = vld [vmem:[%s4812_s1 + $0x40] sm:$0xff]  ;;  %v41_v21 = vld [vmem:[%s4812_s1 + $0x50] sm:$0xff]  ;;  %v48_v24 = vld [vmem:[%s4812_s1 + $0x88] sm:$0xff] }
   0x6   :  { %2640 = vmatpush1.bf16.msra.mxu0 %v2639_v9  ;;  %v43_v20 = vld [vmem:[%s4812_s1 + $0x60] sm:$0xff]  ;;  %v45_v23 = vld [vmem:[%s4812_s1 + $0x70] sm:$0xff]  ;;  %v52_v25 = vld [vmem:[%s4812_s1 + $0xa8] sm:$0xff] }
   0x7   :  { %2672 = vmatpush1.bf16.msra.mxu1 %v2671_v13  ;;  %v2643_v22 = vpack.c.bf16 %v43_v20, %v39_v19  ;;  %2642 = vmatprep.subr.bf16.mxu0 %v2641_v17  ;;  %v2675_v26 = vpack.c.bf16 %v45_v23, %v41_v21  ;;  %v2645_v27 = vpack.c.bf16 %v52_v25, %v48_v24  ;;  %v50_v28 = vld [vmem:[%s4812_s1 + $0x98] sm:$0xff]  ;;  %v47_v30 = vld [vmem:[%s4812_s1 + $0x80] sm:$0xff]  ;;  %v49_v33 = vld [vmem:[%s4812_s1 + $0x90] sm:$0xff] }
   0x8   :  { %2674 = vmatprep.subr.bf16.mxu1 %v2673_v18  ;;  %v54_v29 = vld [vmem:[%s4812_s1 + $0xb8] sm:$0xff]  ;;  %v51_v32 = vld [vmem:[%s4812_s1 + $0xa0] sm:$0xff]  ;;  %v53_v34 = vld [vmem:[%s4812_s1 + $0xb0] sm:$0xff] }
   0x9   :  { %v2677_v31 = vpack.c.bf16 %v54_v29, %v50_v28  ;;  %v2647_v35 = vpack.c.bf16 %v51_v32, %v47_v30  ;;  %v56_v36 = vld [vmem:[%s4812_s1 + $0xc8] sm:$0xff]  ;;  %v58_v38 = vld [vmem:[%s4812_s1 + $0xd8] sm:$0xff]  ;;  %v2679_v39 = vpack.c.bf16 %v53_v34, %v49_v33  ;;  %v55_v42 = vld [vmem:[%s4812_s1 + $0xc0] sm:$0xff] }
   0xa   :  { %2644 = vmatpush1.bf16.msra.mxu0 %v2643_v22  ;;  %v60_v37 = vld [vmem:[%s4812_s1 + $0xe8] sm:$0xff]  ;;  %v62_v41 = vld [vmem:[%s4812_s1 + $0xf8] sm:$0xff]  ;;  %v59_v43 = vld [vmem:[%s4812_s1 + $0xe0] sm:$0xff] }
   0xb   :  { %2676 = vmatpush1.bf16.msra.mxu1 %v2675_v26  ;;  %2646 = vmatprep.subr.bf16.mxu0 %v2645_v27  ;;  %v2649_v40 = vpack.c.bf16 %v60_v37, %v56_v36  ;;  %v2681_v44 = vpack.c.bf16 %v62_v41, %v58_v38  ;;  %v57_v45 = vld [vmem:[%s4812_s1 + $0xd0] sm:$0xff]  ;;  %v64_v47 = vld [vmem:[%s4812_s1 + $0x108] sm:$0xff]  ;;  %v66_v49 = vld [vmem:[%s4812_s1 + $0x118] sm:$0xff]  ;;  %v2651_v51 = vpack.c.bf16 %v59_v43, %v55_v42 }
   0xc   :  { %2678 = vmatprep.subr.bf16.mxu1 %v2677_v31  ;;  %v61_v46 = vld [vmem:[%s4812_s1 + $0xf0] sm:$0xff]  ;;  %v68_v48 = vld [vmem:[%s4812_s1 + $0x128] sm:$0xff]  ;;  %v70_v50 = vld [vmem:[%s4812_s1 + $0x138] sm:$0xff] }
   0xd   :  { %v2683_v52 = vpack.c.bf16 %v61_v46, %v57_v45  ;;  %v2653_v53 = vpack.c.bf16 %v68_v48, %v64_v47  ;;  %v63_v54 = vld [vmem:[%s4812_s1 + $0x100] sm:$0xff]  ;;  %v65_v56 = vld [vmem:[%s4812_s1 + $0x110] sm:$0xff]  ;;  %v2685_v57 = vpack.c.bf16 %v70_v50, %v66_v49  ;;  %v72_v59 = vld [vmem:[%s4812_s1 + $0x148] sm:$0xff] }
   0xe   :  { %2648 = vmatpush1.bf16.msra.mxu0 %v2647_v35  ;;  %v67_v55 = vld [vmem:[%s4812_s1 + $0x120] sm:$0xff]  ;;  %v69_v58 = vld [vmem:[%s4812_s1 + $0x130] sm:$0xff]  ;;  %v76_v60 = vld [vmem:[%s4812_s1 + $0x168] sm:$0xff] }
   0xf   :  { %2680 = vmatpush1.bf16.msra.mxu1 %v2679_v39  ;;  %2650 = vmatprep.subr.bf16.mxu0 %v2649_v40  ;;  %v74_v61 = vld [vmem:[%s4812_s1 + $0x158] sm:$0xff]  ;;  %v2655_v63 = vpack.c.bf16 %v67_v55, %v63_v54  ;;  %v2687_v0 = vpack.c.bf16 %v69_v58, %v65_v56  ;;  %v2657_v1 = vpack.c.bf16 %v76_v60, %v72_v59  ;;  %v71_v2 = vld [vmem:[%s4812_s1 + $0x140] sm:$0xff]  ;;  %v73_v5 = vld [vmem:[%s4812_s1 + $0x150] sm:$0xff] }
  0x10   :  { %2682 = vmatprep.subr.bf16.mxu1 %v2681_v44  ;;  %v78_v62 = vld [vmem:[%s4812_s1 + $0x178] sm:$0xff]  ;;  %v75_v4 = vld [vmem:[%s4812_s1 + $0x160] sm:$0xff]  ;;  %v77_v7 = vld [vmem:[%s4812_s1 + $0x170] sm:$0xff] }
  0x11   :  { %v2689_v6 = vpack.c.bf16 %v78_v62, %v74_v61  ;;  %v80_v8 = vld [vmem:[%s4812_s1 + $0x188] sm:$0xff]  ;;  %v82_v10 = vld [vmem:[%s4812_s1 + $0x198] sm:$0xff]  ;;  %v2659_v12 = vpack.c.bf16 %v75_v4, %v71_v2  ;;  %v2691_v13 = vpack.c.bf16 %v77_v7, %v73_v5  ;;  %v79_v15 = vld [vmem:[%s4812_s1 + $0x180] sm:$0xff] }
  0x12   :  { %2652 = vmatpush1.bf16.msra.mxu0 %v2651_v51  ;;  %v84_v9 = vld [vmem:[%s4812_s1 + $0x1a8] sm:$0xff]  ;;  %v86_v11 = vld [vmem:[%s4812_s1 + $0x1b8] sm:$0xff]  ;;  %v83_v16 = vld [vmem:[%s4812_s1 + $0x1a0] sm:$0xff] }
  0x13   :  { %2684 = vmatpush1.bf16.msra.mxu1 %v2683_v52  ;;  %2654 = vmatprep.subr.bf16.mxu0 %v2653_v53  ;;  %v2661_v14 = vpack.c.bf16 %v84_v9, %v80_v8  ;;  %v81_v17 = vld [vmem:[%s4812_s1 + $0x190] sm:$0xff]  ;;  %v2693_v18 = vpack.c.bf16 %v86_v11, %v82_v10  ;;  %v88_v20 = vld [vmem:[%s4812_s1 + $0x1c8] sm:$0xff]  ;;  %v90_v22 = vld [vmem:[%s4812_s1 + $0x1d8] sm:$0xff]  ;;  %v2663_v24 = vpack.c.bf16 %v83_v16, %v79_v15 }
  0x14   :  { %2686 = vmatprep.subr.bf16.mxu1 %v2685_v57  ;;  %v85_v19 = vld [vmem:[%s4812_s1 + $0x1b0] sm:$0xff]  ;;  %v92_v21 = vld [vmem:[%s4812_s1 + $0x1e8] sm:$0xff]  ;;  %v94_v23 = vld [vmem:[%s4812_s1 + $0x1f8] sm:$0xff] }
  0x15   :  { %v2695_v25 = vpack.c.bf16 %v85_v19, %v81_v17  ;;  %v2665_v26 = vpack.c.bf16 %v92_v21, %v88_v20  ;;  %v87_v27 = vld [vmem:[%s4812_s1 + $0x1c0] sm:$0xff]  ;;  %v89_v29 = vld [vmem:[%s4812_s1 + $0x1d0] sm:$0xff]  ;;  %v2697_v30 = vpack.c.bf16 %v94_v23, %v90_v22  ;;  %v440_v32 = vld [vmem:[%s4813_s2 + $0x8] sm:$0xff] }
  0x16   :  { %2656 = vmatpush1.bf16.msra.mxu0 %v2655_v63  ;;  %v91_v28 = vld [vmem:[%s4812_s1 + $0x1e0] sm:$0xff]  ;;  %v93_v31 = vld [vmem:[%s4812_s1 + $0x1f0] sm:$0xff]  ;;  %v444_v33 = vld [vmem:[%s4813_s2 + $0x28] sm:$0xff] }
  0x17   :  { %2688 = vmatpush1.bf16.msra.mxu1 %v2687_v0  ;;  %2658 = vmatprep.subr.bf16.mxu0 %v2657_v1  ;;  %v442_v34 = vld [vmem:[%s4813_s2 + $0x18] sm:$0xff]  ;;  %v2667_v36 = vpack.c.bf16 %v91_v28, %v87_v27  ;;  %v2699_v37 = vpack.c.bf16 %v93_v31, %v89_v29  ;;  %v3995_v38 = vpack.c.bf16 %v444_v33, %v440_v32  ;;  %v439_v39 = vld [vmem:[%s4813_s2] sm:$0xff]  ;;  %v448_v41 = vld [vmem:[%s4813_s2 + $0x48] sm:$0xff] }
  0x18   :  { %2690 = vmatprep.subr.bf16.mxu1 %v2689_v6  ;;  %v446_v35 = vld [vmem:[%s4813_s2 + $0x38] sm:$0xff]  ;;  %v443_v40 = vld [vmem:[%s4813_s2 + $0x20] sm:$0xff]  ;;  %v452_v43 = vld [vmem:[%s4813_s2 + $0x68] sm:$0xff] }
  0x19   :  { %v4006_v42 = vpack.c.bf16 %v446_v35, %v442_v34  ;;  %v441_v44 = vld [vmem:[%s4813_s2 + $0x10] sm:$0xff]  ;;  %v19_v46 = vld [vmem:[%s4814_s0] sm:$0xff]  ;;  %v4020_v47 = vpack.c.bf16 %v443_v40, %v439_v39  ;;  %v450_v48 = vld [vmem:[%s4813_s2 + $0x58] sm:$0xff]  ;;  %v4029_v50 = vpack.c.bf16 %v452_v43, %v448_v41 }
  0x1a   :  { %2660 = vmatpush1.bf16.msra.mxu0 %v2659_v12  ;;  %v445_v45 = vld [vmem:[%s4813_s2 + $0x30] sm:$0xff]  ;;  %v454_v49 = vld [vmem:[%s4813_s2 + $0x78] sm:$0xff]  ;;  %v447_v51 = vld [vmem:[%s4813_s2 + $0x40] sm:$0xff] }
  0x1b   :  { %2692 = vmatpush1.bf16.msra.mxu1 %v2691_v13  ;;  %2662 = vmatprep.subr.bf16.mxu0 %v2661_v14  ;;  %v451_v52 = vld [vmem:[%s4813_s2 + $0x60] sm:$0xff]  ;;  %v456_v53 = vld [vmem:[%s4813_s2 + $0x88] sm:$0xff]  ;;  %v4041_v54 = vpack.c.bf16 %v445_v45, %v441_v44  ;;  %v4046_v56 = vpack.c.bf16 %v454_v49, %v450_v48  ;;  %v449_v57 = vld [vmem:[%s4813_s2 + $0x50] sm:$0xff] }
  0x1c   :  { %2694 = vmatprep.subr.bf16.mxu1 %v2693_v18  ;;  %v460_v55 = vld [vmem:[%s4813_s2 + $0xa8] sm:$0xff]  ;;  %v453_v58 = vld [vmem:[%s4813_s2 + $0x70] sm:$0xff]  ;;  %v458_v60 = vld [vmem:[%s4813_s2 + $0x98] sm:$0xff]  ;;  %v4066_v62 = vpack.c.bf16 %v451_v52, %v447_v51 }
  0x1d   :  { %v20_v59 = vld [vmem:[%s4814_s0 + $0x8] sm:$0xff]  ;;  %v462_v61 = vld [vmem:[%s4813_s2 + $0xb8] sm:$0xff]  ;;  %v4069_v63 = vpack.c.bf16 %v460_v55, %v456_v53  ;;  %v455_v0 = vld [vmem:[%s4813_s2 + $0x80] sm:$0xff]  ;;  %v4081_v4 = vpack.c.bf16 %v453_v58, %v449_v57 }
  0x1e   :  { %2664 = vmatpush1.bf16.msra.mxu0 %v2663_v24  ;;  %v459_v1 = vld [vmem:[%s4813_s2 + $0xa0] sm:$0xff]  ;;  %v464_v2 = vld [vmem:[%s4813_s2 + $0xc8] sm:$0xff]  ;;  %v4087_v6 = vpack.c.bf16 %v462_v61, %v458_v60  ;;  %v457_v7 = vld [vmem:[%s4813_s2 + $0x90] sm:$0xff] }
  0x1f   :  { %2696 = vmatpush1.bf16.msra.mxu1 %v2695_v25  ;;  %2666 = vmatprep.subr.bf16.mxu0 %v2665_v26  ;;  %v468_v5 = vld [vmem:[%s4813_s2 + $0xe8] sm:$0xff]  ;;  %v461_v8 = vld [vmem:[%s4813_s2 + $0xb0] sm:$0xff]  ;;  %v466_v10 = vld [vmem:[%s4813_s2 + $0xd8] sm:$0xff]  ;;  %v4107_v12 = vpack.c.bf16 %v459_v1, %v455_v0 }
  0x20   :  { %2698 = vmatprep.subr.bf16.mxu1 %v2697_v30  ;;  %v21_v9 = vld [vmem:[%s4814_s0 + $0x10] sm:$0xff]  ;;  %v470_v11 = vld [vmem:[%s4813_s2 + $0xf8] sm:$0xff]  ;;  %v4110_v13 = vpack.c.bf16 %v468_v5, %v464_v2  ;;  %v463_v14 = vld [vmem:[%s4813_s2 + $0xc0] sm:$0xff]  ;;  %v4122_v17 = vpack.c.bf16 %v461_v8, %v457_v7 }
  0x21   :  { %v467_v15 = vld [vmem:[%s4813_s2 + $0xe0] sm:$0xff]  ;;  %v472_v16 = vld [vmem:[%s4813_s2 + $0x108] sm:$0xff]  ;;  %v4128_v19 = vpack.c.bf16 %v470_v11, %v466_v10  ;;  %v465_v20 = vld [vmem:[%s4813_s2 + $0xd0] sm:$0xff] }
  0x22   :  { %2668 = vmatpush1.bf16.msra.mxu0 %v2667_v36  ;;  %v476_v18 = vld [vmem:[%s4813_s2 + $0x128] sm:$0xff]  ;;  %v469_v21 = vld [vmem:[%s4813_s2 + $0xf0] sm:$0xff]  ;;  %v22_v22 = vld [vmem:[%s4814_s0 + $0x18] sm:$0xff]  ;;  %v4148_v25 = vpack.c.bf16 %v467_v15, %v463_v14 }
  0x23   :  { %2700 = vmatpush1.bf16.msra.mxu1 %v2699_v37  ;;  %2702 = vmatprep.subr.bf16.mxu0 %v3995_v38  ;;  %v474_v23 = vld [vmem:[%s4813_s2 + $0x118] sm:$0xff]  ;;  %v4151_v26 = vpack.c.bf16 %v476_v18, %v472_v16  ;;  %v471_v27 = vld [vmem:[%s4813_s2 + $0x100] sm:$0xff]  ;;  %v4160_v29 = vpack.c.bf16 %v469_v21, %v465_v20  ;;  %v480_v30 = vld [vmem:[%s4813_s2 + $0x148] sm:$0xff] }
  0x24   :  { %2734 = vmatprep.subr.bf16.mxu1 %v4006_v42  ;;  %v478_v24 = vld [vmem:[%s4813_s2 + $0x138] sm:$0xff]  ;;  %v475_v28 = vld [vmem:[%s4813_s2 + $0x120] sm:$0xff]  ;;  %v484_v31 = vld [vmem:[%s4813_s2 + $0x168] sm:$0xff] }
  0x25   :  { %182 = vmatmul.mubr.f32.vlgmr.msra.gmra.mrb[0].mxu0 %v19_v46  ;;  %v4169_v32 = vpack.c.bf16 %v478_v24, %v474_v23  ;;  %v473_v33 = vld [vmem:[%s4813_s2 + $0x110] sm:$0xff]  ;;  %v23_v35 = vld [vmem:[%s4814_s0 + $0x20] sm:$0xff]  ;;  %v482_v36 = vld [vmem:[%s4813_s2 + $0x158] sm:$0xff]  ;;  %v4189_v39 = vpack.c.bf16 %v475_v28, %v471_v27  ;;  %v4193_v40 = vpack.c.bf16 %v484_v31, %v480_v30 }
  0x26   :  { %319 = vmatmul.mubr.f32.vlgmr.msra.gmra.mrb[0].mxu1 %v19_v46  ;;  %2704 = vmatpush1.bf16.msra.mxu0 %v4020_v47  ;;  %v477_v34 = vld [vmem:[%s4813_s2 + $0x130] sm:$0xff]  ;;  %v486_v37 = vld [vmem:[%s4813_s2 + $0x178] sm:$0xff]  ;;  %v479_v41 = vld [vmem:[%s4813_s2 + $0x140] sm:$0xff] }
  0x27   :  { %187 = vmatprep.mubr.f32.mxu0 %v3758_v3  ;;  %324 = vmatprep.mubr.f32.mxu1 %v3758_v3  ;;  %v483_v43 = vld [vmem:[%s4813_s2 + $0x160] sm:$0xff]  ;;  %v4201_v44 = vpack.c.bf16 %v477_v34, %v473_v33  ;;  %v488_v45 = vld [vmem:[%s4813_s2 + $0x188] sm:$0xff]  ;;  %v4210_v48 = vpack.c.bf16 %v486_v37, %v482_v36  ;;  %v481_v49 = vld [vmem:[%s4813_s2 + $0x150] sm:$0xff]  ;;  %v97_v34 = vlaneseq }
  0x28   :  { %2706 = vmatprep.subr.bf16.mxu0 %v4029_v50  ;;  %2736 = vmatpush1.bf16.msra.mxu1 %v4041_v54  ;;  %v492_v46 = vld [vmem:[%s4813_s2 + $0x1a8] sm:$0xff]  ;;  %v485_v51 = vld [vmem:[%s4813_s2 + $0x170] sm:$0xff]  ;;  %v490_v53 = vld [vmem:[%s4813_s2 + $0x198] sm:$0xff]  ;;  %v4230_v57 = vpack.c.bf16 %v483_v43, %v479_v41 }
  0x29   :  { %188 = vmatmul.mubr.f32.gmra.mrb[2].mxu0 %v20_v59  ;;  %2738 = vmatprep.subr.bf16.mxu1 %v4046_v56  ;;  %v24_v52 = vld [vmem:[%s4814_s0 + $0x28] sm:$0xff]  ;;  %v494_v55 = vld [vmem:[%s4813_s2 + $0x1b8] sm:$0xff]  ;;  %v4234_v58 = vpack.c.bf16 %v492_v46, %v488_v45  ;;  %v491_v60 = vld [vmem:[%s4813_s2 + $0x1a0] sm:$0xff]  ;;  %v4242_v61 = vpack.c.bf16 %v485_v51, %v481_v49 }
  0x2a   :  { %325 = vmatmul.mubr.f32.gmra.mrb[2].mxu1 %v20_v59  ;;  %193 = vmatprep.mubr.f32.mxu0 %v3758_v3  ;;  %v487_v59 = vld [vmem:[%s4813_s2 + $0x180] sm:$0xff]  ;;  %v489_v0 = vld [vmem:[%s4813_s2 + $0x190] sm:$0xff]  ;;  %v4248_v1 = vpack.c.bf16 %v494_v55, %v490_v53  ;;  %v496_v5 = vld [vmem:[%s4813_s2 + $0x1c8] sm:$0xff] }
  0x2b   :  { %330 = vmatprep.mubr.f32.mxu1 %v3758_v3  ;;  %2708 = vmatpush1.bf16.msra.mxu0 %v4066_v62  ;;  %v493_v2 = vld [vmem:[%s4813_s2 + $0x1b0] sm:$0xff]  ;;  %v500_v7 = vld [vmem:[%s4813_s2 + $0x1e8] sm:$0xff]  ;;  %v502_v10 = vld [vmem:[%s4813_s2 + $0x1f8] sm:$0xff]  ;;  %v4271_v11 = vpack.c.bf16 %v491_v60, %v487_v59 }
  0x2c   :  { %2710 = vmatprep.subr.bf16.mxu0 %v4069_v63  ;;  %2740 = vmatpush1.bf16.msra.mxu1 %v4081_v4  ;;  %v25_v8 = vld [vmem:[%s4814_s0 + $0x30] sm:$0xff]  ;;  %v4275_v14 = vpack.c.bf16 %v493_v2, %v489_v0  ;;  %v4277_v15 = vpack.c.bf16 %v500_v7, %v496_v5  ;;  %v495_v16 = vld [vmem:[%s4813_s2 + $0x1c0] sm:$0xff]  ;;  %v26_v23 = vld [vmem:[%s4814_s0 + $0x38] sm:$0xff] }
  0x2d   :  { %194 = vmatmul.mubr.f32.gmra.mrb[4].mxu0 %v21_v9  ;;  %2742 = vmatprep.subr.bf16.mxu1 %v4087_v6  ;;  %v499_v18 = vld [vmem:[%s4813_s2 + $0x1e0] sm:$0xff]  ;;  %v497_v21 = vld [vmem:[%s4813_s2 + $0x1d0] sm:$0xff]  ;;  %v28_v30 = vld [vmem:[%s4814_s0 + $0x48] sm:$0xff] }
  0x2e   :  { %331 = vmatmul.mubr.f32.gmra.mrb[4].mxu1 %v21_v9  ;;  %199 = vmatprep.mubr.f32.mxu0 %v3758_v3  ;;  %v498_v9 = vld [vmem:[%s4813_s2 + $0x1d8] sm:$0xff]  ;;  %v4300_v24 = vpack.c.bf16 %v499_v18, %v495_v16  ;;  %v27_v28 = vld [vmem:[%s4814_s0 + $0x40] sm:$0xff]  ;;  %v29_v31 = vld [vmem:[%s4814_s0 + $0x50] sm:$0xff] }
  0x2f   :  { %336 = vmatprep.mubr.f32.mxu1 %v3758_v3  ;;  %2712 = vmatpush1.bf16.msra.mxu0 %v4107_v12  ;;  %v4286_v20 = vpack.c.bf16 %v502_v10, %v498_v9  ;;  %v30_v33 = vld [vmem:[%s4814_s0 + $0x58] sm:$0xff]  ;;  %v95_v37 = vld [vmem:[%s4815_s3] sm:$0xf] }
  0x30   :  { %2714 = vmatprep.subr.bf16.mxu0 %v4110_v13  ;;  %2744 = vmatpush1.bf16.msra.mxu1 %v4122_v17 }
  0x31   :  { %200 = vmatmul.mubr.f32.gmra.mrb[6].mxu0 %v22_v22  ;;  %2746 = vmatprep.subr.bf16.mxu1 %v4128_v19 }
  0x32   :  { %337 = vmatmul.mubr.f32.gmra.mrb[6].mxu1 %v22_v22  ;;  %205 = vmatprep.mubr.f32.mxu0 %v3758_v3  ;;  %v501_v22 = vld [vmem:[%s4813_s2 + $0x1f0] sm:$0xff] }
  0x33   :  { %342 = vmatprep.mubr.f32.mxu1 %v3758_v3  ;;  %2716 = vmatpush1.bf16.msra.mxu0 %v4148_v25  ;;  %v4304_v27 = vpack.c.bf16 %v501_v22, %v497_v21 }
  0x34   :  { %2718 = vmatprep.subr.bf16.mxu0 %v4151_v26  ;;  %2748 = vmatpush1.bf16.msra.mxu1 %v4160_v29 }
  0x35   :  { %206 = vmatmul.mubr.f32.gmra.mrb[8].mxu0 %v23_v35  ;;  %2750 = vmatprep.subr.bf16.mxu1 %v4169_v32 }
  0x36   :  { %343 = vmatmul.mubr.f32.gmra.mrb[8].mxu1 %v23_v35  ;;  %211 = vmatprep.mubr.f32.mxu0 %v3758_v3  ;;  %v98_v35 = vshrl.u32 %v97_v34, 7 }
  0x37   :  { %348 = vmatprep.mubr.f32.mxu1 %v3758_v3  ;;  %2720 = vmatpush1.bf16.msra.mxu0 %v4189_v39 }
  0x38   :  { %2722 = vmatprep.subr.bf16.mxu0 %v4193_v40  ;;  %2752 = vmatpush1.bf16.msra.mxu1 %v4201_v44  ;;  %v99_v36 = vsub.s32 0, %v98_v35  ;;  %v103_v41 = vsub.s32 1, %v98_v35  ;;  %v111_v49 = vsub.s32 3, %v98_v35  ;;  %v107_v5 = vsub.s32 2, %v98_v35 }
  0x39   :  { %212 = vmatmul.mubr.f32.gmra.mrb[10].mxu0 %v24_v52  ;;  %2754 = vmatprep.subr.bf16.mxu1 %v4210_v48 }
  0x3a   :  { %349 = vmatmul.mubr.f32.gmra.mrb[10].mxu1 %v24_v52  ;;  %217 = vmatprep.mubr.f32.mxu0 %v3758_v3  ;;  %v4372_v43 = vrot.slane %v95_v37, %v99_v36  ;;  %v4374_v45 = vrot.slane %v95_v37, %v103_v41  ;;  %v4378_v2 = vrot.slane %v95_v37, %v111_v49 }
  0x3b   :  { %354 = vmatprep.mubr.f32.mxu1 %v3758_v3  ;;  %2724 = vmatpush1.bf16.msra.mxu0 %v4230_v57 }
  0x3c   :  { %2726 = vmatprep.subr.bf16.mxu0 %v4234_v58  ;;  %2756 = vmatpush1.bf16.msra.mxu1 %v4242_v61 }
  0x3d   :  { %218 = vmatmul.mubr.f32.gmra.mrb[12].mxu0 %v25_v8  ;;  %2758 = vmatprep.subr.bf16.mxu1 %v4248_v1 }
  0x3e   :  { %355 = vmatmul.mubr.f32.gmra.mrb[12].mxu1 %v25_v8  ;;  %223 = vmatprep.mubr.f32.mxu0 %v3758_v3  ;;  %v4381_v8 = vrot.slane %v95_v37, %v107_v5 }
  0x3f   :  { %360 = vmatprep.mubr.f32.mxu1 %v3758_v3  ;;  %2728 = vmatpush1.bf16.msra.mxu0 %v4271_v11 }
  0x40   :  { %2760 = vmatpush1.bf16.msra.mxu1 %v4275_v14  ;;  %2730 = vmatprep.subr.bf16.mxu0 %v4277_v15 }
  0x41   :  { %224 = vmatmul.mubr.f32.gmra.mrb[14].mxu0 %v26_v23  ;;  %2762 = vmatprep.subr.bf16.mxu1 %v4286_v20 }
  0x42   :  { %361 = vmatmul.mubr.f32.gmra.mrb[14].mxu1 %v26_v23  ;;  %229 = vmatprep.mubr.f32.mxu0 %v3758_v3 }
  0x43   :  { %366 = vmatprep.mubr.f32.mxu1 %v3758_v3  ;;  %2732 = vmatpush1.bf16.msra.mxu0 %v4300_v24 }
  0x44   :  { %2764 = vmatpush1.bf16.msra.mxu1 %v4304_v27  ;;  %2766 = vmatprep.subr.bf16.mxu0 %v3995_v38 }
  0x45   :  { %230 = vmatmul.mubr.f32.gmra.mrb[16].mxu0 %v27_v28  ;;  %2798 = vmatprep.subr.bf16.mxu1 %v4006_v42 }
  0x46   :  { %367 = vmatmul.mubr.f32.gmra.mrb[16].mxu1 %v27_v28  ;;  %235 = vmatprep.mubr.f32.mxu0 %v3758_v3 }
  0x47   :  { %372 = vmatprep.mubr.f32.mxu1 %v3758_v3 }
  0x49   :  { %236 = vmatmul.mubr.f32.gmra.mrb[18].mxu0 %v28_v30 }
  0x4a   :  { %373 = vmatmul.mubr.f32.gmra.mrb[18].mxu1 %v28_v30  ;;  %241 = vmatprep.mubr.f32.mxu0 %v3758_v3 }
  0x4b   :  { %378 = vmatprep.mubr.f32.mxu1 %v3758_v3 }
  0x4d   :  { %242 = vmatmul.mubr.f32.gmra.mrb[20].mxu0 %v29_v31 }
  0x4e   :  { %379 = vmatmul.mubr.f32.gmra.mrb[20].mxu1 %v29_v31  ;;  %247 = vmatprep.mubr.f32.mxu0 %v3758_v3 }
  0x4f   :  { %384 = vmatprep.mubr.f32.mxu1 %v3758_v3 }
  0x51   :  { %248 = vmatmul.mubr.f32.gmra.mrb[22].mxu0 %v30_v33 }
  0x52   :  { %385 = vmatmul.mubr.f32.gmra.mrb[22].mxu1 %v30_v33  ;;  %571 = vmatprep.mubr.f32.mxu0 %v3758_v3 }
  0x53   :  { %642 = vmatprep.mubr.f32.mxu1 %v3758_v3 }
  0x55   :  { %572 = vmatmul.mubr.f32.vlgmr.msra.gmra.mrb[0].mxu0 %v3758_v3 }
  0x56   :  { %643 = vmatmul.mubr.f32.vlgmr.msra.gmra.mrb[0].mxu1 %v3758_v3  ;;  %2768 = vmatpush1.bf16.msra.mxu0 %v4020_v47 }
  0x57   :  { %2800 = vmatpush1.bf16.msra.mxu1 %v4041_v54  ;;  %2770 = vmatprep.subr.bf16.mxu0 %v4029_v50 }
  0x58   :  { %2802 = vmatprep.subr.bf16.mxu1 %v4046_v56  ;;  %745 = vmatprep.mubr.f32.mxu0 %v3758_v3 }
  0x59   :  { %816 = vmatprep.mubr.f32.mxu1 %v3758_v3 }
  0x5a   :  { %2772 = vmatpush1.bf16.msra.mxu0 %v4066_v62 }
  0x5b   :  { %2804 = vmatpush1.bf16.msra.mxu1 %v4081_v4  ;;  %2774 = vmatprep.subr.bf16.mxu0 %v4069_v63 }
  0x5c   :  { %2806 = vmatprep.subr.bf16.mxu1 %v4087_v6 }
  0x5e   :  { %2776 = vmatpush1.bf16.msra.mxu0 %v4107_v12 }
  0x5f   :  { %2808 = vmatpush1.bf16.msra.mxu1 %v4122_v17  ;;  %2778 = vmatprep.subr.bf16.mxu0 %v4110_v13 }
  0x60   :  { %2810 = vmatprep.subr.bf16.mxu1 %v4128_v19 }
  0x62   :  { %2780 = vmatpush1.bf16.msra.mxu0 %v4148_v25 }
  0x63   :  { %2812 = vmatpush1.bf16.msra.mxu1 %v4160_v29  ;;  %2782 = vmatprep.subr.bf16.mxu0 %v4151_v26 }
  0x64   :  { %2814 = vmatprep.subr.bf16.mxu1 %v4169_v32 }
  0x66   :  { %2784 = vmatpush1.bf16.msra.mxu0 %v4189_v39 }
  0x67   :  { %2816 = vmatpush1.bf16.msra.mxu1 %v4201_v44  ;;  %2786 = vmatprep.subr.bf16.mxu0 %v4193_v40 }
  0x68   :  { %2818 = vmatprep.subr.bf16.mxu1 %v4210_v48 }
  0x6a   :  { %2788 = vmatpush1.bf16.msra.mxu0 %v4230_v57 }
  0x6b   :  { %2820 = vmatpush1.bf16.msra.mxu1 %v4242_v61  ;;  %2790 = vmatprep.subr.bf16.mxu0 %v4234_v58 }
  0x6c   :  { %2822 = vmatprep.subr.bf16.mxu1 %v4248_v1 }
  0x6e   :  { %2792 = vmatpush1.bf16.msra.mxu0 %v4271_v11 }
  0x6f   :  { %2824 = vmatpush1.bf16.msra.mxu1 %v4275_v14  ;;  %2794 = vmatprep.subr.bf16.mxu0 %v4277_v15 }
  0x70   :  { %2826 = vmatprep.subr.bf16.mxu1 %v4286_v20 }
  0x72   :  { %2796 = vmatpush1.bf16.msra.mxu0 %v4300_v24 }
  0x73   :  { %2828 = vmatpush1.bf16.msra.mxu1 %v4304_v27  ;;  %2830 = vmatprep.subr.bf16.mxu0 %v3995_v38 }
  0x74   :  { %2862 = vmatprep.subr.bf16.mxu1 %v4006_v42 }
 0x128   :  { %v573_v46 = vpop.f32.mrb[0].mxu0 }
 0x129   :  { %v3469_v51 = vadd.f32 %v573_v46, %v4372_v43  ;;  %v644_v52 = vpop.f32.mrb[0].mxu1  ;;  %v575_v53 = vpop.f32.mrb[1].mxu0 }
 0x12a   :  { %v3470_v55 = vadd.f32 %v575_v53, %v4374_v45  ;;  %v646_v59 = vpop.f32.mrb[1].mxu1  ;;  %v3493_v10 = vadd.f32 %v644_v52, %v4381_v8 }
 0x12b   :  { %v2601_v60 = vmul.f32 -1.442695, %v3469_v51  ;;  %v3494_v7 = vadd.f32 %v646_v59, %v4378_v2 }
 0x12c   :  { %v2602_v0 = vmul.f32 -1.442695, %v3470_v55 }
 0x12d   :  { %3566 = vpow2.f32 %v2601_v60  ;;  %v2603_v9 = vmul.f32 -1.442695, %v3494_v7 }
 0x12e   :  { %3568 = vpow2.f32 %v2602_v0 }
 0x12f   :  { %3570 = vpow2.f32 %v2603_v9 }
 0x130   :  { %3572 = vtanh.f32 %v3493_v10 }
 0x137   :  { %v3567_v16 = vpop.eup %3566 }
 0x138   :  { %v3569_v18 = vpop.eup %3568  ;;  %v656_v21 = vadd.f32 1.0, %v3567_v16 }
 0x139   :  { %v662_v22 = vadd.f32 1.0, %v3569_v18  ;;  %v3571_v23 = vpop.eup %3570 }
 0x13a   :  { %3574 = vrcp.f32 %v656_v21  ;;  %v3573_v28 = vpop.eup %3572  ;;  %v669_v34 = vadd.f32 1.0, %v3571_v23 }
 0x13b   :  { %3576 = vrcp.f32 %v662_v22 }
 0x13c   :  { %3578 = vrcp.f32 %v669_v34 }
 0x144   :  { %v3575_v30 = vpop.eup %3574 }
 0x145   :  { %v3577_v31 = vpop.eup %3576  ;;  %v673_v33 = vmul.f32 %v3575_v30, %v3573_v28 }
 0x146   :  { %v672_v35 = vmul.f32 0.0, %v3577_v31  ;;  %v3579_v37 = vpop.eup %3578 }
 0x148   :  { %v4384_v36 = vadd.f32 %v673_v33, %v672_v35 }
 0x14a   :  { %3580 = vtanh.f32 %v4384_v36 }
 0x154   :  { %v3581_v41 = vpop.eup %3580 }
 0x155   :  { %v676_v46 = vmul.f32 %v3581_v41, %v3579_v37 }
 0x157   :  { %746 = vmatmul.mubr.f32.vlgmr.msra.gmra.mrb[2].mxu0 %v676_v46  ;;  %817 = vmatmul.mubr.f32.vlgmr.msra.gmra.mrb[2].mxu1 %v676_v46 }
 0x158   :  { %2832 = vmatpush1.bf16.msra.mxu0 %v4020_v47  ;;  %2864 = vmatpush1.bf16.msra.mxu1 %v4041_v54 }
 0x159   :  { %2834 = vmatprep.subr.bf16.mxu0 %v4029_v50  ;;  %2866 = vmatprep.subr.bf16.mxu1 %v4046_v56 }
 0x15a   :  { %919 = vmatprep.mubr.f32.mxu0 %v3758_v3  ;;  %990 = vmatprep.mubr.f32.mxu1 %v3758_v3 }
 0x15c   :  { %2836 = vmatpush1.bf16.msra.mxu0 %v4066_v62  ;;  %2868 = vmatpush1.bf16.msra.mxu1 %v4081_v4 }
 0x15d   :  { %2838 = vmatprep.subr.bf16.mxu0 %v4069_v63  ;;  %2870 = vmatprep.subr.bf16.mxu1 %v4087_v6 }
 0x160   :  { %2840 = vmatpush1.bf16.msra.mxu0 %v4107_v12  ;;  %2872 = vmatpush1.bf16.msra.mxu1 %v4122_v17 }
 0x161   :  { %2842 = vmatprep.subr.bf16.mxu0 %v4110_v13  ;;  %2874 = vmatprep.subr.bf16.mxu1 %v4128_v19 }
 0x164   :  { %2844 = vmatpush1.bf16.msra.mxu0 %v4148_v25  ;;  %2876 = vmatpush1.bf16.msra.mxu1 %v4160_v29 }
 0x165   :  { %2846 = vmatprep.subr.bf16.mxu0 %v4151_v26  ;;  %2878 = vmatprep.subr.bf16.mxu1 %v4169_v32 }
 0x168   :  { %2848 = vmatpush1.bf16.msra.mxu0 %v4189_v39  ;;  %2880 = vmatpush1.bf16.msra.mxu1 %v4201_v44 }
 0x169   :  { %2850 = vmatprep.subr.bf16.mxu0 %v4193_v40  ;;  %2882 = vmatprep.subr.bf16.mxu1 %v4210_v48 }
 0x16c   :  { %2852 = vmatpush1.bf16.msra.mxu0 %v4230_v57  ;;  %2884 = vmatpush1.bf16.msra.mxu1 %v4242_v61 }
 0x16d   :  { %2854 = vmatprep.subr.bf16.mxu0 %v4234_v58  ;;  %2886 = vmatprep.subr.bf16.mxu1 %v4248_v1 }
 0x170   :  { %2856 = vmatpush1.bf16.msra.mxu0 %v4271_v11  ;;  %2888 = vmatpush1.bf16.msra.mxu1 %v4275_v14 }
 0x171   :  { %2858 = vmatprep.subr.bf16.mxu0 %v4277_v15  ;;  %2890 = vmatprep.subr.bf16.mxu1 %v4286_v20 }
 0x174   :  { %2860 = vmatpush1.bf16.msra.mxu0 %v4300_v24  ;;  %2892 = vmatpush1.bf16.msra.mxu1 %v4304_v27 }
 0x175   :  { %2894 = vmatprep.subr.bf16.mxu0 %v3995_v38  ;;  %2926 = vmatprep.subr.bf16.mxu1 %v4006_v42 }
 0x22a   :  { %v747_v49 = vpop.f32.mrb[2].mxu0  ;;  %v818_v51 = vpop.f32.mrb[2].mxu1 }
 0x22b   :  { %v3471_v52 = vadd.f32 %v747_v49, %v4372_v43  ;;  %v749_v53 = vpop.f32.mrb[3].mxu0  ;;  %v820_v55 = vpop.f32.mrb[3].mxu1  ;;  %v3495_v9 = vadd.f32 %v818_v51, %v4381_v8 }
 0x22c   :  { %v3472_v59 = vadd.f32 %v749_v53, %v4374_v45  ;;  %v3496_v5 = vadd.f32 %v820_v55, %v4378_v2 }
 0x22d   :  { %v2604_v60 = vmul.f32 -1.442695, %v3471_v52 }
 0x22e   :  { %v2605_v0 = vmul.f32 -1.442695, %v3472_v59  ;;  %v2606_v7 = vmul.f32 -1.442695, %v3496_v5 }
 0x22f   :  { %3582 = vpow2.f32 %v2604_v60 }
 0x230   :  { %3584 = vpow2.f32 %v2605_v0 }
 0x231   :  { %3586 = vpow2.f32 %v2606_v7 }
 0x232   :  { %3588 = vtanh.f32 %v3495_v9 }
 0x239   :  { %v3583_v10 = vpop.eup %3582 }
 0x23a   :  { %v3585_v16 = vpop.eup %3584  ;;  %v830_v18 = vadd.f32 1.0, %v3583_v10 }
 0x23b   :  { %v836_v21 = vadd.f32 1.0, %v3585_v16  ;;  %v3587_v22 = vpop.eup %3586 }
 0x23c   :  { %3590 = vrcp.f32 %v830_v18  ;;  %v3589_v23 = vpop.eup %3588  ;;  %v843_v33 = vadd.f32 1.0, %v3587_v22 }
 0x23d   :  { %3592 = vrcp.f32 %v836_v21 }
 0x23e   :  { %3594 = vrcp.f32 %v843_v33 }
 0x246   :  { %v3591_v28 = vpop.eup %3590 }
 0x247   :  { %v3593_v30 = vpop.eup %3592  ;;  %v847_v31 = vmul.f32 %v3591_v28, %v3589_v23 }
 0x248   :  { %v846_v34 = vmul.f32 %v3593_v30, %v4384_v36  ;;  %v3595_v37 = vpop.eup %3594 }
 0x24a   :  { %v4426_v35 = vadd.f32 %v847_v31, %v846_v34 }
 0x24c   :  { %3596 = vtanh.f32 %v4426_v35 }
 0x256   :  { %v3597_v41 = vpop.eup %3596 }
 0x257   :  { %v850_v46 = vmul.f32 %v3597_v41, %v3595_v37 }
 0x259   :  { %920 = vmatmul.mubr.f32.vlgmr.msra.gmra.mrb[4].mxu0 %v850_v46  ;;  %991 = vmatmul.mubr.f32.vlgmr.msra.gmra.mrb[4].mxu1 %v850_v46 }
 0x25a   :  { %2896 = vmatpush1.bf16.msra.mxu0 %v4020_v47  ;;  %2928 = vmatpush1.bf16.msra.mxu1 %v4041_v54 }
 0x25b   :  { %2898 = vmatprep.subr.bf16.mxu0 %v4029_v50  ;;  %2930 = vmatprep.subr.bf16.mxu1 %v4046_v56 }
 0x25c   :  { %1093 = vmatprep.mubr.f32.mxu0 %v3758_v3  ;;  %1164 = vmatprep.mubr.f32.mxu1 %v3758_v3 }
 0x25e   :  { %2900 = vmatpush1.bf16.msra.mxu0 %v4066_v62  ;;  %2932 = vmatpush1.bf16.msra.mxu1 %v4081_v4 }
 0x25f   :  { %2902 = vmatprep.subr.bf16.mxu0 %v4069_v63  ;;  %2934 = vmatprep.subr.bf16.mxu1 %v4087_v6 }
 0x262   :  { %2904 = vmatpush1.bf16.msra.mxu0 %v4107_v12  ;;  %2936 = vmatpush1.bf16.msra.mxu1 %v4122_v17 }
 0x263   :  { %2906 = vmatprep.subr.bf16.mxu0 %v4110_v13  ;;  %2938 = vmatprep.subr.bf16.mxu1 %v4128_v19 }
 0x266   :  { %2908 = vmatpush1.bf16.msra.mxu0 %v4148_v25  ;;  %2940 = vmatpush1.bf16.msra.mxu1 %v4160_v29 }
 0x267   :  { %2910 = vmatprep.subr.bf16.mxu0 %v4151_v26  ;;  %2942 = vmatprep.subr.bf16.mxu1 %v4169_v32 }
 0x26a   :  { %2912 = vmatpush1.bf16.msra.mxu0 %v4189_v39  ;;  %2944 = vmatpush1.bf16.msra.mxu1 %v4201_v44 }
 0x26b   :  { %2914 = vmatprep.subr.bf16.mxu0 %v4193_v40  ;;  %2946 = vmatprep.subr.bf16.mxu1 %v4210_v48 }
 0x26e   :  { %2916 = vmatpush1.bf16.msra.mxu0 %v4230_v57  ;;  %2948 = vmatpush1.bf16.msra.mxu1 %v4242_v61 }
 0x26f   :  { %2918 = vmatprep.subr.bf16.mxu0 %v4234_v58  ;;  %2950 = vmatprep.subr.bf16.mxu1 %v4248_v1 }
 0x272   :  { %2920 = vmatpush1.bf16.msra.mxu0 %v4271_v11  ;;  %2952 = vmatpush1.bf16.msra.mxu1 %v4275_v14 }
 0x273   :  { %2922 = vmatprep.subr.bf16.mxu0 %v4277_v15  ;;  %2954 = vmatprep.subr.bf16.mxu1 %v4286_v20 }
 0x276   :  { %2924 = vmatpush1.bf16.msra.mxu0 %v4300_v24  ;;  %2956 = vmatpush1.bf16.msra.mxu1 %v4304_v27 }
 0x277   :  { %2958 = vmatprep.subr.bf16.mxu0 %v3995_v38  ;;  %2990 = vmatprep.subr.bf16.mxu1 %v4006_v42 }
 0x32c   :  { %v921_v36 = vpop.f32.mrb[4].mxu0  ;;  %v992_v49 = vpop.f32.mrb[4].mxu1 }
 0x32d   :  { %v3473_v51 = vadd.f32 %v921_v36, %v4372_v43  ;;  %v923_v52 = vpop.f32.mrb[5].mxu0  ;;  %v994_v53 = vpop.f32.mrb[5].mxu1  ;;  %v3497_v7 = vadd.f32 %v992_v49, %v4381_v8 }
 0x32e   :  { %v3474_v55 = vadd.f32 %v923_v52, %v4374_v45  ;;  %v3498_v0 = vadd.f32 %v994_v53, %v4378_v2 }
 0x32f   :  { %v2607_v59 = vmul.f32 -1.442695, %v3473_v51 }
 0x330   :  { %v2608_v60 = vmul.f32 -1.442695, %v3474_v55  ;;  %v2609_v5 = vmul.f32 -1.442695, %v3498_v0 }
 0x331   :  { %3598 = vpow2.f32 %v2607_v59 }
 0x332   :  { %3600 = vpow2.f32 %v2608_v60 }
 0x333   :  { %3602 = vpow2.f32 %v2609_v5 }
 0x334   :  { %3604 = vtanh.f32 %v3497_v7 }
 0x33b   :  { %v3599_v9 = vpop.eup %3598 }
 0x33c   :  { %v3601_v10 = vpop.eup %3600  ;;  %v1004_v16 = vadd.f32 1.0, %v3599_v9 }
 0x33d   :  { %v1010_v18 = vadd.f32 1.0, %v3601_v10  ;;  %v3603_v21 = vpop.eup %3602 }
 0x33e   :  { %3606 = vrcp.f32 %v1004_v16  ;;  %v3605_v22 = vpop.eup %3604  ;;  %v1017_v31 = vadd.f32 1.0, %v3603_v21 }
 0x33f   :  { %3608 = vrcp.f32 %v1010_v18 }
 0x340   :  { %3610 = vrcp.f32 %v1017_v31 }
 0x348   :  { %v3607_v23 = vpop.eup %3606 }
 0x349   :  { %v3609_v28 = vpop.eup %3608  ;;  %v1021_v30 = vmul.f32 %v3607_v23, %v3605_v22 }
 0x34a   :  { %v1020_v33 = vmul.f32 %v3609_v28, %v4426_v35  ;;  %v3611_v37 = vpop.eup %3610 }
 0x34c   :  { %v4468_v34 = vadd.f32 %v1021_v30, %v1020_v33 }
 0x34e   :  { %3612 = vtanh.f32 %v4468_v34 }
 0x358   :  { %v3613_v41 = vpop.eup %3612 }
 0x359   :  { %v1024_v46 = vmul.f32 %v3613_v41, %v3611_v37 }
 0x35b   :  { %1094 = vmatmul.mubr.f32.vlgmr.msra.gmra.mrb[6].mxu0 %v1024_v46  ;;  %1165 = vmatmul.mubr.f32.vlgmr.msra.gmra.mrb[6].mxu1 %v1024_v46 }
 0x35c   :  { %2960 = vmatpush1.bf16.msra.mxu0 %v4020_v47  ;;  %2992 = vmatpush1.bf16.msra.mxu1 %v4041_v54 }
 0x35d   :  { %2962 = vmatprep.subr.bf16.mxu0 %v4029_v50  ;;  %2994 = vmatprep.subr.bf16.mxu1 %v4046_v56 }
 0x35e   :  { %1267 = vmatprep.mubr.f32.mxu0 %v3758_v3  ;;  %1338 = vmatprep.mubr.f32.mxu1 %v3758_v3 }
 0x360   :  { %2964 = vmatpush1.bf16.msra.mxu0 %v4066_v62  ;;  %2996 = vmatpush1.bf16.msra.mxu1 %v4081_v4 }
 0x361   :  { %2966 = vmatprep.subr.bf16.mxu0 %v4069_v63  ;;  %2998 = vmatprep.subr.bf16.mxu1 %v4087_v6 }
 0x364   :  { %2968 = vmatpush1.bf16.msra.mxu0 %v4107_v12  ;;  %3000 = vmatpush1.bf16.msra.mxu1 %v4122_v17 }
 0x365   :  { %2970 = vmatprep.subr.bf16.mxu0 %v4110_v13  ;;  %3002 = vmatprep.subr.bf16.mxu1 %v4128_v19 }
 0x368   :  { %2972 = vmatpush1.bf16.msra.mxu0 %v4148_v25  ;;  %3004 = vmatpush1.bf16.msra.mxu1 %v4160_v29 }
 0x369   :  { %2974 = vmatprep.subr.bf16.mxu0 %v4151_v26  ;;  %3006 = vmatprep.subr.bf16.mxu1 %v4169_v32 }
 0x36c   :  { %2976 = vmatpush1.bf16.msra.mxu0 %v4189_v39  ;;  %3008 = vmatpush1.bf16.msra.mxu1 %v4201_v44 }
 0x36d   :  { %2978 = vmatprep.subr.bf16.mxu0 %v4193_v40  ;;  %3010 = vmatprep.subr.bf16.mxu1 %v4210_v48 }
 0x370   :  { %2980 = vmatpush1.bf16.msra.mxu0 %v4230_v57  ;;  %3012 = vmatpush1.bf16.msra.mxu1 %v4242_v61 }
 0x371   :  { %2982 = vmatprep.subr.bf16.mxu0 %v4234_v58  ;;  %3014 = vmatprep.subr.bf16.mxu1 %v4248_v1 }
 0x374   :  { %2984 = vmatpush1.bf16.msra.mxu0 %v4271_v11  ;;  %3016 = vmatpush1.bf16.msra.mxu1 %v4275_v14 }
 0x375   :  { %2986 = vmatprep.subr.bf16.mxu0 %v4277_v15  ;;  %3018 = vmatprep.subr.bf16.mxu1 %v4286_v20 }
 0x378   :  { %2988 = vmatpush1.bf16.msra.mxu0 %v4300_v24  ;;  %3020 = vmatpush1.bf16.msra.mxu1 %v4304_v27 }
 0x379   :  { %3022 = vmatprep.subr.bf16.mxu0 %v3995_v38  ;;  %3054 = vmatprep.subr.bf16.mxu1 %v4006_v42 }
 0x42e   :  { %v1095_v35 = vpop.f32.mrb[6].mxu0  ;;  %v1166_v36 = vpop.f32.mrb[6].mxu1 }
 0x42f   :  { %v3475_v49 = vadd.f32 %v1095_v35, %v4372_v43  ;;  %v1097_v51 = vpop.f32.mrb[7].mxu0  ;;  %v1168_v52 = vpop.f32.mrb[7].mxu1  ;;  %v3499_v5 = vadd.f32 %v1166_v36, %v4381_v8 }
 0x430   :  { %v3476_v53 = vadd.f32 %v1097_v51, %v4374_v45  ;;  %v3500_v60 = vadd.f32 %v1168_v52, %v4378_v2 }
 0x431   :  { %v2610_v55 = vmul.f32 -1.442695, %v3475_v49 }
 0x432   :  { %v2611_v59 = vmul.f32 -1.442695, %v3476_v53  ;;  %v2612_v0 = vmul.f32 -1.442695, %v3500_v60 }
 0x433   :  { %3614 = vpow2.f32 %v2610_v55 }
 0x434   :  { %3616 = vpow2.f32 %v2611_v59 }
 0x435   :  { %3618 = vpow2.f32 %v2612_v0 }
 0x436   :  { %3620 = vtanh.f32 %v3499_v5 }
 0x43d   :  { %v3615_v7 = vpop.eup %3614 }
 0x43e   :  { %v3617_v9 = vpop.eup %3616  ;;  %v1178_v10 = vadd.f32 1.0, %v3615_v7 }
 0x43f   :  { %v1184_v16 = vadd.f32 1.0, %v3617_v9  ;;  %v3619_v18 = vpop.eup %3618 }
 0x440   :  { %3622 = vrcp.f32 %v1178_v10  ;;  %v3621_v21 = vpop.eup %3620  ;;  %v1191_v30 = vadd.f32 1.0, %v3619_v18 }
 0x441   :  { %3624 = vrcp.f32 %v1184_v16 }
 0x442   :  { %3626 = vrcp.f32 %v1191_v30 }
 0x44a   :  { %v3623_v22 = vpop.eup %3622 }
 0x44b   :  { %v3625_v23 = vpop.eup %3624  ;;  %v1195_v28 = vmul.f32 %v3623_v22, %v3621_v21 }
 0x44c   :  { %v1194_v31 = vmul.f32 %v3625_v23, %v4468_v34  ;;  %v3627_v37 = vpop.eup %3626 }
 0x44e   :  { %v4510_v33 = vadd.f32 %v1195_v28, %v1194_v31 }
 0x450   :  { %3628 = vtanh.f32 %v4510_v33 }
 0x45a   :  { %v3629_v41 = vpop.eup %3628 }
 0x45b   :  { %v1198_v46 = vmul.f32 %v3629_v41, %v3627_v37 }
 0x45d   :  { %1268 = vmatmul.mubr.f32.vlgmr.msra.gmra.mrb[8].mxu0 %v1198_v46  ;;  %1339 = vmatmul.mubr.f32.vlgmr.msra.gmra.mrb[8].mxu1 %v1198_v46 }
 0x45e   :  { %3024 = vmatpush1.bf16.msra.mxu0 %v4020_v47  ;;  %3056 = vmatpush1.bf16.msra.mxu1 %v4041_v54 }
 0x45f   :  { %3026 = vmatprep.subr.bf16.mxu0 %v4029_v50  ;;  %3058 = vmatprep.subr.bf16.mxu1 %v4046_v56 }
 0x460   :  { %1441 = vmatprep.mubr.f32.mxu0 %v3758_v3  ;;  %1512 = vmatprep.mubr.f32.mxu1 %v3758_v3 }
 0x462   :  { %3028 = vmatpush1.bf16.msra.mxu0 %v4066_v62  ;;  %3060 = vmatpush1.bf16.msra.mxu1 %v4081_v4 }
 0x463   :  { %3030 = vmatprep.subr.bf16.mxu0 %v4069_v63  ;;  %3062 = vmatprep.subr.bf16.mxu1 %v4087_v6 }
 0x466   :  { %3032 = vmatpush1.bf16.msra.mxu0 %v4107_v12  ;;  %3064 = vmatpush1.bf16.msra.mxu1 %v4122_v17 }
 0x467   :  { %3034 = vmatprep.subr.bf16.mxu0 %v4110_v13  ;;  %3066 = vmatprep.subr.bf16.mxu1 %v4128_v19 }
 0x46a   :  { %3036 = vmatpush1.bf16.msra.mxu0 %v4148_v25  ;;  %3068 = vmatpush1.bf16.msra.mxu1 %v4160_v29 }
 0x46b   :  { %3038 = vmatprep.subr.bf16.mxu0 %v4151_v26  ;;  %3070 = vmatprep.subr.bf16.mxu1 %v4169_v32 }
 0x46e   :  { %3040 = vmatpush1.bf16.msra.mxu0 %v4189_v39  ;;  %3072 = vmatpush1.bf16.msra.mxu1 %v4201_v44 }
 0x46f   :  { %3042 = vmatprep.subr.bf16.mxu0 %v4193_v40  ;;  %3074 = vmatprep.subr.bf16.mxu1 %v4210_v48 }
 0x472   :  { %3044 = vmatpush1.bf16.msra.mxu0 %v4230_v57  ;;  %3076 = vmatpush1.bf16.msra.mxu1 %v4242_v61 }
 0x473   :  { %3046 = vmatprep.subr.bf16.mxu0 %v4234_v58  ;;  %3078 = vmatprep.subr.bf16.mxu1 %v4248_v1 }
 0x476   :  { %3048 = vmatpush1.bf16.msra.mxu0 %v4271_v11  ;;  %3080 = vmatpush1.bf16.msra.mxu1 %v4275_v14 }
 0x477   :  { %3050 = vmatprep.subr.bf16.mxu0 %v4277_v15  ;;  %3082 = vmatprep.subr.bf16.mxu1 %v4286_v20 }
 0x47a   :  { %3052 = vmatpush1.bf16.msra.mxu0 %v4300_v24  ;;  %3084 = vmatpush1.bf16.msra.mxu1 %v4304_v27 }
 0x47b   :  { %3086 = vmatprep.subr.bf16.mxu0 %v3995_v38  ;;  %3118 = vmatprep.subr.bf16.mxu1 %v4006_v42 }
 0x530   :  { %v1269_v34 = vpop.f32.mrb[8].mxu0  ;;  %v1340_v35 = vpop.f32.mrb[8].mxu1 }
 0x531   :  { %v3477_v36 = vadd.f32 %v1269_v34, %v4372_v43  ;;  %v1271_v49 = vpop.f32.mrb[9].mxu0  ;;  %v1342_v51 = vpop.f32.mrb[9].mxu1  ;;  %v3501_v0 = vadd.f32 %v1340_v35, %v4381_v8 }
 0x532   :  { %v3478_v52 = vadd.f32 %v1271_v49, %v4374_v45  ;;  %v3502_v59 = vadd.f32 %v1342_v51, %v4378_v2 }
 0x533   :  { %v2613_v53 = vmul.f32 -1.442695, %v3477_v36 }
 0x534   :  { %v2614_v55 = vmul.f32 -1.442695, %v3478_v52  ;;  %v2615_v60 = vmul.f32 -1.442695, %v3502_v59 }
 0x535   :  { %3630 = vpow2.f32 %v2613_v53 }
 0x536   :  { %3632 = vpow2.f32 %v2614_v55 }
 0x537   :  { %3634 = vpow2.f32 %v2615_v60 }
 0x538   :  { %3636 = vtanh.f32 %v3501_v0 }
 0x53f   :  { %v3631_v5 = vpop.eup %3630 }
 0x540   :  { %v3633_v7 = vpop.eup %3632  ;;  %v1352_v9 = vadd.f32 1.0, %v3631_v5 }
 0x541   :  { %v1358_v10 = vadd.f32 1.0, %v3633_v7  ;;  %v3635_v16 = vpop.eup %3634 }
 0x542   :  { %3638 = vrcp.f32 %v1352_v9  ;;  %v3637_v18 = vpop.eup %3636  ;;  %v1365_v28 = vadd.f32 1.0, %v3635_v16 }
 0x543   :  { %3640 = vrcp.f32 %v1358_v10 }
 0x544   :  { %3642 = vrcp.f32 %v1365_v28 }
 0x54c   :  { %v3639_v21 = vpop.eup %3638 }
 0x54d   :  { %v3641_v22 = vpop.eup %3640  ;;  %v1369_v23 = vmul.f32 %v3639_v21, %v3637_v18 }
 0x54e   :  { %v1368_v30 = vmul.f32 %v3641_v22, %v4510_v33  ;;  %v3643_v37 = vpop.eup %3642 }
 0x550   :  { %v4552_v31 = vadd.f32 %v1369_v23, %v1368_v30 }
 0x552   :  { %3644 = vtanh.f32 %v4552_v31 }
 0x55c   :  { %v3645_v41 = vpop.eup %3644 }
 0x55d   :  { %v1372_v46 = vmul.f32 %v3645_v41, %v3643_v37 }
 0x55f   :  { %1442 = vmatmul.mubr.f32.vlgmr.msra.gmra.mrb[10].mxu0 %v1372_v46  ;;  %1513 = vmatmul.mubr.f32.vlgmr.msra.gmra.mrb[10].mxu1 %v1372_v46 }
 0x560   :  { %3088 = vmatpush1.bf16.msra.mxu0 %v4020_v47  ;;  %3120 = vmatpush1.bf16.msra.mxu1 %v4041_v54 }
 0x561   :  { %3090 = vmatprep.subr.bf16.mxu0 %v4029_v50  ;;  %3122 = vmatprep.subr.bf16.mxu1 %v4046_v56 }
 0x562   :  { %1615 = vmatprep.mubr.f32.mxu0 %v3758_v3  ;;  %1686 = vmatprep.mubr.f32.mxu1 %v3758_v3 }
 0x564   :  { %3092 = vmatpush1.bf16.msra.mxu0 %v4066_v62  ;;  %3124 = vmatpush1.bf16.msra.mxu1 %v4081_v4 }
 0x565   :  { %3094 = vmatprep.subr.bf16.mxu0 %v4069_v63  ;;  %3126 = vmatprep.subr.bf16.mxu1 %v4087_v6 }
 0x568   :  { %3096 = vmatpush1.bf16.msra.mxu0 %v4107_v12  ;;  %3128 = vmatpush1.bf16.msra.mxu1 %v4122_v17 }
 0x569   :  { %3098 = vmatprep.subr.bf16.mxu0 %v4110_v13  ;;  %3130 = vmatprep.subr.bf16.mxu1 %v4128_v19 }
 0x56c   :  { %3100 = vmatpush1.bf16.msra.mxu0 %v4148_v25  ;;  %3132 = vmatpush1.bf16.msra.mxu1 %v4160_v29 }
 0x56d   :  { %3102 = vmatprep.subr.bf16.mxu0 %v4151_v26  ;;  %3134 = vmatprep.subr.bf16.mxu1 %v4169_v32 }
 0x570   :  { %3104 = vmatpush1.bf16.msra.mxu0 %v4189_v39  ;;  %3136 = vmatpush1.bf16.msra.mxu1 %v4201_v44 }
 0x571   :  { %3106 = vmatprep.subr.bf16.mxu0 %v4193_v40  ;;  %3138 = vmatprep.subr.bf16.mxu1 %v4210_v48 }
 0x574   :  { %3108 = vmatpush1.bf16.msra.mxu0 %v4230_v57  ;;  %3140 = vmatpush1.bf16.msra.mxu1 %v4242_v61 }
 0x575   :  { %3110 = vmatprep.subr.bf16.mxu0 %v4234_v58  ;;  %3142 = vmatprep.subr.bf16.mxu1 %v4248_v1 }
 0x578   :  { %3112 = vmatpush1.bf16.msra.mxu0 %v4271_v11  ;;  %3144 = vmatpush1.bf16.msra.mxu1 %v4275_v14 }
 0x579   :  { %3114 = vmatprep.subr.bf16.mxu0 %v4277_v15  ;;  %3146 = vmatprep.subr.bf16.mxu1 %v4286_v20 }
 0x57c   :  { %3116 = vmatpush1.bf16.msra.mxu0 %v4300_v24  ;;  %3148 = vmatpush1.bf16.msra.mxu1 %v4304_v27 }
 0x57d   :  { %3150 = vmatprep.subr.bf16.mxu0 %v3995_v38  ;;  %3182 = vmatprep.subr.bf16.mxu1 %v4006_v42 }
 0x632   :  { %v1443_v33 = vpop.f32.mrb[10].mxu0  ;;  %v1514_v34 = vpop.f32.mrb[10].mxu1 }
 0x633   :  { %v3479_v35 = vadd.f32 %v1443_v33, %v4372_v43  ;;  %v1445_v36 = vpop.f32.mrb[11].mxu0  ;;  %v1516_v49 = vpop.f32.mrb[11].mxu1  ;;  %v3503_v60 = vadd.f32 %v1514_v34, %v4381_v8 }
 0x634   :  { %v3480_v51 = vadd.f32 %v1445_v36, %v4374_v45  ;;  %v3504_v55 = vadd.f32 %v1516_v49, %v4378_v2 }
 0x635   :  { %v2616_v52 = vmul.f32 -1.442695, %v3479_v35 }
 0x636   :  { %v2617_v53 = vmul.f32 -1.442695, %v3480_v51  ;;  %v2618_v59 = vmul.f32 -1.442695, %v3504_v55 }
 0x637   :  { %3646 = vpow2.f32 %v2616_v52 }
 0x638   :  { %3648 = vpow2.f32 %v2617_v53 }
 0x639   :  { %3650 = vpow2.f32 %v2618_v59 }
 0x63a   :  { %3652 = vtanh.f32 %v3503_v60 }
 0x641   :  { %v3647_v0 = vpop.eup %3646 }
 0x642   :  { %v3649_v5 = vpop.eup %3648  ;;  %v1526_v7 = vadd.f32 1.0, %v3647_v0 }
 0x643   :  { %v1532_v9 = vadd.f32 1.0, %v3649_v5  ;;  %v3651_v10 = vpop.eup %3650 }
 0x644   :  { %3654 = vrcp.f32 %v1526_v7  ;;  %v3653_v16 = vpop.eup %3652  ;;  %v1539_v23 = vadd.f32 1.0, %v3651_v10 }
 0x645   :  { %3656 = vrcp.f32 %v1532_v9 }
 0x646   :  { %3658 = vrcp.f32 %v1539_v23 }
 0x64e   :  { %v3655_v18 = vpop.eup %3654 }
 0x64f   :  { %v3657_v21 = vpop.eup %3656  ;;  %v1543_v22 = vmul.f32 %v3655_v18, %v3653_v16 }
 0x650   :  { %v1542_v28 = vmul.f32 %v3657_v21, %v4552_v31  ;;  %v3659_v37 = vpop.eup %3658 }
 0x652   :  { %v4594_v30 = vadd.f32 %v1543_v22, %v1542_v28 }
 0x654   :  { %3660 = vtanh.f32 %v4594_v30 }
 0x65e   :  { %v3661_v41 = vpop.eup %3660 }
 0x65f   :  { %v1546_v46 = vmul.f32 %v3661_v41, %v3659_v37 }
 0x661   :  { %1616 = vmatmul.mubr.f32.vlgmr.msra.gmra.mrb[12].mxu0 %v1546_v46  ;;  %1687 = vmatmul.mubr.f32.vlgmr.msra.gmra.mrb[12].mxu1 %v1546_v46 }
 0x662   :  { %3152 = vmatpush1.bf16.msra.mxu0 %v4020_v47  ;;  %3184 = vmatpush1.bf16.msra.mxu1 %v4041_v54 }
 0x663   :  { %3154 = vmatprep.subr.bf16.mxu0 %v4029_v50  ;;  %3186 = vmatprep.subr.bf16.mxu1 %v4046_v56 }
 0x664   :  { %1789 = vmatprep.mubr.f32.mxu0 %v3758_v3  ;;  %1860 = vmatprep.mubr.f32.mxu1 %v3758_v3 }
 0x666   :  { %3156 = vmatpush1.bf16.msra.mxu0 %v4066_v62  ;;  %3188 = vmatpush1.bf16.msra.mxu1 %v4081_v4 }
 0x667   :  { %3158 = vmatprep.subr.bf16.mxu0 %v4069_v63  ;;  %3190 = vmatprep.subr.bf16.mxu1 %v4087_v6 }
 0x66a   :  { %3160 = vmatpush1.bf16.msra.mxu0 %v4107_v12  ;;  %3192 = vmatpush1.bf16.msra.mxu1 %v4122_v17 }
 0x66b   :  { %3162 = vmatprep.subr.bf16.mxu0 %v4110_v13  ;;  %3194 = vmatprep.subr.bf16.mxu1 %v4128_v19 }
 0x66e   :  { %3164 = vmatpush1.bf16.msra.mxu0 %v4148_v25  ;;  %3196 = vmatpush1.bf16.msra.mxu1 %v4160_v29 }
 0x66f   :  { %3166 = vmatprep.subr.bf16.mxu0 %v4151_v26  ;;  %3198 = vmatprep.subr.bf16.mxu1 %v4169_v32 }
 0x672   :  { %3168 = vmatpush1.bf16.msra.mxu0 %v4189_v39  ;;  %3200 = vmatpush1.bf16.msra.mxu1 %v4201_v44 }
 0x673   :  { %3170 = vmatprep.subr.bf16.mxu0 %v4193_v40  ;;  %3202 = vmatprep.subr.bf16.mxu1 %v4210_v48 }
 0x676   :  { %3172 = vmatpush1.bf16.msra.mxu0 %v4230_v57  ;;  %3204 = vmatpush1.bf16.msra.mxu1 %v4242_v61 }
 0x677   :  { %3174 = vmatprep.subr.bf16.mxu0 %v4234_v58  ;;  %3206 = vmatprep.subr.bf16.mxu1 %v4248_v1 }
 0x67a   :  { %3176 = vmatpush1.bf16.msra.mxu0 %v4271_v11  ;;  %3208 = vmatpush1.bf16.msra.mxu1 %v4275_v14 }
 0x67b   :  { %3178 = vmatprep.subr.bf16.mxu0 %v4277_v15  ;;  %3210 = vmatprep.subr.bf16.mxu1 %v4286_v20 }
 0x67e   :  { %3180 = vmatpush1.bf16.msra.mxu0 %v4300_v24  ;;  %3212 = vmatpush1.bf16.msra.mxu1 %v4304_v27 }
 0x67f   :  { %3214 = vmatprep.subr.bf16.mxu0 %v3995_v38  ;;  %3246 = vmatprep.subr.bf16.mxu1 %v4006_v42 }
 0x734   :  { %v1617_v31 = vpop.f32.mrb[12].mxu0  ;;  %v1688_v33 = vpop.f32.mrb[12].mxu1 }
 0x735   :  { %v3481_v34 = vadd.f32 %v1617_v31, %v4372_v43  ;;  %v1619_v35 = vpop.f32.mrb[13].mxu0  ;;  %v1690_v36 = vpop.f32.mrb[13].mxu1  ;;  %v3505_v59 = vadd.f32 %v1688_v33, %v4381_v8 }
 0x736   :  { %v3482_v49 = vadd.f32 %v1619_v35, %v4374_v45  ;;  %v3506_v53 = vadd.f32 %v1690_v36, %v4378_v2 }
 0x737   :  { %v2619_v51 = vmul.f32 -1.442695, %v3481_v34 }
 0x738   :  { %v2620_v52 = vmul.f32 -1.442695, %v3482_v49  ;;  %v2621_v55 = vmul.f32 -1.442695, %v3506_v53 }
 0x739   :  { %3662 = vpow2.f32 %v2619_v51 }
 0x73a   :  { %3664 = vpow2.f32 %v2620_v52 }
 0x73b   :  { %3666 = vpow2.f32 %v2621_v55 }
 0x73c   :  { %3668 = vtanh.f32 %v3505_v59 }
 0x743   :  { %v3663_v60 = vpop.eup %3662 }
 0x744   :  { %v3665_v0 = vpop.eup %3664  ;;  %v1700_v5 = vadd.f32 1.0, %v3663_v60 }
 0x745   :  { %v1706_v7 = vadd.f32 1.0, %v3665_v0  ;;  %v3667_v9 = vpop.eup %3666 }
 0x746   :  { %3670 = vrcp.f32 %v1700_v5  ;;  %v3669_v10 = vpop.eup %3668  ;;  %v1713_v22 = vadd.f32 1.0, %v3667_v9 }
 0x747   :  { %3672 = vrcp.f32 %v1706_v7 }
 0x748   :  { %3674 = vrcp.f32 %v1713_v22 }
 0x750   :  { %v3671_v16 = vpop.eup %3670 }
 0x751   :  { %v3673_v18 = vpop.eup %3672  ;;  %v1717_v21 = vmul.f32 %v3671_v16, %v3669_v10 }
 0x752   :  { %v1716_v23 = vmul.f32 %v3673_v18, %v4594_v30  ;;  %v3675_v37 = vpop.eup %3674 }
 0x754   :  { %v4636_v28 = vadd.f32 %v1717_v21, %v1716_v23 }
 0x756   :  { %3676 = vtanh.f32 %v4636_v28 }
 0x760   :  { %v3677_v41 = vpop.eup %3676 }
 0x761   :  { %v1720_v46 = vmul.f32 %v3677_v41, %v3675_v37 }
 0x763   :  { %1790 = vmatmul.mubr.f32.vlgmr.msra.gmra.mrb[14].mxu0 %v1720_v46  ;;  %1861 = vmatmul.mubr.f32.vlgmr.msra.gmra.mrb[14].mxu1 %v1720_v46 }
 0x764   :  { %3216 = vmatpush1.bf16.msra.mxu0 %v4020_v47  ;;  %3248 = vmatpush1.bf16.msra.mxu1 %v4041_v54 }
 0x765   :  { %3218 = vmatprep.subr.bf16.mxu0 %v4029_v50  ;;  %3250 = vmatprep.subr.bf16.mxu1 %v4046_v56 }
 0x766   :  { %1963 = vmatprep.mubr.f32.mxu0 %v3758_v3  ;;  %2034 = vmatprep.mubr.f32.mxu1 %v3758_v3 }
 0x768   :  { %3220 = vmatpush1.bf16.msra.mxu0 %v4066_v62  ;;  %3252 = vmatpush1.bf16.msra.mxu1 %v4081_v4 }
 0x769   :  { %3222 = vmatprep.subr.bf16.mxu0 %v4069_v63  ;;  %3254 = vmatprep.subr.bf16.mxu1 %v4087_v6 }
 0x76c   :  { %3224 = vmatpush1.bf16.msra.mxu0 %v4107_v12  ;;  %3256 = vmatpush1.bf16.msra.mxu1 %v4122_v17 }
 0x76d   :  { %3226 = vmatprep.subr.bf16.mxu0 %v4110_v13  ;;  %3258 = vmatprep.subr.bf16.mxu1 %v4128_v19 }
 0x770   :  { %3228 = vmatpush1.bf16.msra.mxu0 %v4148_v25  ;;  %3260 = vmatpush1.bf16.msra.mxu1 %v4160_v29 }
 0x771   :  { %3230 = vmatprep.subr.bf16.mxu0 %v4151_v26  ;;  %3262 = vmatprep.subr.bf16.mxu1 %v4169_v32 }
 0x774   :  { %3232 = vmatpush1.bf16.msra.mxu0 %v4189_v39  ;;  %3264 = vmatpush1.bf16.msra.mxu1 %v4201_v44 }
 0x775   :  { %3234 = vmatprep.subr.bf16.mxu0 %v4193_v40  ;;  %3266 = vmatprep.subr.bf16.mxu1 %v4210_v48 }
 0x778   :  { %3236 = vmatpush1.bf16.msra.mxu0 %v4230_v57  ;;  %3268 = vmatpush1.bf16.msra.mxu1 %v4242_v61 }
 0x779   :  { %3238 = vmatprep.subr.bf16.mxu0 %v4234_v58  ;;  %3270 = vmatprep.subr.bf16.mxu1 %v4248_v1 }
 0x77c   :  { %3240 = vmatpush1.bf16.msra.mxu0 %v4271_v11  ;;  %3272 = vmatpush1.bf16.msra.mxu1 %v4275_v14 }
 0x77d   :  { %3242 = vmatprep.subr.bf16.mxu0 %v4277_v15  ;;  %3274 = vmatprep.subr.bf16.mxu1 %v4286_v20 }
 0x780   :  { %3244 = vmatpush1.bf16.msra.mxu0 %v4300_v24  ;;  %3276 = vmatpush1.bf16.msra.mxu1 %v4304_v27 }
 0x781   :  { %3278 = vmatprep.subr.bf16.mxu0 %v3995_v38  ;;  %3310 = vmatprep.subr.bf16.mxu1 %v4006_v42 }
 0x836   :  { %v1791_v30 = vpop.f32.mrb[14].mxu0  ;;  %v1862_v31 = vpop.f32.mrb[14].mxu1 }
 0x837   :  { %v3483_v33 = vadd.f32 %v1791_v30, %v4372_v43  ;;  %v1793_v34 = vpop.f32.mrb[15].mxu0  ;;  %v1864_v35 = vpop.f32.mrb[15].mxu1  ;;  %v3507_v55 = vadd.f32 %v1862_v31, %v4381_v8 }
 0x838   :  { %v3484_v36 = vadd.f32 %v1793_v34, %v4374_v45  ;;  %v3508_v52 = vadd.f32 %v1864_v35, %v4378_v2 }
 0x839   :  { %v2622_v49 = vmul.f32 -1.442695, %v3483_v33 }
 0x83a   :  { %v2623_v51 = vmul.f32 -1.442695, %v3484_v36  ;;  %v2624_v53 = vmul.f32 -1.442695, %v3508_v52 }
 0x83b   :  { %3678 = vpow2.f32 %v2622_v49 }
 0x83c   :  { %3680 = vpow2.f32 %v2623_v51 }
 0x83d   :  { %3682 = vpow2.f32 %v2624_v53 }
 0x83e   :  { %3684 = vtanh.f32 %v3507_v55 }
 0x845   :  { %v3679_v59 = vpop.eup %3678 }
 0x846   :  { %v3681_v60 = vpop.eup %3680  ;;  %v1874_v0 = vadd.f32 1.0, %v3679_v59 }
 0x847   :  { %v1880_v5 = vadd.f32 1.0, %v3681_v60  ;;  %v3683_v7 = vpop.eup %3682 }
 0x848   :  { %3686 = vrcp.f32 %v1874_v0  ;;  %v3685_v9 = vpop.eup %3684  ;;  %v1887_v21 = vadd.f32 1.0, %v3683_v7 }
 0x849   :  { %3688 = vrcp.f32 %v1880_v5 }
 0x84a   :  { %3690 = vrcp.f32 %v1887_v21 }
 0x852   :  { %v3687_v10 = vpop.eup %3686 }
 0x853   :  { %v3689_v16 = vpop.eup %3688  ;;  %v1891_v18 = vmul.f32 %v3687_v10, %v3685_v9 }
 0x854   :  { %v1890_v22 = vmul.f32 %v3689_v16, %v4636_v28  ;;  %v3691_v37 = vpop.eup %3690 }
 0x856   :  { %v4678_v23 = vadd.f32 %v1891_v18, %v1890_v22 }
 0x858   :  { %3692 = vtanh.f32 %v4678_v23 }
 0x862   :  { %v3693_v41 = vpop.eup %3692 }
 0x863   :  { %v1894_v46 = vmul.f32 %v3693_v41, %v3691_v37 }
 0x865   :  { %1964 = vmatmul.mubr.f32.vlgmr.msra.gmra.mrb[16].mxu0 %v1894_v46  ;;  %2035 = vmatmul.mubr.f32.vlgmr.msra.gmra.mrb[16].mxu1 %v1894_v46 }
 0x866   :  { %3280 = vmatpush1.bf16.msra.mxu0 %v4020_v47  ;;  %3312 = vmatpush1.bf16.msra.mxu1 %v4041_v54 }
 0x867   :  { %3282 = vmatprep.subr.bf16.mxu0 %v4029_v50  ;;  %3314 = vmatprep.subr.bf16.mxu1 %v4046_v56 }
 0x868   :  { %2137 = vmatprep.mubr.f32.mxu0 %v3758_v3  ;;  %2208 = vmatprep.mubr.f32.mxu1 %v3758_v3 }
 0x86a   :  { %3284 = vmatpush1.bf16.msra.mxu0 %v4066_v62  ;;  %3316 = vmatpush1.bf16.msra.mxu1 %v4081_v4 }
 0x86b   :  { %3286 = vmatprep.subr.bf16.mxu0 %v4069_v63  ;;  %3318 = vmatprep.subr.bf16.mxu1 %v4087_v6 }
 0x86e   :  { %3288 = vmatpush1.bf16.msra.mxu0 %v4107_v12  ;;  %3320 = vmatpush1.bf16.msra.mxu1 %v4122_v17 }
 0x86f   :  { %3290 = vmatprep.subr.bf16.mxu0 %v4110_v13  ;;  %3322 = vmatprep.subr.bf16.mxu1 %v4128_v19 }
 0x872   :  { %3292 = vmatpush1.bf16.msra.mxu0 %v4148_v25  ;;  %3324 = vmatpush1.bf16.msra.mxu1 %v4160_v29 }
 0x873   :  { %3294 = vmatprep.subr.bf16.mxu0 %v4151_v26  ;;  %3326 = vmatprep.subr.bf16.mxu1 %v4169_v32 }
 0x876   :  { %3296 = vmatpush1.bf16.msra.mxu0 %v4189_v39  ;;  %3328 = vmatpush1.bf16.msra.mxu1 %v4201_v44 }
 0x877   :  { %3298 = vmatprep.subr.bf16.mxu0 %v4193_v40  ;;  %3330 = vmatprep.subr.bf16.mxu1 %v4210_v48 }
 0x87a   :  { %3300 = vmatpush1.bf16.msra.mxu0 %v4230_v57  ;;  %3332 = vmatpush1.bf16.msra.mxu1 %v4242_v61 }
 0x87b   :  { %3302 = vmatprep.subr.bf16.mxu0 %v4234_v58  ;;  %3334 = vmatprep.subr.bf16.mxu1 %v4248_v1 }
 0x87e   :  { %3304 = vmatpush1.bf16.msra.mxu0 %v4271_v11  ;;  %3336 = vmatpush1.bf16.msra.mxu1 %v4275_v14 }
 0x87f   :  { %3306 = vmatprep.subr.bf16.mxu0 %v4277_v15  ;;  %3338 = vmatprep.subr.bf16.mxu1 %v4286_v20 }
 0x882   :  { %3308 = vmatpush1.bf16.msra.mxu0 %v4300_v24  ;;  %3340 = vmatpush1.bf16.msra.mxu1 %v4304_v27 }
 0x883   :  { %3342 = vmatprep.subr.bf16.mxu0 %v3995_v38  ;;  %3374 = vmatprep.subr.bf16.mxu1 %v4006_v42 }
 0x938   :  { %v1965_v28 = vpop.f32.mrb[16].mxu0  ;;  %v2036_v30 = vpop.f32.mrb[16].mxu1 }
 0x939   :  { %v3485_v31 = vadd.f32 %v1965_v28, %v4372_v43  ;;  %v1967_v33 = vpop.f32.mrb[17].mxu0  ;;  %v2038_v34 = vpop.f32.mrb[17].mxu1  ;;  %v3509_v53 = vadd.f32 %v2036_v30, %v4381_v8 }
 0x93a   :  { %v3486_v35 = vadd.f32 %v1967_v33, %v4374_v45  ;;  %v3510_v51 = vadd.f32 %v2038_v34, %v4378_v2 }
 0x93b   :  { %v2625_v36 = vmul.f32 -1.442695, %v3485_v31 }
 0x93c   :  { %v2626_v49 = vmul.f32 -1.442695, %v3486_v35  ;;  %v2627_v52 = vmul.f32 -1.442695, %v3510_v51 }
 0x93d   :  { %3694 = vpow2.f32 %v2625_v36 }
 0x93e   :  { %3696 = vpow2.f32 %v2626_v49 }
 0x93f   :  { %3698 = vpow2.f32 %v2627_v52 }
 0x940   :  { %3700 = vtanh.f32 %v3509_v53 }
 0x947   :  { %v3695_v55 = vpop.eup %3694 }
 0x948   :  { %v3697_v59 = vpop.eup %3696  ;;  %v2048_v60 = vadd.f32 1.0, %v3695_v55 }
 0x949   :  { %v2054_v0 = vadd.f32 1.0, %v3697_v59  ;;  %v3699_v5 = vpop.eup %3698 }
 0x94a   :  { %3702 = vrcp.f32 %v2048_v60  ;;  %v3701_v7 = vpop.eup %3700  ;;  %v2061_v18 = vadd.f32 1.0, %v3699_v5 }
 0x94b   :  { %3704 = vrcp.f32 %v2054_v0 }
 0x94c   :  { %3706 = vrcp.f32 %v2061_v18 }
 0x954   :  { %v3703_v9 = vpop.eup %3702 }
 0x955   :  { %v3705_v10 = vpop.eup %3704  ;;  %v2065_v16 = vmul.f32 %v3703_v9, %v3701_v7 }
 0x956   :  { %v2064_v21 = vmul.f32 %v3705_v10, %v4678_v23  ;;  %v3707_v37 = vpop.eup %3706 }
 0x958   :  { %v4720_v22 = vadd.f32 %v2065_v16, %v2064_v21 }
 0x95a   :  { %3708 = vtanh.f32 %v4720_v22 }
 0x964   :  { %v3709_v41 = vpop.eup %3708 }
 0x965   :  { %v2068_v46 = vmul.f32 %v3709_v41, %v3707_v37 }
 0x967   :  { %2138 = vmatmul.mubr.f32.vlgmr.msra.gmra.mrb[18].mxu0 %v2068_v46  ;;  %2209 = vmatmul.mubr.f32.vlgmr.msra.gmra.mrb[18].mxu1 %v2068_v46 }
 0x968   :  { %3344 = vmatpush1.bf16.msra.mxu0 %v4020_v47  ;;  %3376 = vmatpush1.bf16.msra.mxu1 %v4041_v54 }
 0x969   :  { %3346 = vmatprep.subr.bf16.mxu0 %v4029_v50  ;;  %3378 = vmatprep.subr.bf16.mxu1 %v4046_v56 }
 0x96a   :  { %2311 = vmatprep.mubr.f32.mxu0 %v3758_v3  ;;  %2382 = vmatprep.mubr.f32.mxu1 %v3758_v3 }
 0x96c   :  { %3348 = vmatpush1.bf16.msra.mxu0 %v4066_v62  ;;  %3380 = vmatpush1.bf16.msra.mxu1 %v4081_v4 }
 0x96d   :  { %3350 = vmatprep.subr.bf16.mxu0 %v4069_v63  ;;  %3382 = vmatprep.subr.bf16.mxu1 %v4087_v6 }
 0x970   :  { %3352 = vmatpush1.bf16.msra.mxu0 %v4107_v12  ;;  %3384 = vmatpush1.bf16.msra.mxu1 %v4122_v17 }
 0x971   :  { %3354 = vmatprep.subr.bf16.mxu0 %v4110_v13  ;;  %3386 = vmatprep.subr.bf16.mxu1 %v4128_v19 }
 0x974   :  { %3356 = vmatpush1.bf16.msra.mxu0 %v4148_v25  ;;  %3388 = vmatpush1.bf16.msra.mxu1 %v4160_v29 }
 0x975   :  { %3358 = vmatprep.subr.bf16.mxu0 %v4151_v26  ;;  %3390 = vmatprep.subr.bf16.mxu1 %v4169_v32 }
 0x978   :  { %3360 = vmatpush1.bf16.msra.mxu0 %v4189_v39  ;;  %3392 = vmatpush1.bf16.msra.mxu1 %v4201_v44 }
 0x979   :  { %3362 = vmatprep.subr.bf16.mxu0 %v4193_v40  ;;  %3394 = vmatprep.subr.bf16.mxu1 %v4210_v48 }
 0x97c   :  { %3364 = vmatpush1.bf16.msra.mxu0 %v4230_v57  ;;  %3396 = vmatpush1.bf16.msra.mxu1 %v4242_v61 }
 0x97d   :  { %3366 = vmatprep.subr.bf16.mxu0 %v4234_v58  ;;  %3398 = vmatprep.subr.bf16.mxu1 %v4248_v1 }
 0x980   :  { %3368 = vmatpush1.bf16.msra.mxu0 %v4271_v11  ;;  %3400 = vmatpush1.bf16.msra.mxu1 %v4275_v14 }
 0x981   :  { %3370 = vmatprep.subr.bf16.mxu0 %v4277_v15  ;;  %3402 = vmatprep.subr.bf16.mxu1 %v4286_v20 }
 0x984   :  { %3372 = vmatpush1.bf16.msra.mxu0 %v4300_v24  ;;  %3404 = vmatpush1.bf16.msra.mxu1 %v4304_v27 }
 0x985   :  { %3406 = vmatprep.subr.bf16.mxu0 %v3995_v38  ;;  %3438 = vmatprep.subr.bf16.mxu1 %v4006_v42 }
 0xa3a   :  { %v2139_v23 = vpop.f32.mrb[18].mxu0  ;;  %v2210_v28 = vpop.f32.mrb[18].mxu1 }
 0xa3b   :  { %v3487_v30 = vadd.f32 %v2139_v23, %v4372_v43  ;;  %v2141_v31 = vpop.f32.mrb[19].mxu0  ;;  %v2212_v33 = vpop.f32.mrb[19].mxu1  ;;  %v3511_v52 = vadd.f32 %v2210_v28, %v4381_v8 }
 0xa3c   :  { %v3488_v34 = vadd.f32 %v2141_v31, %v4374_v45  ;;  %v3512_v49 = vadd.f32 %v2212_v33, %v4378_v2 }
 0xa3d   :  { %v2628_v35 = vmul.f32 -1.442695, %v3487_v30 }
 0xa3e   :  { %v2629_v36 = vmul.f32 -1.442695, %v3488_v34  ;;  %v2630_v51 = vmul.f32 -1.442695, %v3512_v49 }
 0xa3f   :  { %3710 = vpow2.f32 %v2628_v35 }
 0xa40   :  { %3712 = vpow2.f32 %v2629_v36 }
 0xa41   :  { %3714 = vpow2.f32 %v2630_v51 }
 0xa42   :  { %3716 = vtanh.f32 %v3511_v52 }
 0xa49   :  { %v3711_v38 = vpop.eup %3710 }
 0xa4a   :  { %v3713_v53 = vpop.eup %3712  ;;  %v2222_v42 = vadd.f32 1.0, %v3711_v38 }
 0xa4b   :  { %v2228_v55 = vadd.f32 1.0, %v3713_v53  ;;  %v3715_v59 = vpop.eup %3714 }
 0xa4c   :  { %3718 = vrcp.f32 %v2222_v42  ;;  %v3717_v60 = vpop.eup %3716  ;;  %v2235_v9 = vadd.f32 1.0, %v3715_v59 }
 0xa4d   :  { %3720 = vrcp.f32 %v2228_v55 }
 0xa4e   :  { %3722 = vrcp.f32 %v2235_v9 }
 0xa56   :  { %v3719_v0 = vpop.eup %3718 }
 0xa57   :  { %v3721_v5 = vpop.eup %3720  ;;  %v2239_v7 = vmul.f32 %v3719_v0, %v3717_v60 }
 0xa58   :  { %v2238_v10 = vmul.f32 %v3721_v5, %v4720_v22  ;;  %v3723_v18 = vpop.eup %3722 }
 0xa5a   :  { %v4762_v16 = vadd.f32 %v2239_v7, %v2238_v10 }
 0xa5c   :  { %3724 = vtanh.f32 %v4762_v16 }
 0xa66   :  { %v3725_v21 = vpop.eup %3724 }
 0xa67   :  { %v2242_v37 = vmul.f32 %v3725_v21, %v3723_v18 }
 0xa69   :  { %2312 = vmatmul.mubr.f32.vlgmr.msra.gmra.mrb[20].mxu0 %v2242_v37  ;;  %2383 = vmatmul.mubr.f32.vlgmr.msra.gmra.mrb[20].mxu1 %v2242_v37 }
 0xa6a   :  { %3408 = vmatpush1.bf16.msra.mxu0 %v4020_v47  ;;  %3440 = vmatpush1.bf16.msra.mxu1 %v4041_v54 }
 0xa6b   :  { %3410 = vmatprep.subr.bf16.mxu0 %v4029_v50  ;;  %3442 = vmatprep.subr.bf16.mxu1 %v4046_v56 }
 0xa6c   :  { %2485 = vmatprep.mubr.f32.mxu0 %v3758_v3  ;;  %2556 = vmatprep.mubr.f32.mxu1 %v3758_v3 }
 0xa6e   :  { %3412 = vmatpush1.bf16.msra.mxu0 %v4066_v62  ;;  %3444 = vmatpush1.bf16.msra.mxu1 %v4081_v4 }
 0xa6f   :  { %3414 = vmatprep.subr.bf16.mxu0 %v4069_v63  ;;  %3446 = vmatprep.subr.bf16.mxu1 %v4087_v6 }
 0xa72   :  { %3416 = vmatpush1.bf16.msra.mxu0 %v4107_v12  ;;  %3448 = vmatpush1.bf16.msra.mxu1 %v4122_v17 }
 0xa73   :  { %3418 = vmatprep.subr.bf16.mxu0 %v4110_v13  ;;  %3450 = vmatprep.subr.bf16.mxu1 %v4128_v19 }
 0xa76   :  { %3420 = vmatpush1.bf16.msra.mxu0 %v4148_v25  ;;  %3452 = vmatpush1.bf16.msra.mxu1 %v4160_v29 }
 0xa77   :  { %3422 = vmatprep.subr.bf16.mxu0 %v4151_v26  ;;  %3454 = vmatprep.subr.bf16.mxu1 %v4169_v32 }
 0xa7a   :  { %3424 = vmatpush1.bf16.msra.mxu0 %v4189_v39  ;;  %3456 = vmatpush1.bf16.msra.mxu1 %v4201_v44 }
 0xa7b   :  { %3426 = vmatprep.subr.bf16.mxu0 %v4193_v40  ;;  %3458 = vmatprep.subr.bf16.mxu1 %v4210_v48 }
 0xa7e   :  { %3428 = vmatpush1.bf16.msra.mxu0 %v4230_v57  ;;  %3460 = vmatpush1.bf16.msra.mxu1 %v4242_v61 }
 0xa7f   :  { %3430 = vmatprep.subr.bf16.mxu0 %v4234_v58  ;;  %3462 = vmatprep.subr.bf16.mxu1 %v4248_v1 }
 0xa82   :  { %3432 = vmatpush1.bf16.msra.mxu0 %v4271_v11  ;;  %3464 = vmatpush1.bf16.msra.mxu1 %v4275_v14 }
 0xa83   :  { %3434 = vmatprep.subr.bf16.mxu0 %v4277_v15  ;;  %3466 = vmatprep.subr.bf16.mxu1 %v4286_v20 }
 0xa86   :  { %3436 = vmatpush1.bf16.msra.mxu0 %v4300_v24  ;;  %3468 = vmatpush1.bf16.msra.mxu1 %v4304_v27 }
 0xb3c   :  { %v2313_v3 = vpop.f32.mrb[20].mxu0  ;;  %v2384_v47 = vpop.f32.mrb[20].mxu1 }
 0xb3d   :  { %v3489_v50 = vadd.f32 %v2313_v3, %v4372_v43  ;;  %v2315_v54 = vpop.f32.mrb[21].mxu0  ;;  %v2386_v56 = vpop.f32.mrb[21].mxu1  ;;  %v3513_v13 = vadd.f32 %v2384_v47, %v4381_v8 }
 0xb3e   :  { %v3490_v62 = vadd.f32 %v2315_v54, %v4374_v45  ;;  %v3514_v6 = vadd.f32 %v2386_v56, %v4378_v2 }
 0xb3f   :  { %v2631_v63 = vmul.f32 -1.442695, %v3489_v50 }
 0xb40   :  { %v2632_v4 = vmul.f32 -1.442695, %v3490_v62  ;;  %v2633_v12 = vmul.f32 -1.442695, %v3514_v6 }
 0xb41   :  { %3726 = vpow2.f32 %v2631_v63 }
 0xb42   :  { %3728 = vpow2.f32 %v2632_v4 }
 0xb43   :  { %3730 = vpow2.f32 %v2633_v12 }
 0xb44   :  { %3732 = vtanh.f32 %v3513_v13 }
 0xb4b   :  { %v3727_v17 = vpop.eup %3726 }
 0xb4c   :  { %v3729_v19 = vpop.eup %3728  ;;  %v2396_v25 = vadd.f32 1.0, %v3727_v17 }
 0xb4d   :  { %v2402_v26 = vadd.f32 1.0, %v3729_v19  ;;  %v3731_v29 = vpop.eup %3730 }
 0xb4e   :  { %3734 = vrcp.f32 %v2396_v25  ;;  %v3733_v32 = vpop.eup %3732  ;;  %v2409_v48 = vadd.f32 1.0, %v3731_v29 }
 0xb4f   :  { %3736 = vrcp.f32 %v2402_v26 }
 0xb50   :  { %3738 = vrcp.f32 %v2409_v48 }
 0xb58   :  { %v3735_v39 = vpop.eup %3734 }
 0xb59   :  { %v3737_v40 = vpop.eup %3736  ;;  %v2413_v44 = vmul.f32 %v3735_v39, %v3733_v32 }
 0xb5a   :  { %v2412_v57 = vmul.f32 %v3737_v40, %v4762_v16  ;;  %v3739_v61 = vpop.eup %3738 }
 0xb5c   :  { %v2414_v58 = vadd.f32 %v2413_v44, %v2412_v57 }
 0xb5e   :  { %3740 = vtanh.f32 %v2414_v58 }
 0xb68   :  { %v3741_v1 = vpop.eup %3740 }
 0xb69   :  { %v2416_v11 = vmul.f32 %v3741_v1, %v3739_v61 }
 0xb6b   :  { %2486 = vmatmul.mubr.f32.vlgmr.msra.gmra.mrb[22].mxu0 %v2416_v11  ;;  %2557 = vmatmul.mubr.f32.vlgmr.msra.gmra.mrb[22].mxu1 %v2416_v11 }
 0xc3e   :  { %v2487_v14 = vpop.f32.mrb[22].mxu0  ;;  %v2558_v15 = vpop.f32.mrb[22].mxu1 }
 0xc3f   :  { %v3491_v20 = vadd.f32 %v2487_v14, %v4372_v43  ;;  %v2489_v24 = vpop.f32.mrb[23].mxu0  ;;  %v2560_v27 = vpop.f32.mrb[23].mxu1  ;;  %v3515_v30 = vadd.f32 %v2558_v15, %v4381_v8 }
 0xc40   :  { %v3492_v22 = vadd.f32 %v2489_v24, %v4374_v45  ;;  %v3516_v23 = vadd.f32 %v2560_v27, %v4378_v2 }
 0xc41   :  { %v2634_v41 = vmul.f32 -1.442695, %v3491_v20 }
 0xc42   :  { %v2635_v46 = vmul.f32 -1.442695, %v3492_v22  ;;  %v2636_v28 = vmul.f32 -1.442695, %v3516_v23 }
 0xc43   :  { %3742 = vpow2.f32 %v2634_v41 }
 0xc44   :  { %3744 = vpow2.f32 %v2635_v46 }
 0xc45   :  { %3746 = vpow2.f32 %v2636_v28 }
 0xc46   :  { %3748 = vtanh.f32 %v3515_v30 }
 0xc4d   :  { %v3743_v31 = vpop.eup %3742 }
 0xc4e   :  { %v3745_v33 = vpop.eup %3744  ;;  %v2570_v34 = vadd.f32 1.0, %v3743_v31 }
 0xc4f   :  { %v2576_v35 = vadd.f32 1.0, %v3745_v33  ;;  %v3747_v43 = vpop.eup %3746 }
 0xc50   :  { %3750 = vrcp.f32 %v2570_v34  ;;  %v3749_v36 = vpop.eup %3748  ;;  %v2583_v52 = vadd.f32 1.0, %v3747_v43 }
 0xc51   :  { %3752 = vrcp.f32 %v2576_v35 }
 0xc52   :  { %3754 = vrcp.f32 %v2583_v52 }
 0xc5a   :  { %v3751_v45 = vpop.eup %3750 }
 0xc5b   :  { %v3753_v49 = vpop.eup %3752  ;;  %v2587_v51 = vmul.f32 %v3751_v45, %v3749_v36 }
 0xc5c   :  { %v2586_v38 = vmul.f32 %v3753_v49, %v2414_v58  ;;  %v3755_v2 = vpop.eup %3754 }
 0xc5e   :  { %v2588_v53 = vadd.f32 %v2587_v51, %v2586_v38 }
 0xc60   :  { %3756 = vtanh.f32 %v2588_v53  ;;  %2592 = vst [vmem:[%s4816_s5] sm:$0xff] %v2588_v53 }
 0xc6a   :  { %v3757_v8 = vpop.eup %3756 }
 0xc6b   :  { %v2590_v42 = vmul.f32 %v3757_v8, %v3755_v2 }
 0xc6d   :  { %2591 = vst [vmem:[%s4817_s4] sm:$0xff] %v2590_v42 }

</bundles_post_ra>
